<compile_context>
chip_gen: v5e
topology: v5e:2x2
jax: 0.10.0
libtpu: 0.0.40
codegen_flags: <defaults>
</compile_context>

<pallas_src>
import numpy as np

import jax
import jax.numpy as jnp
from jax.experimental import pallas as pl
from jax.experimental.pallas import tpu as pltpu  # noqa: F401  (TPU backend)

# ---------------- small config (consistent with the module's __init__) -------
IMG_SIZE = 16
PATCH = 4
IN_CHANS = 4
EMBED_DIM = 32
ENC_DEPTH = 2
ENC_HEADS = 4
DEC_DEPTH = 1
DEC_HEADS = 4
MLP_RATIO = 4
PROJ_DIM = 16
LN_EPS = 1e-5   # nn.LayerNorm default
BN_EPS = 1e-5   # nn.BatchNorm1d default
NEG_INF = -1e9  # additive mask value (exp underflows to exactly 0 in f32)

NUM_PATCHES = (IMG_SIZE // PATCH) ** 2

BLOCK_PARAM_NAMES = ('ln1_w', 'ln1_b', 'qkv_w', 'qkv_b', 'proj_w', 'proj_b',
                     'ln2_w', 'ln2_b', 'fc1_w', 'fc1_b', 'fc2_w', 'fc2_b')


# ---------------- in-kernel helpers -----------------------------------------
def _layernorm(x, w, b):
    mu = jnp.mean(x, axis=-1, keepdims=True)
    var = jnp.mean((x - mu) ** 2, axis=-1, keepdims=True)
    return (x - mu) * jax.lax.rsqrt(var + LN_EPS) * w + b


def _gelu(x):
    # exact GELU (matches nn.GELU default): 0.5 * x * (1 + erf(x / sqrt(2)))
    return 0.5 * x * (1.0 + jax.lax.erf(x * np.float32(1.0 / np.sqrt(2.0))))


def _vit_block(x, w, mask, num_heads):
    """One pre-norm ViT block on a flat [T, D] token slab.

    `mask` is an additive [T, T] block-diagonal mask (0 within a sample,
    NEG_INF across samples) so attention never mixes batch elements.
    """
    (ln1w, ln1b, qkvw, qkvb, projw, projb,
     ln2w, ln2b, fc1w, fc1b, fc2w, fc2b) = w
    T, D = x.shape
    dh = D // num_heads
    scale = np.float32(dh ** -0.5)        # timm Attention: head_dim ** -0.5

    # --- attention branch ---
    h = _layernorm(x, ln1w, ln1b)
    qkv = jnp.dot(h, qkvw, preferred_element_type=jnp.float32) + qkvb   # [T, 3D]

    heads = []
    for hh in range(num_heads):
        q = qkv[:, hh * dh:(hh + 1) * dh]
        k = qkv[:, D + hh * dh:D + (hh + 1) * dh]
        v = qkv[:, 2 * D + hh * dh:2 * D + (hh + 1) * dh]
        # q @ k^T without materializing a transpose (NT dot_general)
        s = jax.lax.dot_general(q, k, (((1,), (1,)), ((), ())),
                                preferred_element_type=jnp.float32)
        s = s * scale + mask
        s = s - jnp.max(s, axis=-1, keepdims=True)
        e = jnp.exp(s)
        p_attn = e * pl.reciprocal(jnp.sum(e, axis=-1, keepdims=True), approx=True)
        heads.append(jnp.dot(p_attn, v, preferred_element_type=jnp.float32))
    attn = jnp.concatenate(heads, axis=-1)                               # [T, D]
    attn = jnp.dot(attn, projw, preferred_element_type=jnp.float32) + projb
    x = x + attn                           # drop_path / dropout rates are 0.0

    # --- MLP branch ---
    h2 = _layernorm(x, ln2w, ln2b)
    m = _gelu(jnp.dot(h2, fc1w, preferred_element_type=jnp.float32) + fc1b)
    m = jnp.dot(m, fc2w, preferred_element_type=jnp.float32) + fc2b
    return x + m


# ---------------- the single fused Pallas kernel ------------------------------
def fused_forward_kernel(patches_ref, posadd_ref, cls_ref,
                         scat_tok_ref, cls_ind_ref,
                         mask_enc_ref, mask_dec_ref,
                         sel_cls_ref, sel_patch_ref,
                         patch_w_ref, patch_b_ref,
                         *rest):
    nb = len(BLOCK_PARAM_NAMES)
    enc_refs = rest[0:nb]                              # each stacked [ENC_DEPTH, ...]
    dec_refs = rest[nb:2 * nb]                         # each stacked [DEC_DEPTH, ...]
    (norm_w_ref, norm_b_ref,
     ph_w1_ref, ph_b1_ref, ph_bnw_ref, ph_bnb_ref,
     ph_w2_ref, ph_b2_ref) = rest[2 * nb:2 * nb + 8]
    latent_ref, pos_pred_ref, proj_ref = rest[2 * nb + 8:]

    # 1) patch embedding (Conv2d k=s=P == matmul) + (shuffled) positional embed
    xv = (jnp.dot(patches_ref[...], patch_w_ref[...],
                  preferred_element_type=jnp.float32)
          + patch_b_ref[...] + posadd_ref[...])                        # [B*V, D]

    # 2) interleave cls tokens into row layout [cls_0, p_0.., cls_1, p_1..]
    #    via a constant 0/1 scatter matmul (MXU) — no sublane concatenation.
    x = (jnp.dot(scat_tok_ref[...], xv, preferred_element_type=jnp.float32)
         + cls_ind_ref[...] * cls_ref[...])                            # [B*S, D]

    # 3) encoder blocks (statically unrolled over depth)
    mask_e = mask_enc_ref[...]
    for d in range(ENC_DEPTH):
        w = tuple(r[d] for r in enc_refs)
        x = _vit_block(x, w, mask_e, ENC_HEADS)

    lat = _layernorm(x, norm_w_ref[...], norm_b_ref[...])              # [B*S, D]
    latent_ref[...] = lat

    # 4) projection head on cls tokens (BatchNorm1d with batch statistics)
    cls_x = jnp.dot(sel_cls_ref[...], lat, preferred_element_type=jnp.float32)  # [B, D]
    h = jnp.dot(cls_x, ph_w1_ref[...], preferred_element_type=jnp.float32) + ph_b1_ref[...]
    mu = jnp.mean(h, axis=0, keepdims=True)
    var = jnp.mean((h - mu) ** 2, axis=0, keepdims=True)   # biased, as BN uses
    h = (h - mu) * jax.lax.rsqrt(var + BN_EPS) * ph_bnw_ref[...] + ph_bnb_ref[...]
    h = _gelu(h)
    proj_ref[...] = (jnp.dot(h, ph_w2_ref[...], preferred_element_type=jnp.float32)
                     + ph_b2_ref[...])

    # 5) positional decoder on patch tokens
    y = jnp.dot(sel_patch_ref[...], lat, preferred_element_type=jnp.float32)     # [B*V, D]
    mask_d = mask_dec_ref[...]
    for d in range(DEC_DEPTH):
        w = tuple(r[d] for r in dec_refs)
        y = _vit_block(y, w, mask_d, DEC_HEADS)
    pos_pred_ref[...] = y


# ---------------- wrapper around the fused kernel ------------------------------
def _block_diag_mask(n_groups, group_len):
    t = n_groups * group_len
    g = np.arange(t) // group_len
    return np.where(g[:, None] == g[None, :], 0.0, NEG_INF).astype(np.float32)


def _build_layout_constants(B, V):
    """Constant 0/1 scatter / select matrices and attention masks."""
    S = V + 1
    Te, Td = B * S, B * V
    scat = np.zeros((Te, Td), np.float32)       # visible-token rows -> token rows
    cls_ind = np.zeros((Te, 1), np.float32)     # 1.0 on cls rows
    sel_cls = np.zeros((B, Te), np.float32)     # pick cls rows
    sel_patch = np.zeros((Td, Te), np.float32)  # pick patch rows
    for b in range(B):
        cls_ind[b * S, 0] = 1.0
        sel_cls[b, b * S] = 1.0
        for j in range(V):
            scat[b * S + 1 + j, b * V + j] = 1.0
            sel_patch[b * V + j, b * S + 1 + j] = 1.0
    return (scat, cls_ind, sel_cls, sel_patch,
            _block_diag_mask(B, S), _block_diag_mask(B, V))


def fused_forward_pallas(patches2d, pos2d, params, B, V):
    D = EMBED_DIM
    S = V + 1
    Te, Td = B * S, B * V

    scat, cls_ind, sel_cls, sel_patch, mask_enc, mask_dec = _build_layout_constants(B, V)

    enc_stacked = [jnp.stack([blk[n] for blk in params['enc_blocks']], axis=0)
                   for n in BLOCK_PARAM_NAMES]
    dec_stacked = [jnp.stack([blk[n] for blk in params['dec_blocks']], axis=0)
                   for n in BLOCK_PARAM_NAMES]

    out_shape = (
        jax.ShapeDtypeStruct((Te, D), jnp.float32),       # latent, flat tokens
        jax.ShapeDtypeStruct((Td, D), jnp.float32),       # pos_pred, flat patch tokens
        jax.ShapeDtypeStruct((B, PROJ_DIM), jnp.float32),  # projection
    )

    # No grid: single invocation, every operand is a full-array VMEM block.
    latent2d, pos_pred2d, proj = pl.pallas_call(
        fused_forward_kernel,
        out_shape=out_shape,
    )(patches2d, pos2d,
      params['cls_token'].reshape(1, D),
      jnp.asarray(scat), jnp.asarray(cls_ind),
      jnp.asarray(mask_enc), jnp.asarray(mask_dec),
      jnp.asarray(sel_cls), jnp.asarray(sel_patch),
      params['patch_w'], params['patch_b'],
      *enc_stacked, *dec_stacked,
      params['norm_w'], params['norm_b'],
      params['ph_w1'], params['ph_b1'], params['ph_bn_w'], params['ph_bn_b'],
      params['ph_w2'], params['ph_b2'])

    return (latent2d.reshape(B, S, D), pos_pred2d.reshape(B, V, D), proj)


# ---------------- parameter init (deterministic, shapes per __init__) --------
def get_2d_sincos_pos_embed(embed_dim, grid_size):
    def _1d(dim, pos):
        omega = np.arange(dim // 2, dtype=np.float64) / (dim / 2.0)
        omega = 1.0 / 10000 ** omega
        out = np.einsum('m,d->md', pos.reshape(-1), omega)
        return np.concatenate([np.sin(out), np.cos(out)], axis=1)

    grid_h = np.arange(grid_size, dtype=np.float32)
    grid_w = np.arange(grid_size, dtype=np.float32)
    grid = np.meshgrid(grid_w, grid_h)           # w goes first (MAE convention)
    grid = np.stack(grid, axis=0).reshape([2, 1, grid_size, grid_size])
    emb_h = _1d(embed_dim // 2, grid[0])
    emb_w = _1d(embed_dim // 2, grid[1])
    return np.concatenate([emb_h, emb_w], axis=1)   # [grid*grid, embed_dim]


def xavier(key, fan_in, fan_out, shape):
    bound = float(np.sqrt(6.0 / (fan_in + fan_out)))
    return jax.random.uniform(key, shape, jnp.float32, -bound, bound)


def init_block(keys, D):
    Hm = D * MLP_RATIO
    return {
        'ln1_w': jnp.ones((1, D), jnp.float32), 'ln1_b': jnp.zeros((1, D), jnp.float32),
        'qkv_w': xavier(next(keys), D, 3 * D, (D, 3 * D)),
        'qkv_b': jnp.zeros((1, 3 * D), jnp.float32),
        'proj_w': xavier(next(keys), D, D, (D, D)),
        'proj_b': jnp.zeros((1, D), jnp.float32),
        'ln2_w': jnp.ones((1, D), jnp.float32), 'ln2_b': jnp.zeros((1, D), jnp.float32),
        'fc1_w': xavier(next(keys), D, Hm, (D, Hm)),
        'fc1_b': jnp.zeros((1, Hm), jnp.float32),
        'fc2_w': xavier(next(keys), Hm, D, (Hm, D)),
        'fc2_b': jnp.zeros((1, D), jnp.float32),
    }


def init_params(key):
    D = EMBED_DIM
    K = IN_CHANS * PATCH * PATCH
    keys = iter(jax.random.split(key, 64))
    params = {
        # conv weight viewed as (D, K) gets xavier; we store its transpose (K, D)
        'patch_w': xavier(next(keys), K, D, (K, D)),
        'patch_b': jnp.zeros((1, D), jnp.float32),
        'cls_token': 0.02 * jax.random.normal(next(keys), (1, 1, D), jnp.float32),
        'pos_embed': jnp.asarray(
            get_2d_sincos_pos_embed(D, int(NUM_PATCHES ** 0.5)), jnp.float32)[None],
        'norm_w': jnp.ones((1, D), jnp.float32),
        'norm_b': jnp.zeros((1, D), jnp.float32),
        'enc_blocks': [init_block(keys, D) for _ in range(ENC_DEPTH)],
        'dec_blocks': [init_block(keys, D) for _ in range(DEC_DEPTH)],
        'ph_w1': xavier(next(keys), D, D, (D, D)),
        'ph_b1': jnp.zeros((1, D), jnp.float32),
        'ph_bn_w': jnp.ones((1, D), jnp.float32),
        'ph_bn_b': jnp.zeros((1, D), jnp.float32),
        'ph_w2': xavier(next(keys), D, PROJ_DIM, (D, PROJ_DIM)),
        'ph_b2': jnp.zeros((1, PROJ_DIM), jnp.float32),
    }
    return params


# ---------------- forward (pretrain path, target_network=False) --------------
def forward(img, params, key, position=True, shuffle=True, mask_ratio=0.75):
    B, C, H, W = img.shape
    P = PATCH
    gh, gw = H // P, W // P
    N = gh * gw
    D = EMBED_DIM
    K = C * P * P

    # patchify (Conv2d k=s=P == patchify + matmul; matmul is in the kernel)
    patches = (img.reshape(B, C, gh, P, gw, P)
               .transpose(0, 2, 4, 1, 3, 5)
               .reshape(B, N, K))

    k_shuf, k_mask = jax.random.split(key)

    # positional embedding per token (optionally randomly shuffled per sample);
    # the add itself happens inside the fused kernel.
    if position:
        if shuffle:
            noise = jax.random.uniform(k_shuf, (B, N))
            sidx = jnp.argsort(noise, axis=1)
            bpe = jnp.broadcast_to(params['pos_embed'], (B, N, D))
            pos_tok = jnp.take_along_axis(bpe, sidx[:, :, None], axis=1)
        else:
            pos_tok = jnp.broadcast_to(params['pos_embed'], (B, N, D))
    else:
        pos_tok = jnp.zeros((B, N, D), jnp.float32)

    # random masking: keep first int(N*(1-mask_ratio)) of a random permutation.
    # Since the patch embedding is per-token, masking the raw patches before
    # the embedding is mathematically identical to masking afterwards.
    if mask_ratio > 0:
        noise2 = jax.random.uniform(k_mask, (B, N))
        midx = jnp.argsort(noise2, axis=1)
        V = int(N * (1 - mask_ratio))
        vis = midx[:, :V]
        patches_vis = jnp.take_along_axis(patches, vis[:, :, None], axis=1)
        pos_vis = jnp.take_along_axis(pos_tok, vis[:, :, None], axis=1)
        vis_ids = jnp.broadcast_to(vis[:, :, None], (B, V, D))
    else:
        V = N
        patches_vis = patches
        pos_vis = pos_tok
        vis_ids = None

    latent, pos_pred, proj = fused_forward_pallas(
        patches_vis.reshape(B * V, K), pos_vis.reshape(B * V, D), params, B, V)

    return latent, pos_pred, vis_ids, proj


# ---------------- main --------------------------------------------------------
if __name__ == "__main__":
    root = jax.random.PRNGKey(0)
    k_img, k_param, k_fwd = jax.random.split(root, 3)

    img = jax.random.normal(k_img, (2, IN_CHANS, IMG_SIZE, IMG_SIZE), jnp.float32)
    params = init_params(k_param)

    fwd = jax.jit(forward)   # defaults: position=True, shuffle=True, mask_ratio=0.75
    latent, pos_pred, vis_ids, proj = fwd(img, params, k_fwd)
    jax.block_until_ready((latent, pos_pred, vis_ids, proj))

    vis_len = int(NUM_PATCHES * 0.25)
    assert latent.shape == (2, 1 + vis_len, EMBED_DIM)
    assert pos_pred.shape == (2, vis_len, EMBED_DIM)
    assert vis_ids.shape == (2, vis_len, EMBED_DIM)
    assert proj.shape == (2, PROJ_DIM)
    assert bool(jnp.all(jnp.isfinite(latent)))
    assert bool(jnp.all(jnp.isfinite(pos_pred)))
    assert bool(jnp.all(jnp.isfinite(proj)))

    print("KERNEL_OK")
</pallas_src>

<mosaic_0001>
module attributes {stable_mosaic.version = 11 : i64} {
  func.func @fused_forward_kernel(%arg0: memref<8x64xf32, #tpu.memory_space<vmem>>, %arg1: memref<8x32xf32, #tpu.memory_space<vmem>>, %arg2: memref<1x32xf32, #tpu.memory_space<vmem>>, %arg3: memref<10x8xf32, #tpu.memory_space<vmem>>, %arg4: memref<10x1xf32, #tpu.memory_space<vmem>>, %arg5: memref<10x10xf32, #tpu.memory_space<vmem>>, %arg6: memref<8x8xf32, #tpu.memory_space<vmem>>, %arg7: memref<2x10xf32, #tpu.memory_space<vmem>>, %arg8: memref<8x10xf32, #tpu.memory_space<vmem>>, %arg9: memref<64x32xf32, #tpu.memory_space<vmem>>, %arg10: memref<1x32xf32, #tpu.memory_space<vmem>>, %arg11: memref<2x1x32xf32, #tpu.memory_space<vmem>>, %arg12: memref<2x1x32xf32, #tpu.memory_space<vmem>>, %arg13: memref<2x32x96xf32, #tpu.memory_space<vmem>>, %arg14: memref<2x1x96xf32, #tpu.memory_space<vmem>>, %arg15: memref<2x32x32xf32, #tpu.memory_space<vmem>>, %arg16: memref<2x1x32xf32, #tpu.memory_space<vmem>>, %arg17: memref<2x1x32xf32, #tpu.memory_space<vmem>>, %arg18: memref<2x1x32xf32, #tpu.memory_space<vmem>>, %arg19: memref<2x32x128xf32, #tpu.memory_space<vmem>>, %arg20: memref<2x1x128xf32, #tpu.memory_space<vmem>>, %arg21: memref<2x128x32xf32, #tpu.memory_space<vmem>>, %arg22: memref<2x1x32xf32, #tpu.memory_space<vmem>>, %arg23: memref<1x1x32xf32, #tpu.memory_space<vmem>>, %arg24: memref<1x1x32xf32, #tpu.memory_space<vmem>>, %arg25: memref<1x32x96xf32, #tpu.memory_space<vmem>>, %arg26: memref<1x1x96xf32, #tpu.memory_space<vmem>>, %arg27: memref<1x32x32xf32, #tpu.memory_space<vmem>>, %arg28: memref<1x1x32xf32, #tpu.memory_space<vmem>>, %arg29: memref<1x1x32xf32, #tpu.memory_space<vmem>>, %arg30: memref<1x1x32xf32, #tpu.memory_space<vmem>>, %arg31: memref<1x32x128xf32, #tpu.memory_space<vmem>>, %arg32: memref<1x1x128xf32, #tpu.memory_space<vmem>>, %arg33: memref<1x128x32xf32, #tpu.memory_space<vmem>>, %arg34: memref<1x1x32xf32, #tpu.memory_space<vmem>>, %arg35: memref<1x32xf32, #tpu.memory_space<vmem>>, %arg36: memref<1x32xf32, #tpu.memory_space<vmem>>, %arg37: memref<32x32xf32, #tpu.memory_space<vmem>>, %arg38: memref<1x32xf32, #tpu.memory_space<vmem>>, %arg39: memref<1x32xf32, #tpu.memory_space<vmem>>, %arg40: memref<1x32xf32, #tpu.memory_space<vmem>>, %arg41: memref<32x16xf32, #tpu.memory_space<vmem>>, %arg42: memref<1x16xf32, #tpu.memory_space<vmem>>, %arg43: memref<10x32xf32, #tpu.memory_space<vmem>>, %arg44: memref<8x32xf32, #tpu.memory_space<vmem>>, %arg45: memref<2x16xf32, #tpu.memory_space<vmem>>) attributes {dimension_semantics = [], scalar_prefetch = 0 : i64, scratch_operands = 0 : i64, tpu.core_type = #tpu.core_type<tc>} {
    %c0 = arith.constant 0 : index
    %c0_0 = arith.constant 0 : index
    %0 = vector.load %arg0[%c0, %c0_0] : memref<8x64xf32, #tpu.memory_space<vmem>>, vector<8x64xf32>
    %c0_1 = arith.constant 0 : index
    %c0_2 = arith.constant 0 : index
    %1 = vector.load %arg9[%c0_1, %c0_2] : memref<64x32xf32, #tpu.memory_space<vmem>>, vector<64x32xf32>
    %cst = arith.constant dense<0.000000e+00> : vector<8x32xf32>
    %2 = tpu.matmul %0, %1, %cst {dimension_numbers = #tpu.dot_dimension_numbers<[1], [0], [0], [1], [0, 0, 1, 1], [], []>} : vector<8x64xf32>, vector<64x32xf32>, vector<8x32xf32> -> vector<8x32xf32>
    %c0_3 = arith.constant 0 : index
    %c0_4 = arith.constant 0 : index
    %3 = vector.load %arg10[%c0_3, %c0_4] : memref<1x32xf32, #tpu.memory_space<vmem>>, vector<1x32xf32>
    %4 = vector.broadcast %3 : vector<1x32xf32> to vector<8x32xf32>
    %5 = arith.addf %2, %4 : vector<8x32xf32>
    %c0_5 = arith.constant 0 : index
    %c0_6 = arith.constant 0 : index
    %6 = vector.load %arg1[%c0_5, %c0_6] : memref<8x32xf32, #tpu.memory_space<vmem>>, vector<8x32xf32>
    %7 = arith.addf %5, %6 : vector<8x32xf32>
    %c0_7 = arith.constant 0 : index
    %c0_8 = arith.constant 0 : index
    %8 = vector.load %arg3[%c0_7, %c0_8] : memref<10x8xf32, #tpu.memory_space<vmem>>, vector<10x8xf32>
    %cst_9 = arith.constant dense<0.000000e+00> : vector<10x32xf32>
    %9 = tpu.matmul %8, %7, %cst_9 {dimension_numbers = #tpu.dot_dimension_numbers<[1], [0], [0], [1], [0, 0, 1, 1], [], []>} : vector<10x8xf32>, vector<8x32xf32>, vector<10x32xf32> -> vector<10x32xf32>
    %c0_10 = arith.constant 0 : index
    %c0_11 = arith.constant 0 : index
    %10 = vector.load %arg4[%c0_10, %c0_11] : memref<10x1xf32, #tpu.memory_space<vmem>>, vector<10x1xf32>
    %c0_12 = arith.constant 0 : index
    %c0_13 = arith.constant 0 : index
    %11 = vector.load %arg2[%c0_12, %c0_13] : memref<1x32xf32, #tpu.memory_space<vmem>>, vector<1x32xf32>
    %12 = vector.broadcast %10 : vector<10x1xf32> to vector<10x32xf32>
    %13 = vector.broadcast %11 : vector<1x32xf32> to vector<10x32xf32>
    %14 = arith.mulf %12, %13 : vector<10x32xf32>
    %15 = arith.addf %9, %14 : vector<10x32xf32>
    %c0_14 = arith.constant 0 : index
    %c0_15 = arith.constant 0 : index
    %16 = vector.load %arg5[%c0_14, %c0_15] : memref<10x10xf32, #tpu.memory_space<vmem>>, vector<10x10xf32>
    %c0_16 = arith.constant 0 : index
    %c0_17 = arith.constant 0 : index
    %c0_18 = arith.constant 0 : index
    %17 = vector.load %arg11[%c0_16, %c0_17, %c0_18] : memref<2x1x32xf32, #tpu.memory_space<vmem>>, vector<1x1x32xf32>
    %18 = vector.shape_cast %17 : vector<1x1x32xf32> to vector<1x32xf32>
    %c0_19 = arith.constant 0 : index
    %c0_20 = arith.constant 0 : index
    %c0_21 = arith.constant 0 : index
    %19 = vector.load %arg12[%c0_19, %c0_20, %c0_21] : memref<2x1x32xf32, #tpu.memory_space<vmem>>, vector<1x1x32xf32>
    %20 = vector.shape_cast %19 : vector<1x1x32xf32> to vector<1x32xf32>
    %c0_22 = arith.constant 0 : index
    %c0_23 = arith.constant 0 : index
    %c0_24 = arith.constant 0 : index
    %21 = vector.load %arg13[%c0_22, %c0_23, %c0_24] : memref<2x32x96xf32, #tpu.memory_space<vmem>>, vector<1x32x96xf32>
    %22 = vector.shape_cast %21 : vector<1x32x96xf32> to vector<32x96xf32>
    %c0_25 = arith.constant 0 : index
    %c0_26 = arith.constant 0 : index
    %c0_27 = arith.constant 0 : index
    %23 = vector.load %arg14[%c0_25, %c0_26, %c0_27] : memref<2x1x96xf32, #tpu.memory_space<vmem>>, vector<1x1x96xf32>
    %24 = vector.shape_cast %23 : vector<1x1x96xf32> to vector<1x96xf32>
    %c0_28 = arith.constant 0 : index
    %c0_29 = arith.constant 0 : index
    %c0_30 = arith.constant 0 : index
    %25 = vector.load %arg15[%c0_28, %c0_29, %c0_30] : memref<2x32x32xf32, #tpu.memory_space<vmem>>, vector<1x32x32xf32>
    %26 = vector.shape_cast %25 : vector<1x32x32xf32> to vector<32x32xf32>
    %c0_31 = arith.constant 0 : index
    %c0_32 = arith.constant 0 : index
    %c0_33 = arith.constant 0 : index
    %27 = vector.load %arg16[%c0_31, %c0_32, %c0_33] : memref<2x1x32xf32, #tpu.memory_space<vmem>>, vector<1x1x32xf32>
    %28 = vector.shape_cast %27 : vector<1x1x32xf32> to vector<1x32xf32>
    %c0_34 = arith.constant 0 : index
    %c0_35 = arith.constant 0 : index
    %c0_36 = arith.constant 0 : index
    %29 = vector.load %arg17[%c0_34, %c0_35, %c0_36] : memref<2x1x32xf32, #tpu.memory_space<vmem>>, vector<1x1x32xf32>
    %30 = vector.shape_cast %29 : vector<1x1x32xf32> to vector<1x32xf32>
    %c0_37 = arith.constant 0 : index
    %c0_38 = arith.constant 0 : index
    %c0_39 = arith.constant 0 : index
    %31 = vector.load %arg18[%c0_37, %c0_38, %c0_39] : memref<2x1x32xf32, #tpu.memory_space<vmem>>, vector<1x1x32xf32>
    %32 = vector.shape_cast %31 : vector<1x1x32xf32> to vector<1x32xf32>
    %c0_40 = arith.constant 0 : index
    %c0_41 = arith.constant 0 : index
    %c0_42 = arith.constant 0 : index
    %33 = vector.load %arg19[%c0_40, %c0_41, %c0_42] : memref<2x32x128xf32, #tpu.memory_space<vmem>>, vector<1x32x128xf32>
    %34 = vector.shape_cast %33 : vector<1x32x128xf32> to vector<32x128xf32>
    %c0_43 = arith.constant 0 : index
    %c0_44 = arith.constant 0 : index
    %c0_45 = arith.constant 0 : index
    %35 = vector.load %arg20[%c0_43, %c0_44, %c0_45] : memref<2x1x128xf32, #tpu.memory_space<vmem>>, vector<1x1x128xf32>
    %36 = vector.shape_cast %35 : vector<1x1x128xf32> to vector<1x128xf32>
    %c0_46 = arith.constant 0 : index
    %c0_47 = arith.constant 0 : index
    %c0_48 = arith.constant 0 : index
    %37 = vector.load %arg21[%c0_46, %c0_47, %c0_48] : memref<2x128x32xf32, #tpu.memory_space<vmem>>, vector<1x128x32xf32>
    %38 = vector.shape_cast %37 : vector<1x128x32xf32> to vector<128x32xf32>
    %c0_49 = arith.constant 0 : index
    %c0_50 = arith.constant 0 : index
    %c0_51 = arith.constant 0 : index
    %39 = vector.load %arg22[%c0_49, %c0_50, %c0_51] : memref<2x1x32xf32, #tpu.memory_space<vmem>>, vector<1x1x32xf32>
    %40 = vector.shape_cast %39 : vector<1x1x32xf32> to vector<1x32xf32>
    %cst_52 = arith.constant dense<0.000000e+00> : vector<10xf32>
    %41 = vector.multi_reduction <add>, %15, %cst_52 [1] : vector<10x32xf32> to vector<10xf32>
    %42 = vector.shape_cast %41 : vector<10xf32> to vector<10x1xf32>
    %cst_53 = arith.constant 3.200000e+01 : f32
    %43 = vector.broadcast %cst_53 : f32 to vector<10x1xf32>
    %44 = arith.divf %42, %43 : vector<10x1xf32>
    %45 = vector.broadcast %44 : vector<10x1xf32> to vector<10x32xf32>
    %46 = arith.subf %15, %45 : vector<10x32xf32>
    %47 = arith.mulf %46, %46 : vector<10x32xf32>
    %cst_54 = arith.constant dense<0.000000e+00> : vector<10xf32>
    %48 = vector.multi_reduction <add>, %47, %cst_54 [1] : vector<10x32xf32> to vector<10xf32>
    %49 = vector.shape_cast %48 : vector<10xf32> to vector<10x1xf32>
    %cst_55 = arith.constant 3.200000e+01 : f32
    %50 = vector.broadcast %cst_55 : f32 to vector<10x1xf32>
    %51 = arith.divf %49, %50 : vector<10x1xf32>
    %52 = vector.broadcast %44 : vector<10x1xf32> to vector<10x32xf32>
    %53 = arith.subf %15, %52 : vector<10x32xf32>
    %cst_56 = arith.constant 9.99999974E-6 : f32
    %54 = vector.broadcast %cst_56 : f32 to vector<10x1xf32>
    %55 = arith.addf %51, %54 : vector<10x1xf32>
    %56 = math.rsqrt %55 : vector<10x1xf32>
    %57 = vector.broadcast %56 : vector<10x1xf32> to vector<10x32xf32>
    %58 = arith.mulf %53, %57 : vector<10x32xf32>
    %59 = vector.broadcast %18 : vector<1x32xf32> to vector<10x32xf32>
    %60 = arith.mulf %58, %59 : vector<10x32xf32>
    %61 = vector.broadcast %20 : vector<1x32xf32> to vector<10x32xf32>
    %62 = arith.addf %60, %61 : vector<10x32xf32>
    %cst_57 = arith.constant dense<0.000000e+00> : vector<10x96xf32>
    %63 = tpu.matmul %62, %22, %cst_57 {dimension_numbers = #tpu.dot_dimension_numbers<[1], [0], [0], [1], [0, 0, 1, 1], [], []>} : vector<10x32xf32>, vector<32x96xf32>, vector<10x96xf32> -> vector<10x96xf32>
    %64 = vector.broadcast %24 : vector<1x96xf32> to vector<10x96xf32>
    %65 = arith.addf %63, %64 : vector<10x96xf32>
    %66 = vector.extract_strided_slice %65 {offsets = [0, 0], sizes = [10, 8], strides = [1, 1]} : vector<10x96xf32> to vector<10x8xf32>
    %67 = vector.extract_strided_slice %65 {offsets = [0, 32], sizes = [10, 8], strides = [1, 1]} : vector<10x96xf32> to vector<10x8xf32>
    %68 = vector.extract_strided_slice %65 {offsets = [0, 64], sizes = [10, 8], strides = [1, 1]} : vector<10x96xf32> to vector<10x8xf32>
    %cst_58 = arith.constant dense<0.000000e+00> : vector<10x10xf32>
    %69 = tpu.matmul %66, %67, %cst_58 {dimension_numbers = #tpu.dot_dimension_numbers<[1], [1], [0], [0], [0, 0, 1, 0], [], []>} : vector<10x8xf32>, vector<10x8xf32>, vector<10x10xf32> -> vector<10x10xf32>
    %cst_59 = arith.constant 0.353553385 : f32
    %70 = vector.broadcast %cst_59 : f32 to vector<10x10xf32>
    %71 = arith.mulf %69, %70 : vector<10x10xf32>
    %72 = arith.addf %71, %16 : vector<10x10xf32>
    %cst_60 = arith.constant dense<0xFF800000> : vector<10xf32>
    %73 = vector.multi_reduction <maximumf>, %72, %cst_60 [1] : vector<10x10xf32> to vector<10xf32>
    %74 = vector.shape_cast %73 : vector<10xf32> to vector<10x1xf32>
    %75 = vector.broadcast %74 : vector<10x1xf32> to vector<10x10xf32>
    %76 = arith.subf %72, %75 : vector<10x10xf32>
    %77 = math.exp %76 : vector<10x10xf32>
    %cst_61 = arith.constant dense<0.000000e+00> : vector<10xf32>
    %78 = vector.multi_reduction <add>, %77, %cst_61 [1] : vector<10x10xf32> to vector<10xf32>
    %79 = vector.shape_cast %78 : vector<10xf32> to vector<10x1xf32>
    %80 = tpu.reciprocal %79 {approx = true} : vector<10x1xf32> -> vector<10x1xf32>
    %81 = vector.broadcast %80 : vector<10x1xf32> to vector<10x10xf32>
    %82 = arith.mulf %77, %81 : vector<10x10xf32>
    %cst_62 = arith.constant dense<0.000000e+00> : vector<10x8xf32>
    %83 = tpu.matmul %82, %68, %cst_62 {dimension_numbers = #tpu.dot_dimension_numbers<[1], [0], [0], [1], [0, 0, 1, 1], [], []>} : vector<10x10xf32>, vector<10x8xf32>, vector<10x8xf32> -> vector<10x8xf32>
    %84 = vector.extract_strided_slice %65 {offsets = [0, 8], sizes = [10, 8], strides = [1, 1]} : vector<10x96xf32> to vector<10x8xf32>
    %85 = vector.extract_strided_slice %65 {offsets = [0, 40], sizes = [10, 8], strides = [1, 1]} : vector<10x96xf32> to vector<10x8xf32>
    %86 = vector.extract_strided_slice %65 {offsets = [0, 72], sizes = [10, 8], strides = [1, 1]} : vector<10x96xf32> to vector<10x8xf32>
    %cst_63 = arith.constant dense<0.000000e+00> : vector<10x10xf32>
    %87 = tpu.matmul %84, %85, %cst_63 {dimension_numbers = #tpu.dot_dimension_numbers<[1], [1], [0], [0], [0, 0, 1, 0], [], []>} : vector<10x8xf32>, vector<10x8xf32>, vector<10x10xf32> -> vector<10x10xf32>
    %cst_64 = arith.constant 0.353553385 : f32
    %88 = vector.broadcast %cst_64 : f32 to vector<10x10xf32>
    %89 = arith.mulf %87, %88 : vector<10x10xf32>
    %90 = arith.addf %89, %16 : vector<10x10xf32>
    %cst_65 = arith.constant dense<0xFF800000> : vector<10xf32>
    %91 = vector.multi_reduction <maximumf>, %90, %cst_65 [1] : vector<10x10xf32> to vector<10xf32>
    %92 = vector.shape_cast %91 : vector<10xf32> to vector<10x1xf32>
    %93 = vector.broadcast %92 : vector<10x1xf32> to vector<10x10xf32>
    %94 = arith.subf %90, %93 : vector<10x10xf32>
    %95 = math.exp %94 : vector<10x10xf32>
    %cst_66 = arith.constant dense<0.000000e+00> : vector<10xf32>
    %96 = vector.multi_reduction <add>, %95, %cst_66 [1] : vector<10x10xf32> to vector<10xf32>
    %97 = vector.shape_cast %96 : vector<10xf32> to vector<10x1xf32>
    %98 = tpu.reciprocal %97 {approx = true} : vector<10x1xf32> -> vector<10x1xf32>
    %99 = vector.broadcast %98 : vector<10x1xf32> to vector<10x10xf32>
    %100 = arith.mulf %95, %99 : vector<10x10xf32>
    %cst_67 = arith.constant dense<0.000000e+00> : vector<10x8xf32>
    %101 = tpu.matmul %100, %86, %cst_67 {dimension_numbers = #tpu.dot_dimension_numbers<[1], [0], [0], [1], [0, 0, 1, 1], [], []>} : vector<10x10xf32>, vector<10x8xf32>, vector<10x8xf32> -> vector<10x8xf32>
    %102 = vector.extract_strided_slice %65 {offsets = [0, 16], sizes = [10, 8], strides = [1, 1]} : vector<10x96xf32> to vector<10x8xf32>
    %103 = vector.extract_strided_slice %65 {offsets = [0, 48], sizes = [10, 8], strides = [1, 1]} : vector<10x96xf32> to vector<10x8xf32>
    %104 = vector.extract_strided_slice %65 {offsets = [0, 80], sizes = [10, 8], strides = [1, 1]} : vector<10x96xf32> to vector<10x8xf32>
    %cst_68 = arith.constant dense<0.000000e+00> : vector<10x10xf32>
    %105 = tpu.matmul %102, %103, %cst_68 {dimension_numbers = #tpu.dot_dimension_numbers<[1], [1], [0], [0], [0, 0, 1, 0], [], []>} : vector<10x8xf32>, vector<10x8xf32>, vector<10x10xf32> -> vector<10x10xf32>
    %cst_69 = arith.constant 0.353553385 : f32
    %106 = vector.broadcast %cst_69 : f32 to vector<10x10xf32>
    %107 = arith.mulf %105, %106 : vector<10x10xf32>
    %108 = arith.addf %107, %16 : vector<10x10xf32>
    %cst_70 = arith.constant dense<0xFF800000> : vector<10xf32>
    %109 = vector.multi_reduction <maximumf>, %108, %cst_70 [1] : vector<10x10xf32> to vector<10xf32>
    %110 = vector.shape_cast %109 : vector<10xf32> to vector<10x1xf32>
    %111 = vector.broadcast %110 : vector<10x1xf32> to vector<10x10xf32>
    %112 = arith.subf %108, %111 : vector<10x10xf32>
    %113 = math.exp %112 : vector<10x10xf32>
    %cst_71 = arith.constant dense<0.000000e+00> : vector<10xf32>
    %114 = vector.multi_reduction <add>, %113, %cst_71 [1] : vector<10x10xf32> to vector<10xf32>
    %115 = vector.shape_cast %114 : vector<10xf32> to vector<10x1xf32>
    %116 = tpu.reciprocal %115 {approx = true} : vector<10x1xf32> -> vector<10x1xf32>
    %117 = vector.broadcast %116 : vector<10x1xf32> to vector<10x10xf32>
    %118 = arith.mulf %113, %117 : vector<10x10xf32>
    %cst_72 = arith.constant dense<0.000000e+00> : vector<10x8xf32>
    %119 = tpu.matmul %118, %104, %cst_72 {dimension_numbers = #tpu.dot_dimension_numbers<[1], [0], [0], [1], [0, 0, 1, 1], [], []>} : vector<10x10xf32>, vector<10x8xf32>, vector<10x8xf32> -> vector<10x8xf32>
    %120 = vector.extract_strided_slice %65 {offsets = [0, 24], sizes = [10, 8], strides = [1, 1]} : vector<10x96xf32> to vector<10x8xf32>
    %121 = vector.extract_strided_slice %65 {offsets = [0, 56], sizes = [10, 8], strides = [1, 1]} : vector<10x96xf32> to vector<10x8xf32>
    %122 = vector.extract_strided_slice %65 {offsets = [0, 88], sizes = [10, 8], strides = [1, 1]} : vector<10x96xf32> to vector<10x8xf32>
    %cst_73 = arith.constant dense<0.000000e+00> : vector<10x10xf32>
    %123 = tpu.matmul %120, %121, %cst_73 {dimension_numbers = #tpu.dot_dimension_numbers<[1], [1], [0], [0], [0, 0, 1, 0], [], []>} : vector<10x8xf32>, vector<10x8xf32>, vector<10x10xf32> -> vector<10x10xf32>
    %cst_74 = arith.constant 0.353553385 : f32
    %124 = vector.broadcast %cst_74 : f32 to vector<10x10xf32>
    %125 = arith.mulf %123, %124 : vector<10x10xf32>
    %126 = arith.addf %125, %16 : vector<10x10xf32>
    %cst_75 = arith.constant dense<0xFF800000> : vector<10xf32>
    %127 = vector.multi_reduction <maximumf>, %126, %cst_75 [1] : vector<10x10xf32> to vector<10xf32>
    %128 = vector.shape_cast %127 : vector<10xf32> to vector<10x1xf32>
    %129 = vector.broadcast %128 : vector<10x1xf32> to vector<10x10xf32>
    %130 = arith.subf %126, %129 : vector<10x10xf32>
    %131 = math.exp %130 : vector<10x10xf32>
    %cst_76 = arith.constant dense<0.000000e+00> : vector<10xf32>
    %132 = vector.multi_reduction <add>, %131, %cst_76 [1] : vector<10x10xf32> to vector<10xf32>
    %133 = vector.shape_cast %132 : vector<10xf32> to vector<10x1xf32>
    %134 = tpu.reciprocal %133 {approx = true} : vector<10x1xf32> -> vector<10x1xf32>
    %135 = vector.broadcast %134 : vector<10x1xf32> to vector<10x10xf32>
    %136 = arith.mulf %131, %135 : vector<10x10xf32>
    %cst_77 = arith.constant dense<0.000000e+00> : vector<10x8xf32>
    %137 = tpu.matmul %136, %122, %cst_77 {dimension_numbers = #tpu.dot_dimension_numbers<[1], [0], [0], [1], [0, 0, 1, 1], [], []>} : vector<10x10xf32>, vector<10x8xf32>, vector<10x8xf32> -> vector<10x8xf32>
    %138 = tpu.concatenate %83, %101, %119, %137 in 1 : vector<10x8xf32>, vector<10x8xf32>, vector<10x8xf32>, vector<10x8xf32> -> vector<10x32xf32>
    %cst_78 = arith.constant dense<0.000000e+00> : vector<10x32xf32>
    %139 = tpu.matmul %138, %26, %cst_78 {dimension_numbers = #tpu.dot_dimension_numbers<[1], [0], [0], [1], [0, 0, 1, 1], [], []>} : vector<10x32xf32>, vector<32x32xf32>, vector<10x32xf32> -> vector<10x32xf32>
    %140 = vector.broadcast %28 : vector<1x32xf32> to vector<10x32xf32>
    %141 = arith.addf %139, %140 : vector<10x32xf32>
    %142 = arith.addf %15, %141 : vector<10x32xf32>
    %cst_79 = arith.constant dense<0.000000e+00> : vector<10xf32>
    %143 = vector.multi_reduction <add>, %142, %cst_79 [1] : vector<10x32xf32> to vector<10xf32>
    %144 = vector.shape_cast %143 : vector<10xf32> to vector<10x1xf32>
    %cst_80 = arith.constant 3.200000e+01 : f32
    %145 = vector.broadcast %cst_80 : f32 to vector<10x1xf32>
    %146 = arith.divf %144, %145 : vector<10x1xf32>
    %147 = vector.broadcast %146 : vector<10x1xf32> to vector<10x32xf32>
    %148 = arith.subf %142, %147 : vector<10x32xf32>
    %149 = arith.mulf %148, %148 : vector<10x32xf32>
    %cst_81 = arith.constant dense<0.000000e+00> : vector<10xf32>
    %150 = vector.multi_reduction <add>, %149, %cst_81 [1] : vector<10x32xf32> to vector<10xf32>
    %151 = vector.shape_cast %150 : vector<10xf32> to vector<10x1xf32>
    %cst_82 = arith.constant 3.200000e+01 : f32
    %152 = vector.broadcast %cst_82 : f32 to vector<10x1xf32>
    %153 = arith.divf %151, %152 : vector<10x1xf32>
    %154 = vector.broadcast %146 : vector<10x1xf32> to vector<10x32xf32>
    %155 = arith.subf %142, %154 : vector<10x32xf32>
    %cst_83 = arith.constant 9.99999974E-6 : f32
    %156 = vector.broadcast %cst_83 : f32 to vector<10x1xf32>
    %157 = arith.addf %153, %156 : vector<10x1xf32>
    %158 = math.rsqrt %157 : vector<10x1xf32>
    %159 = vector.broadcast %158 : vector<10x1xf32> to vector<10x32xf32>
    %160 = arith.mulf %155, %159 : vector<10x32xf32>
    %161 = vector.broadcast %30 : vector<1x32xf32> to vector<10x32xf32>
    %162 = arith.mulf %160, %161 : vector<10x32xf32>
    %163 = vector.broadcast %32 : vector<1x32xf32> to vector<10x32xf32>
    %164 = arith.addf %162, %163 : vector<10x32xf32>
    %cst_84 = arith.constant dense<0.000000e+00> : vector<10x128xf32>
    %165 = tpu.matmul %164, %34, %cst_84 {dimension_numbers = #tpu.dot_dimension_numbers<[1], [0], [0], [1], [0, 0, 1, 1], [], []>} : vector<10x32xf32>, vector<32x128xf32>, vector<10x128xf32> -> vector<10x128xf32>
    %166 = vector.broadcast %36 : vector<1x128xf32> to vector<10x128xf32>
    %167 = arith.addf %165, %166 : vector<10x128xf32>
    %cst_85 = arith.constant 5.000000e-01 : f32
    %168 = vector.broadcast %cst_85 : f32 to vector<10x128xf32>
    %169 = arith.mulf %168, %167 : vector<10x128xf32>
    %cst_86 = arith.constant 0.707106769 : f32
    %170 = vector.broadcast %cst_86 : f32 to vector<10x128xf32>
    %171 = arith.mulf %167, %170 : vector<10x128xf32>
    %172 = math.erf %171 : vector<10x128xf32>
    %cst_87 = arith.constant 1.000000e+00 : f32
    %173 = vector.broadcast %cst_87 : f32 to vector<10x128xf32>
    %174 = arith.addf %173, %172 : vector<10x128xf32>
    %175 = arith.mulf %169, %174 : vector<10x128xf32>
    %cst_88 = arith.constant dense<0.000000e+00> : vector<10x32xf32>
    %176 = tpu.matmul %175, %38, %cst_88 {dimension_numbers = #tpu.dot_dimension_numbers<[1], [0], [0], [1], [0, 0, 1, 1], [], []>} : vector<10x128xf32>, vector<128x32xf32>, vector<10x32xf32> -> vector<10x32xf32>
    %177 = vector.broadcast %40 : vector<1x32xf32> to vector<10x32xf32>
    %178 = arith.addf %176, %177 : vector<10x32xf32>
    %179 = arith.addf %142, %178 : vector<10x32xf32>
    %c1 = arith.constant 1 : index
    %c0_89 = arith.constant 0 : index
    %c0_90 = arith.constant 0 : index
    %180 = vector.load %arg11[%c1, %c0_89, %c0_90] : memref<2x1x32xf32, #tpu.memory_space<vmem>>, vector<1x1x32xf32>
    %181 = vector.shape_cast %180 : vector<1x1x32xf32> to vector<1x32xf32>
    %c1_91 = arith.constant 1 : index
    %c0_92 = arith.constant 0 : index
    %c0_93 = arith.constant 0 : index
    %182 = vector.load %arg12[%c1_91, %c0_92, %c0_93] : memref<2x1x32xf32, #tpu.memory_space<vmem>>, vector<1x1x32xf32>
    %183 = vector.shape_cast %182 : vector<1x1x32xf32> to vector<1x32xf32>
    %c1_94 = arith.constant 1 : index
    %c0_95 = arith.constant 0 : index
    %c0_96 = arith.constant 0 : index
    %184 = vector.load %arg13[%c1_94, %c0_95, %c0_96] : memref<2x32x96xf32, #tpu.memory_space<vmem>>, vector<1x32x96xf32>
    %185 = vector.shape_cast %184 : vector<1x32x96xf32> to vector<32x96xf32>
    %c1_97 = arith.constant 1 : index
    %c0_98 = arith.constant 0 : index
    %c0_99 = arith.constant 0 : index
    %186 = vector.load %arg14[%c1_97, %c0_98, %c0_99] : memref<2x1x96xf32, #tpu.memory_space<vmem>>, vector<1x1x96xf32>
    %187 = vector.shape_cast %186 : vector<1x1x96xf32> to vector<1x96xf32>
    %c1_100 = arith.constant 1 : index
    %c0_101 = arith.constant 0 : index
    %c0_102 = arith.constant 0 : index
    %188 = vector.load %arg15[%c1_100, %c0_101, %c0_102] : memref<2x32x32xf32, #tpu.memory_space<vmem>>, vector<1x32x32xf32>
    %189 = vector.shape_cast %188 : vector<1x32x32xf32> to vector<32x32xf32>
    %c1_103 = arith.constant 1 : index
    %c0_104 = arith.constant 0 : index
    %c0_105 = arith.constant 0 : index
    %190 = vector.load %arg16[%c1_103, %c0_104, %c0_105] : memref<2x1x32xf32, #tpu.memory_space<vmem>>, vector<1x1x32xf32>
    %191 = vector.shape_cast %190 : vector<1x1x32xf32> to vector<1x32xf32>
    %c1_106 = arith.constant 1 : index
    %c0_107 = arith.constant 0 : index
    %c0_108 = arith.constant 0 : index
    %192 = vector.load %arg17[%c1_106, %c0_107, %c0_108] : memref<2x1x32xf32, #tpu.memory_space<vmem>>, vector<1x1x32xf32>
    %193 = vector.shape_cast %192 : vector<1x1x32xf32> to vector<1x32xf32>
    %c1_109 = arith.constant 1 : index
    %c0_110 = arith.constant 0 : index
    %c0_111 = arith.constant 0 : index
    %194 = vector.load %arg18[%c1_109, %c0_110, %c0_111] : memref<2x1x32xf32, #tpu.memory_space<vmem>>, vector<1x1x32xf32>
    %195 = vector.shape_cast %194 : vector<1x1x32xf32> to vector<1x32xf32>
    %c1_112 = arith.constant 1 : index
    %c0_113 = arith.constant 0 : index
    %c0_114 = arith.constant 0 : index
    %196 = vector.load %arg19[%c1_112, %c0_113, %c0_114] : memref<2x32x128xf32, #tpu.memory_space<vmem>>, vector<1x32x128xf32>
    %197 = vector.shape_cast %196 : vector<1x32x128xf32> to vector<32x128xf32>
    %c1_115 = arith.constant 1 : index
    %c0_116 = arith.constant 0 : index
    %c0_117 = arith.constant 0 : index
    %198 = vector.load %arg20[%c1_115, %c0_116, %c0_117] : memref<2x1x128xf32, #tpu.memory_space<vmem>>, vector<1x1x128xf32>
    %199 = vector.shape_cast %198 : vector<1x1x128xf32> to vector<1x128xf32>
    %c1_118 = arith.constant 1 : index
    %c0_119 = arith.constant 0 : index
    %c0_120 = arith.constant 0 : index
    %200 = vector.load %arg21[%c1_118, %c0_119, %c0_120] : memref<2x128x32xf32, #tpu.memory_space<vmem>>, vector<1x128x32xf32>
    %201 = vector.shape_cast %200 : vector<1x128x32xf32> to vector<128x32xf32>
    %c1_121 = arith.constant 1 : index
    %c0_122 = arith.constant 0 : index
    %c0_123 = arith.constant 0 : index
    %202 = vector.load %arg22[%c1_121, %c0_122, %c0_123] : memref<2x1x32xf32, #tpu.memory_space<vmem>>, vector<1x1x32xf32>
    %203 = vector.shape_cast %202 : vector<1x1x32xf32> to vector<1x32xf32>
    %cst_124 = arith.constant dense<0.000000e+00> : vector<10xf32>
    %204 = vector.multi_reduction <add>, %179, %cst_124 [1] : vector<10x32xf32> to vector<10xf32>
    %205 = vector.shape_cast %204 : vector<10xf32> to vector<10x1xf32>
    %cst_125 = arith.constant 3.200000e+01 : f32
    %206 = vector.broadcast %cst_125 : f32 to vector<10x1xf32>
    %207 = arith.divf %205, %206 : vector<10x1xf32>
    %208 = vector.broadcast %207 : vector<10x1xf32> to vector<10x32xf32>
    %209 = arith.subf %179, %208 : vector<10x32xf32>
    %210 = arith.mulf %209, %209 : vector<10x32xf32>
    %cst_126 = arith.constant dense<0.000000e+00> : vector<10xf32>
    %211 = vector.multi_reduction <add>, %210, %cst_126 [1] : vector<10x32xf32> to vector<10xf32>
    %212 = vector.shape_cast %211 : vector<10xf32> to vector<10x1xf32>
    %cst_127 = arith.constant 3.200000e+01 : f32
    %213 = vector.broadcast %cst_127 : f32 to vector<10x1xf32>
    %214 = arith.divf %212, %213 : vector<10x1xf32>
    %215 = vector.broadcast %207 : vector<10x1xf32> to vector<10x32xf32>
    %216 = arith.subf %179, %215 : vector<10x32xf32>
    %cst_128 = arith.constant 9.99999974E-6 : f32
    %217 = vector.broadcast %cst_128 : f32 to vector<10x1xf32>
    %218 = arith.addf %214, %217 : vector<10x1xf32>
    %219 = math.rsqrt %218 : vector<10x1xf32>
    %220 = vector.broadcast %219 : vector<10x1xf32> to vector<10x32xf32>
    %221 = arith.mulf %216, %220 : vector<10x32xf32>
    %222 = vector.broadcast %181 : vector<1x32xf32> to vector<10x32xf32>
    %223 = arith.mulf %221, %222 : vector<10x32xf32>
    %224 = vector.broadcast %183 : vector<1x32xf32> to vector<10x32xf32>
    %225 = arith.addf %223, %224 : vector<10x32xf32>
    %cst_129 = arith.constant dense<0.000000e+00> : vector<10x96xf32>
    %226 = tpu.matmul %225, %185, %cst_129 {dimension_numbers = #tpu.dot_dimension_numbers<[1], [0], [0], [1], [0, 0, 1, 1], [], []>} : vector<10x32xf32>, vector<32x96xf32>, vector<10x96xf32> -> vector<10x96xf32>
    %227 = vector.broadcast %187 : vector<1x96xf32> to vector<10x96xf32>
    %228 = arith.addf %226, %227 : vector<10x96xf32>
    %229 = vector.extract_strided_slice %228 {offsets = [0, 0], sizes = [10, 8], strides = [1, 1]} : vector<10x96xf32> to vector<10x8xf32>
    %230 = vector.extract_strided_slice %228 {offsets = [0, 32], sizes = [10, 8], strides = [1, 1]} : vector<10x96xf32> to vector<10x8xf32>
    %231 = vector.extract_strided_slice %228 {offsets = [0, 64], sizes = [10, 8], strides = [1, 1]} : vector<10x96xf32> to vector<10x8xf32>
    %cst_130 = arith.constant dense<0.000000e+00> : vector<10x10xf32>
    %232 = tpu.matmul %229, %230, %cst_130 {dimension_numbers = #tpu.dot_dimension_numbers<[1], [1], [0], [0], [0, 0, 1, 0], [], []>} : vector<10x8xf32>, vector<10x8xf32>, vector<10x10xf32> -> vector<10x10xf32>
    %cst_131 = arith.constant 0.353553385 : f32
    %233 = vector.broadcast %cst_131 : f32 to vector<10x10xf32>
    %234 = arith.mulf %232, %233 : vector<10x10xf32>
    %235 = arith.addf %234, %16 : vector<10x10xf32>
    %cst_132 = arith.constant dense<0xFF800000> : vector<10xf32>
    %236 = vector.multi_reduction <maximumf>, %235, %cst_132 [1] : vector<10x10xf32> to vector<10xf32>
    %237 = vector.shape_cast %236 : vector<10xf32> to vector<10x1xf32>
    %238 = vector.broadcast %237 : vector<10x1xf32> to vector<10x10xf32>
    %239 = arith.subf %235, %238 : vector<10x10xf32>
    %240 = math.exp %239 : vector<10x10xf32>
    %cst_133 = arith.constant dense<0.000000e+00> : vector<10xf32>
    %241 = vector.multi_reduction <add>, %240, %cst_133 [1] : vector<10x10xf32> to vector<10xf32>
    %242 = vector.shape_cast %241 : vector<10xf32> to vector<10x1xf32>
    %243 = tpu.reciprocal %242 {approx = true} : vector<10x1xf32> -> vector<10x1xf32>
    %244 = vector.broadcast %243 : vector<10x1xf32> to vector<10x10xf32>
    %245 = arith.mulf %240, %244 : vector<10x10xf32>
    %cst_134 = arith.constant dense<0.000000e+00> : vector<10x8xf32>
    %246 = tpu.matmul %245, %231, %cst_134 {dimension_numbers = #tpu.dot_dimension_numbers<[1], [0], [0], [1], [0, 0, 1, 1], [], []>} : vector<10x10xf32>, vector<10x8xf32>, vector<10x8xf32> -> vector<10x8xf32>
    %247 = vector.extract_strided_slice %228 {offsets = [0, 8], sizes = [10, 8], strides = [1, 1]} : vector<10x96xf32> to vector<10x8xf32>
    %248 = vector.extract_strided_slice %228 {offsets = [0, 40], sizes = [10, 8], strides = [1, 1]} : vector<10x96xf32> to vector<10x8xf32>
    %249 = vector.extract_strided_slice %228 {offsets = [0, 72], sizes = [10, 8], strides = [1, 1]} : vector<10x96xf32> to vector<10x8xf32>
    %cst_135 = arith.constant dense<0.000000e+00> : vector<10x10xf32>
    %250 = tpu.matmul %247, %248, %cst_135 {dimension_numbers = #tpu.dot_dimension_numbers<[1], [1], [0], [0], [0, 0, 1, 0], [], []>} : vector<10x8xf32>, vector<10x8xf32>, vector<10x10xf32> -> vector<10x10xf32>
    %cst_136 = arith.constant 0.353553385 : f32
    %251 = vector.broadcast %cst_136 : f32 to vector<10x10xf32>
    %252 = arith.mulf %250, %251 : vector<10x10xf32>
    %253 = arith.addf %252, %16 : vector<10x10xf32>
    %cst_137 = arith.constant dense<0xFF800000> : vector<10xf32>
    %254 = vector.multi_reduction <maximumf>, %253, %cst_137 [1] : vector<10x10xf32> to vector<10xf32>
    %255 = vector.shape_cast %254 : vector<10xf32> to vector<10x1xf32>
    %256 = vector.broadcast %255 : vector<10x1xf32> to vector<10x10xf32>
    %257 = arith.subf %253, %256 : vector<10x10xf32>
    %258 = math.exp %257 : vector<10x10xf32>
    %cst_138 = arith.constant dense<0.000000e+00> : vector<10xf32>
    %259 = vector.multi_reduction <add>, %258, %cst_138 [1] : vector<10x10xf32> to vector<10xf32>
    %260 = vector.shape_cast %259 : vector<10xf32> to vector<10x1xf32>
    %261 = tpu.reciprocal %260 {approx = true} : vector<10x1xf32> -> vector<10x1xf32>
    %262 = vector.broadcast %261 : vector<10x1xf32> to vector<10x10xf32>
    %263 = arith.mulf %258, %262 : vector<10x10xf32>
    %cst_139 = arith.constant dense<0.000000e+00> : vector<10x8xf32>
    %264 = tpu.matmul %263, %249, %cst_139 {dimension_numbers = #tpu.dot_dimension_numbers<[1], [0], [0], [1], [0, 0, 1, 1], [], []>} : vector<10x10xf32>, vector<10x8xf32>, vector<10x8xf32> -> vector<10x8xf32>
    %265 = vector.extract_strided_slice %228 {offsets = [0, 16], sizes = [10, 8], strides = [1, 1]} : vector<10x96xf32> to vector<10x8xf32>
    %266 = vector.extract_strided_slice %228 {offsets = [0, 48], sizes = [10, 8], strides = [1, 1]} : vector<10x96xf32> to vector<10x8xf32>
    %267 = vector.extract_strided_slice %228 {offsets = [0, 80], sizes = [10, 8], strides = [1, 1]} : vector<10x96xf32> to vector<10x8xf32>
    %cst_140 = arith.constant dense<0.000000e+00> : vector<10x10xf32>
    %268 = tpu.matmul %265, %266, %cst_140 {dimension_numbers = #tpu.dot_dimension_numbers<[1], [1], [0], [0], [0, 0, 1, 0], [], []>} : vector<10x8xf32>, vector<10x8xf32>, vector<10x10xf32> -> vector<10x10xf32>
    %cst_141 = arith.constant 0.353553385 : f32
    %269 = vector.broadcast %cst_141 : f32 to vector<10x10xf32>
    %270 = arith.mulf %268, %269 : vector<10x10xf32>
    %271 = arith.addf %270, %16 : vector<10x10xf32>
    %cst_142 = arith.constant dense<0xFF800000> : vector<10xf32>
    %272 = vector.multi_reduction <maximumf>, %271, %cst_142 [1] : vector<10x10xf32> to vector<10xf32>
    %273 = vector.shape_cast %272 : vector<10xf32> to vector<10x1xf32>
    %274 = vector.broadcast %273 : vector<10x1xf32> to vector<10x10xf32>
    %275 = arith.subf %271, %274 : vector<10x10xf32>
    %276 = math.exp %275 : vector<10x10xf32>
    %cst_143 = arith.constant dense<0.000000e+00> : vector<10xf32>
    %277 = vector.multi_reduction <add>, %276, %cst_143 [1] : vector<10x10xf32> to vector<10xf32>
    %278 = vector.shape_cast %277 : vector<10xf32> to vector<10x1xf32>
    %279 = tpu.reciprocal %278 {approx = true} : vector<10x1xf32> -> vector<10x1xf32>
    %280 = vector.broadcast %279 : vector<10x1xf32> to vector<10x10xf32>
    %281 = arith.mulf %276, %280 : vector<10x10xf32>
    %cst_144 = arith.constant dense<0.000000e+00> : vector<10x8xf32>
    %282 = tpu.matmul %281, %267, %cst_144 {dimension_numbers = #tpu.dot_dimension_numbers<[1], [0], [0], [1], [0, 0, 1, 1], [], []>} : vector<10x10xf32>, vector<10x8xf32>, vector<10x8xf32> -> vector<10x8xf32>
    %283 = vector.extract_strided_slice %228 {offsets = [0, 24], sizes = [10, 8], strides = [1, 1]} : vector<10x96xf32> to vector<10x8xf32>
    %284 = vector.extract_strided_slice %228 {offsets = [0, 56], sizes = [10, 8], strides = [1, 1]} : vector<10x96xf32> to vector<10x8xf32>
    %285 = vector.extract_strided_slice %228 {offsets = [0, 88], sizes = [10, 8], strides = [1, 1]} : vector<10x96xf32> to vector<10x8xf32>
    %cst_145 = arith.constant dense<0.000000e+00> : vector<10x10xf32>
    %286 = tpu.matmul %283, %284, %cst_145 {dimension_numbers = #tpu.dot_dimension_numbers<[1], [1], [0], [0], [0, 0, 1, 0], [], []>} : vector<10x8xf32>, vector<10x8xf32>, vector<10x10xf32> -> vector<10x10xf32>
    %cst_146 = arith.constant 0.353553385 : f32
    %287 = vector.broadcast %cst_146 : f32 to vector<10x10xf32>
    %288 = arith.mulf %286, %287 : vector<10x10xf32>
    %289 = arith.addf %288, %16 : vector<10x10xf32>
    %cst_147 = arith.constant dense<0xFF800000> : vector<10xf32>
    %290 = vector.multi_reduction <maximumf>, %289, %cst_147 [1] : vector<10x10xf32> to vector<10xf32>
    %291 = vector.shape_cast %290 : vector<10xf32> to vector<10x1xf32>
    %292 = vector.broadcast %291 : vector<10x1xf32> to vector<10x10xf32>
    %293 = arith.subf %289, %292 : vector<10x10xf32>
    %294 = math.exp %293 : vector<10x10xf32>
    %cst_148 = arith.constant dense<0.000000e+00> : vector<10xf32>
    %295 = vector.multi_reduction <add>, %294, %cst_148 [1] : vector<10x10xf32> to vector<10xf32>
    %296 = vector.shape_cast %295 : vector<10xf32> to vector<10x1xf32>
    %297 = tpu.reciprocal %296 {approx = true} : vector<10x1xf32> -> vector<10x1xf32>
    %298 = vector.broadcast %297 : vector<10x1xf32> to vector<10x10xf32>
    %299 = arith.mulf %294, %298 : vector<10x10xf32>
    %cst_149 = arith.constant dense<0.000000e+00> : vector<10x8xf32>
    %300 = tpu.matmul %299, %285, %cst_149 {dimension_numbers = #tpu.dot_dimension_numbers<[1], [0], [0], [1], [0, 0, 1, 1], [], []>} : vector<10x10xf32>, vector<10x8xf32>, vector<10x8xf32> -> vector<10x8xf32>
    %301 = tpu.concatenate %246, %264, %282, %300 in 1 : vector<10x8xf32>, vector<10x8xf32>, vector<10x8xf32>, vector<10x8xf32> -> vector<10x32xf32>
    %cst_150 = arith.constant dense<0.000000e+00> : vector<10x32xf32>
    %302 = tpu.matmul %301, %189, %cst_150 {dimension_numbers = #tpu.dot_dimension_numbers<[1], [0], [0], [1], [0, 0, 1, 1], [], []>} : vector<10x32xf32>, vector<32x32xf32>, vector<10x32xf32> -> vector<10x32xf32>
    %303 = vector.broadcast %191 : vector<1x32xf32> to vector<10x32xf32>
    %304 = arith.addf %302, %303 : vector<10x32xf32>
    %305 = arith.addf %179, %304 : vector<10x32xf32>
    %cst_151 = arith.constant dense<0.000000e+00> : vector<10xf32>
    %306 = vector.multi_reduction <add>, %305, %cst_151 [1] : vector<10x32xf32> to vector<10xf32>
    %307 = vector.shape_cast %306 : vector<10xf32> to vector<10x1xf32>
    %cst_152 = arith.constant 3.200000e+01 : f32
    %308 = vector.broadcast %cst_152 : f32 to vector<10x1xf32>
    %309 = arith.divf %307, %308 : vector<10x1xf32>
    %310 = vector.broadcast %309 : vector<10x1xf32> to vector<10x32xf32>
    %311 = arith.subf %305, %310 : vector<10x32xf32>
    %312 = arith.mulf %311, %311 : vector<10x32xf32>
    %cst_153 = arith.constant dense<0.000000e+00> : vector<10xf32>
    %313 = vector.multi_reduction <add>, %312, %cst_153 [1] : vector<10x32xf32> to vector<10xf32>
    %314 = vector.shape_cast %313 : vector<10xf32> to vector<10x1xf32>
    %cst_154 = arith.constant 3.200000e+01 : f32
    %315 = vector.broadcast %cst_154 : f32 to vector<10x1xf32>
    %316 = arith.divf %314, %315 : vector<10x1xf32>
    %317 = vector.broadcast %309 : vector<10x1xf32> to vector<10x32xf32>
    %318 = arith.subf %305, %317 : vector<10x32xf32>
    %cst_155 = arith.constant 9.99999974E-6 : f32
    %319 = vector.broadcast %cst_155 : f32 to vector<10x1xf32>
    %320 = arith.addf %316, %319 : vector<10x1xf32>
    %321 = math.rsqrt %320 : vector<10x1xf32>
    %322 = vector.broadcast %321 : vector<10x1xf32> to vector<10x32xf32>
    %323 = arith.mulf %318, %322 : vector<10x32xf32>
    %324 = vector.broadcast %193 : vector<1x32xf32> to vector<10x32xf32>
    %325 = arith.mulf %323, %324 : vector<10x32xf32>
    %326 = vector.broadcast %195 : vector<1x32xf32> to vector<10x32xf32>
    %327 = arith.addf %325, %326 : vector<10x32xf32>
    %cst_156 = arith.constant dense<0.000000e+00> : vector<10x128xf32>
    %328 = tpu.matmul %327, %197, %cst_156 {dimension_numbers = #tpu.dot_dimension_numbers<[1], [0], [0], [1], [0, 0, 1, 1], [], []>} : vector<10x32xf32>, vector<32x128xf32>, vector<10x128xf32> -> vector<10x128xf32>
    %329 = vector.broadcast %199 : vector<1x128xf32> to vector<10x128xf32>
    %330 = arith.addf %328, %329 : vector<10x128xf32>
    %cst_157 = arith.constant 5.000000e-01 : f32
    %331 = vector.broadcast %cst_157 : f32 to vector<10x128xf32>
    %332 = arith.mulf %331, %330 : vector<10x128xf32>
    %cst_158 = arith.constant 0.707106769 : f32
    %333 = vector.broadcast %cst_158 : f32 to vector<10x128xf32>
    %334 = arith.mulf %330, %333 : vector<10x128xf32>
    %335 = math.erf %334 : vector<10x128xf32>
    %cst_159 = arith.constant 1.000000e+00 : f32
    %336 = vector.broadcast %cst_159 : f32 to vector<10x128xf32>
    %337 = arith.addf %336, %335 : vector<10x128xf32>
    %338 = arith.mulf %332, %337 : vector<10x128xf32>
    %cst_160 = arith.constant dense<0.000000e+00> : vector<10x32xf32>
    %339 = tpu.matmul %338, %201, %cst_160 {dimension_numbers = #tpu.dot_dimension_numbers<[1], [0], [0], [1], [0, 0, 1, 1], [], []>} : vector<10x128xf32>, vector<128x32xf32>, vector<10x32xf32> -> vector<10x32xf32>
    %340 = vector.broadcast %203 : vector<1x32xf32> to vector<10x32xf32>
    %341 = arith.addf %339, %340 : vector<10x32xf32>
    %342 = arith.addf %305, %341 : vector<10x32xf32>
    %c0_161 = arith.constant 0 : index
    %c0_162 = arith.constant 0 : index
    %343 = vector.load %arg35[%c0_161, %c0_162] : memref<1x32xf32, #tpu.memory_space<vmem>>, vector<1x32xf32>
    %c0_163 = arith.constant 0 : index
    %c0_164 = arith.constant 0 : index
    %344 = vector.load %arg36[%c0_163, %c0_164] : memref<1x32xf32, #tpu.memory_space<vmem>>, vector<1x32xf32>
    %cst_165 = arith.constant dense<0.000000e+00> : vector<10xf32>
    %345 = vector.multi_reduction <add>, %342, %cst_165 [1] : vector<10x32xf32> to vector<10xf32>
    %346 = vector.shape_cast %345 : vector<10xf32> to vector<10x1xf32>
    %cst_166 = arith.constant 3.200000e+01 : f32
    %347 = vector.broadcast %cst_166 : f32 to vector<10x1xf32>
    %348 = arith.divf %346, %347 : vector<10x1xf32>
    %349 = vector.broadcast %348 : vector<10x1xf32> to vector<10x32xf32>
    %350 = arith.subf %342, %349 : vector<10x32xf32>
    %351 = arith.mulf %350, %350 : vector<10x32xf32>
    %cst_167 = arith.constant dense<0.000000e+00> : vector<10xf32>
    %352 = vector.multi_reduction <add>, %351, %cst_167 [1] : vector<10x32xf32> to vector<10xf32>
    %353 = vector.shape_cast %352 : vector<10xf32> to vector<10x1xf32>
    %cst_168 = arith.constant 3.200000e+01 : f32
    %354 = vector.broadcast %cst_168 : f32 to vector<10x1xf32>
    %355 = arith.divf %353, %354 : vector<10x1xf32>
    %356 = vector.broadcast %348 : vector<10x1xf32> to vector<10x32xf32>
    %357 = arith.subf %342, %356 : vector<10x32xf32>
    %cst_169 = arith.constant 9.99999974E-6 : f32
    %358 = vector.broadcast %cst_169 : f32 to vector<10x1xf32>
    %359 = arith.addf %355, %358 : vector<10x1xf32>
    %360 = math.rsqrt %359 : vector<10x1xf32>
    %361 = vector.broadcast %360 : vector<10x1xf32> to vector<10x32xf32>
    %362 = arith.mulf %357, %361 : vector<10x32xf32>
    %363 = vector.broadcast %343 : vector<1x32xf32> to vector<10x32xf32>
    %364 = arith.mulf %362, %363 : vector<10x32xf32>
    %365 = vector.broadcast %344 : vector<1x32xf32> to vector<10x32xf32>
    %366 = arith.addf %364, %365 : vector<10x32xf32>
    %c0_170 = arith.constant 0 : index
    %c0_171 = arith.constant 0 : index
    %367 = vector.load %arg43[%c0_170, %c0_171] : memref<10x32xf32, #tpu.memory_space<vmem>>, vector<10x32xf32>
    tpu.vector_store %arg43[%c0_170, %c0_171], %366 {strides = array<i32>} : memref<10x32xf32, #tpu.memory_space<vmem>>, vector<10x32xf32>,
    %c0_172 = arith.constant 0 : index
    %c0_173 = arith.constant 0 : index
    %368 = vector.load %arg7[%c0_172, %c0_173] : memref<2x10xf32, #tpu.memory_space<vmem>>, vector<2x10xf32>
    %cst_174 = arith.constant dense<0.000000e+00> : vector<2x32xf32>
    %369 = tpu.matmul %368, %366, %cst_174 {dimension_numbers = #tpu.dot_dimension_numbers<[1], [0], [0], [1], [0, 0, 1, 1], [], []>} : vector<2x10xf32>, vector<10x32xf32>, vector<2x32xf32> -> vector<2x32xf32>
    %c0_175 = arith.constant 0 : index
    %c0_176 = arith.constant 0 : index
    %370 = vector.load %arg37[%c0_175, %c0_176] : memref<32x32xf32, #tpu.memory_space<vmem>>, vector<32x32xf32>
    %cst_177 = arith.constant dense<0.000000e+00> : vector<2x32xf32>
    %371 = tpu.matmul %369, %370, %cst_177 {dimension_numbers = #tpu.dot_dimension_numbers<[1], [0], [0], [1], [0, 0, 1, 1], [], []>} : vector<2x32xf32>, vector<32x32xf32>, vector<2x32xf32> -> vector<2x32xf32>
    %c0_178 = arith.constant 0 : index
    %c0_179 = arith.constant 0 : index
    %372 = vector.load %arg38[%c0_178, %c0_179] : memref<1x32xf32, #tpu.memory_space<vmem>>, vector<1x32xf32>
    %373 = vector.broadcast %372 : vector<1x32xf32> to vector<2x32xf32>
    %374 = arith.addf %371, %373 : vector<2x32xf32>
    %cst_180 = arith.constant dense<0.000000e+00> : vector<32xf32>
    %375 = vector.multi_reduction <add>, %374, %cst_180 [0] : vector<2x32xf32> to vector<32xf32>
    %376 = vector.shape_cast %375 : vector<32xf32> to vector<1x32xf32>
    %cst_181 = arith.constant 2.000000e+00 : f32
    %377 = vector.broadcast %cst_181 : f32 to vector<1x32xf32>
    %378 = arith.divf %376, %377 : vector<1x32xf32>
    %379 = vector.broadcast %378 : vector<1x32xf32> to vector<2x32xf32>
    %380 = arith.subf %374, %379 : vector<2x32xf32>
    %381 = arith.mulf %380, %380 : vector<2x32xf32>
    %cst_182 = arith.constant dense<0.000000e+00> : vector<32xf32>
    %382 = vector.multi_reduction <add>, %381, %cst_182 [0] : vector<2x32xf32> to vector<32xf32>
    %383 = vector.shape_cast %382 : vector<32xf32> to vector<1x32xf32>
    %cst_183 = arith.constant 2.000000e+00 : f32
    %384 = vector.broadcast %cst_183 : f32 to vector<1x32xf32>
    %385 = arith.divf %383, %384 : vector<1x32xf32>
    %386 = vector.broadcast %378 : vector<1x32xf32> to vector<2x32xf32>
    %387 = arith.subf %374, %386 : vector<2x32xf32>
    %cst_184 = arith.constant 9.99999974E-6 : f32
    %388 = vector.broadcast %cst_184 : f32 to vector<1x32xf32>
    %389 = arith.addf %385, %388 : vector<1x32xf32>
    %390 = math.rsqrt %389 : vector<1x32xf32>
    %391 = vector.broadcast %390 : vector<1x32xf32> to vector<2x32xf32>
    %392 = arith.mulf %387, %391 : vector<2x32xf32>
    %c0_185 = arith.constant 0 : index
    %c0_186 = arith.constant 0 : index
    %393 = vector.load %arg39[%c0_185, %c0_186] : memref<1x32xf32, #tpu.memory_space<vmem>>, vector<1x32xf32>
    %394 = vector.broadcast %393 : vector<1x32xf32> to vector<2x32xf32>
    %395 = arith.mulf %392, %394 : vector<2x32xf32>
    %c0_187 = arith.constant 0 : index
    %c0_188 = arith.constant 0 : index
    %396 = vector.load %arg40[%c0_187, %c0_188] : memref<1x32xf32, #tpu.memory_space<vmem>>, vector<1x32xf32>
    %397 = vector.broadcast %396 : vector<1x32xf32> to vector<2x32xf32>
    %398 = arith.addf %395, %397 : vector<2x32xf32>
    %cst_189 = arith.constant 5.000000e-01 : f32
    %399 = vector.broadcast %cst_189 : f32 to vector<2x32xf32>
    %400 = arith.mulf %399, %398 : vector<2x32xf32>
    %cst_190 = arith.constant 0.707106769 : f32
    %401 = vector.broadcast %cst_190 : f32 to vector<2x32xf32>
    %402 = arith.mulf %398, %401 : vector<2x32xf32>
    %403 = math.erf %402 : vector<2x32xf32>
    %cst_191 = arith.constant 1.000000e+00 : f32
    %404 = vector.broadcast %cst_191 : f32 to vector<2x32xf32>
    %405 = arith.addf %404, %403 : vector<2x32xf32>
    %406 = arith.mulf %400, %405 : vector<2x32xf32>
    %c0_192 = arith.constant 0 : index
    %c0_193 = arith.constant 0 : index
    %407 = vector.load %arg41[%c0_192, %c0_193] : memref<32x16xf32, #tpu.memory_space<vmem>>, vector<32x16xf32>
    %cst_194 = arith.constant dense<0.000000e+00> : vector<2x16xf32>
    %408 = tpu.matmul %406, %407, %cst_194 {dimension_numbers = #tpu.dot_dimension_numbers<[1], [0], [0], [1], [0, 0, 1, 1], [], []>} : vector<2x32xf32>, vector<32x16xf32>, vector<2x16xf32> -> vector<2x16xf32>
    %c0_195 = arith.constant 0 : index
    %c0_196 = arith.constant 0 : index
    %409 = vector.load %arg42[%c0_195, %c0_196] : memref<1x16xf32, #tpu.memory_space<vmem>>, vector<1x16xf32>
    %410 = vector.broadcast %409 : vector<1x16xf32> to vector<2x16xf32>
    %411 = arith.addf %408, %410 : vector<2x16xf32>
    %c0_197 = arith.constant 0 : index
    %c0_198 = arith.constant 0 : index
    %412 = vector.load %arg45[%c0_197, %c0_198] : memref<2x16xf32, #tpu.memory_space<vmem>>, vector<2x16xf32>
    tpu.vector_store %arg45[%c0_197, %c0_198], %411 {strides = array<i32>} : memref<2x16xf32, #tpu.memory_space<vmem>>, vector<2x16xf32>,
    %c0_199 = arith.constant 0 : index
    %c0_200 = arith.constant 0 : index
    %413 = vector.load %arg8[%c0_199, %c0_200] : memref<8x10xf32, #tpu.memory_space<vmem>>, vector<8x10xf32>
    %cst_201 = arith.constant dense<0.000000e+00> : vector<8x32xf32>
    %414 = tpu.matmul %413, %366, %cst_201 {dimension_numbers = #tpu.dot_dimension_numbers<[1], [0], [0], [1], [0, 0, 1, 1], [], []>} : vector<8x10xf32>, vector<10x32xf32>, vector<8x32xf32> -> vector<8x32xf32>
    %c0_202 = arith.constant 0 : index
    %c0_203 = arith.constant 0 : index
    %415 = vector.load %arg6[%c0_202, %c0_203] : memref<8x8xf32, #tpu.memory_space<vmem>>, vector<8x8xf32>
    %c0_204 = arith.constant 0 : index
    %c0_205 = arith.constant 0 : index
    %c0_206 = arith.constant 0 : index
    %416 = vector.load %arg23[%c0_204, %c0_205, %c0_206] : memref<1x1x32xf32, #tpu.memory_space<vmem>>, vector<1x1x32xf32>
    %417 = vector.shape_cast %416 : vector<1x1x32xf32> to vector<1x32xf32>
    %c0_207 = arith.constant 0 : index
    %c0_208 = arith.constant 0 : index
    %c0_209 = arith.constant 0 : index
    %418 = vector.load %arg24[%c0_207, %c0_208, %c0_209] : memref<1x1x32xf32, #tpu.memory_space<vmem>>, vector<1x1x32xf32>
    %419 = vector.shape_cast %418 : vector<1x1x32xf32> to vector<1x32xf32>
    %c0_210 = arith.constant 0 : index
    %c0_211 = arith.constant 0 : index
    %c0_212 = arith.constant 0 : index
    %420 = vector.load %arg25[%c0_210, %c0_211, %c0_212] : memref<1x32x96xf32, #tpu.memory_space<vmem>>, vector<1x32x96xf32>
    %421 = vector.shape_cast %420 : vector<1x32x96xf32> to vector<32x96xf32>
    %c0_213 = arith.constant 0 : index
    %c0_214 = arith.constant 0 : index
    %c0_215 = arith.constant 0 : index
    %422 = vector.load %arg26[%c0_213, %c0_214, %c0_215] : memref<1x1x96xf32, #tpu.memory_space<vmem>>, vector<1x1x96xf32>
    %423 = vector.shape_cast %422 : vector<1x1x96xf32> to vector<1x96xf32>
    %c0_216 = arith.constant 0 : index
    %c0_217 = arith.constant 0 : index
    %c0_218 = arith.constant 0 : index
    %424 = vector.load %arg27[%c0_216, %c0_217, %c0_218] : memref<1x32x32xf32, #tpu.memory_space<vmem>>, vector<1x32x32xf32>
    %425 = vector.shape_cast %424 : vector<1x32x32xf32> to vector<32x32xf32>
    %c0_219 = arith.constant 0 : index
    %c0_220 = arith.constant 0 : index
    %c0_221 = arith.constant 0 : index
    %426 = vector.load %arg28[%c0_219, %c0_220, %c0_221] : memref<1x1x32xf32, #tpu.memory_space<vmem>>, vector<1x1x32xf32>
    %427 = vector.shape_cast %426 : vector<1x1x32xf32> to vector<1x32xf32>
    %c0_222 = arith.constant 0 : index
    %c0_223 = arith.constant 0 : index
    %c0_224 = arith.constant 0 : index
    %428 = vector.load %arg29[%c0_222, %c0_223, %c0_224] : memref<1x1x32xf32, #tpu.memory_space<vmem>>, vector<1x1x32xf32>
    %429 = vector.shape_cast %428 : vector<1x1x32xf32> to vector<1x32xf32>
    %c0_225 = arith.constant 0 : index
    %c0_226 = arith.constant 0 : index
    %c0_227 = arith.constant 0 : index
    %430 = vector.load %arg30[%c0_225, %c0_226, %c0_227] : memref<1x1x32xf32, #tpu.memory_space<vmem>>, vector<1x1x32xf32>
    %431 = vector.shape_cast %430 : vector<1x1x32xf32> to vector<1x32xf32>
    %c0_228 = arith.constant 0 : index
    %c0_229 = arith.constant 0 : index
    %c0_230 = arith.constant 0 : index
    %432 = vector.load %arg31[%c0_228, %c0_229, %c0_230] : memref<1x32x128xf32, #tpu.memory_space<vmem>>, vector<1x32x128xf32>
    %433 = vector.shape_cast %432 : vector<1x32x128xf32> to vector<32x128xf32>
    %c0_231 = arith.constant 0 : index
    %c0_232 = arith.constant 0 : index
    %c0_233 = arith.constant 0 : index
    %434 = vector.load %arg32[%c0_231, %c0_232, %c0_233] : memref<1x1x128xf32, #tpu.memory_space<vmem>>, vector<1x1x128xf32>
    %435 = vector.shape_cast %434 : vector<1x1x128xf32> to vector<1x128xf32>
    %c0_234 = arith.constant 0 : index
    %c0_235 = arith.constant 0 : index
    %c0_236 = arith.constant 0 : index
    %436 = vector.load %arg33[%c0_234, %c0_235, %c0_236] : memref<1x128x32xf32, #tpu.memory_space<vmem>>, vector<1x128x32xf32>
    %437 = vector.shape_cast %436 : vector<1x128x32xf32> to vector<128x32xf32>
    %c0_237 = arith.constant 0 : index
    %c0_238 = arith.constant 0 : index
    %c0_239 = arith.constant 0 : index
    %438 = vector.load %arg34[%c0_237, %c0_238, %c0_239] : memref<1x1x32xf32, #tpu.memory_space<vmem>>, vector<1x1x32xf32>
    %439 = vector.shape_cast %438 : vector<1x1x32xf32> to vector<1x32xf32>
    %cst_240 = arith.constant dense<0.000000e+00> : vector<8xf32>
    %440 = vector.multi_reduction <add>, %414, %cst_240 [1] : vector<8x32xf32> to vector<8xf32>
    %441 = vector.shape_cast %440 : vector<8xf32> to vector<8x1xf32>
    %cst_241 = arith.constant 3.200000e+01 : f32
    %442 = vector.broadcast %cst_241 : f32 to vector<8x1xf32>
    %443 = arith.divf %441, %442 : vector<8x1xf32>
    %444 = vector.broadcast %443 : vector<8x1xf32> to vector<8x32xf32>
    %445 = arith.subf %414, %444 : vector<8x32xf32>
    %446 = arith.mulf %445, %445 : vector<8x32xf32>
    %cst_242 = arith.constant dense<0.000000e+00> : vector<8xf32>
    %447 = vector.multi_reduction <add>, %446, %cst_242 [1] : vector<8x32xf32> to vector<8xf32>
    %448 = vector.shape_cast %447 : vector<8xf32> to vector<8x1xf32>
    %cst_243 = arith.constant 3.200000e+01 : f32
    %449 = vector.broadcast %cst_243 : f32 to vector<8x1xf32>
    %450 = arith.divf %448, %449 : vector<8x1xf32>
    %451 = vector.broadcast %443 : vector<8x1xf32> to vector<8x32xf32>
    %452 = arith.subf %414, %451 : vector<8x32xf32>
    %cst_244 = arith.constant 9.99999974E-6 : f32
    %453 = vector.broadcast %cst_244 : f32 to vector<8x1xf32>
    %454 = arith.addf %450, %453 : vector<8x1xf32>
    %455 = math.rsqrt %454 : vector<8x1xf32>
    %456 = vector.broadcast %455 : vector<8x1xf32> to vector<8x32xf32>
    %457 = arith.mulf %452, %456 : vector<8x32xf32>
    %458 = vector.broadcast %417 : vector<1x32xf32> to vector<8x32xf32>
    %459 = arith.mulf %457, %458 : vector<8x32xf32>
    %460 = vector.broadcast %419 : vector<1x32xf32> to vector<8x32xf32>
    %461 = arith.addf %459, %460 : vector<8x32xf32>
    %cst_245 = arith.constant dense<0.000000e+00> : vector<8x96xf32>
    %462 = tpu.matmul %461, %421, %cst_245 {dimension_numbers = #tpu.dot_dimension_numbers<[1], [0], [0], [1], [0, 0, 1, 1], [], []>} : vector<8x32xf32>, vector<32x96xf32>, vector<8x96xf32> -> vector<8x96xf32>
    %463 = vector.broadcast %423 : vector<1x96xf32> to vector<8x96xf32>
    %464 = arith.addf %462, %463 : vector<8x96xf32>
    %465 = vector.extract_strided_slice %464 {offsets = [0, 0], sizes = [8, 8], strides = [1, 1]} : vector<8x96xf32> to vector<8x8xf32>
    %466 = vector.extract_strided_slice %464 {offsets = [0, 32], sizes = [8, 8], strides = [1, 1]} : vector<8x96xf32> to vector<8x8xf32>
    %467 = vector.extract_strided_slice %464 {offsets = [0, 64], sizes = [8, 8], strides = [1, 1]} : vector<8x96xf32> to vector<8x8xf32>
    %cst_246 = arith.constant dense<0.000000e+00> : vector<8x8xf32>
    %468 = tpu.matmul %465, %466, %cst_246 {dimension_numbers = #tpu.dot_dimension_numbers<[1], [1], [0], [0], [0, 0, 1, 0], [], []>} : vector<8x8xf32>, vector<8x8xf32>, vector<8x8xf32> -> vector<8x8xf32>
    %cst_247 = arith.constant 0.353553385 : f32
    %469 = vector.broadcast %cst_247 : f32 to vector<8x8xf32>
    %470 = arith.mulf %468, %469 : vector<8x8xf32>
    %471 = arith.addf %470, %415 : vector<8x8xf32>
    %cst_248 = arith.constant dense<0xFF800000> : vector<8xf32>
    %472 = vector.multi_reduction <maximumf>, %471, %cst_248 [1] : vector<8x8xf32> to vector<8xf32>
    %473 = vector.shape_cast %472 : vector<8xf32> to vector<8x1xf32>
    %474 = vector.broadcast %473 : vector<8x1xf32> to vector<8x8xf32>
    %475 = arith.subf %471, %474 : vector<8x8xf32>
    %476 = math.exp %475 : vector<8x8xf32>
    %cst_249 = arith.constant dense<0.000000e+00> : vector<8xf32>
    %477 = vector.multi_reduction <add>, %476, %cst_249 [1] : vector<8x8xf32> to vector<8xf32>
    %478 = vector.shape_cast %477 : vector<8xf32> to vector<8x1xf32>
    %479 = tpu.reciprocal %478 {approx = true} : vector<8x1xf32> -> vector<8x1xf32>
    %480 = vector.broadcast %479 : vector<8x1xf32> to vector<8x8xf32>
    %481 = arith.mulf %476, %480 : vector<8x8xf32>
    %cst_250 = arith.constant dense<0.000000e+00> : vector<8x8xf32>
    %482 = tpu.matmul %481, %467, %cst_250 {dimension_numbers = #tpu.dot_dimension_numbers<[1], [0], [0], [1], [0, 0, 1, 1], [], []>} : vector<8x8xf32>, vector<8x8xf32>, vector<8x8xf32> -> vector<8x8xf32>
    %483 = vector.extract_strided_slice %464 {offsets = [0, 8], sizes = [8, 8], strides = [1, 1]} : vector<8x96xf32> to vector<8x8xf32>
    %484 = vector.extract_strided_slice %464 {offsets = [0, 40], sizes = [8, 8], strides = [1, 1]} : vector<8x96xf32> to vector<8x8xf32>
    %485 = vector.extract_strided_slice %464 {offsets = [0, 72], sizes = [8, 8], strides = [1, 1]} : vector<8x96xf32> to vector<8x8xf32>
    %cst_251 = arith.constant dense<0.000000e+00> : vector<8x8xf32>
    %486 = tpu.matmul %483, %484, %cst_251 {dimension_numbers = #tpu.dot_dimension_numbers<[1], [1], [0], [0], [0, 0, 1, 0], [], []>} : vector<8x8xf32>, vector<8x8xf32>, vector<8x8xf32> -> vector<8x8xf32>
    %cst_252 = arith.constant 0.353553385 : f32
    %487 = vector.broadcast %cst_252 : f32 to vector<8x8xf32>
    %488 = arith.mulf %486, %487 : vector<8x8xf32>
    %489 = arith.addf %488, %415 : vector<8x8xf32>
    %cst_253 = arith.constant dense<0xFF800000> : vector<8xf32>
    %490 = vector.multi_reduction <maximumf>, %489, %cst_253 [1] : vector<8x8xf32> to vector<8xf32>
    %491 = vector.shape_cast %490 : vector<8xf32> to vector<8x1xf32>
    %492 = vector.broadcast %491 : vector<8x1xf32> to vector<8x8xf32>
    %493 = arith.subf %489, %492 : vector<8x8xf32>
    %494 = math.exp %493 : vector<8x8xf32>
    %cst_254 = arith.constant dense<0.000000e+00> : vector<8xf32>
    %495 = vector.multi_reduction <add>, %494, %cst_254 [1] : vector<8x8xf32> to vector<8xf32>
    %496 = vector.shape_cast %495 : vector<8xf32> to vector<8x1xf32>
    %497 = tpu.reciprocal %496 {approx = true} : vector<8x1xf32> -> vector<8x1xf32>
    %498 = vector.broadcast %497 : vector<8x1xf32> to vector<8x8xf32>
    %499 = arith.mulf %494, %498 : vector<8x8xf32>
    %cst_255 = arith.constant dense<0.000000e+00> : vector<8x8xf32>
    %500 = tpu.matmul %499, %485, %cst_255 {dimension_numbers = #tpu.dot_dimension_numbers<[1], [0], [0], [1], [0, 0, 1, 1], [], []>} : vector<8x8xf32>, vector<8x8xf32>, vector<8x8xf32> -> vector<8x8xf32>
    %501 = vector.extract_strided_slice %464 {offsets = [0, 16], sizes = [8, 8], strides = [1, 1]} : vector<8x96xf32> to vector<8x8xf32>
    %502 = vector.extract_strided_slice %464 {offsets = [0, 48], sizes = [8, 8], strides = [1, 1]} : vector<8x96xf32> to vector<8x8xf32>
    %503 = vector.extract_strided_slice %464 {offsets = [0, 80], sizes = [8, 8], strides = [1, 1]} : vector<8x96xf32> to vector<8x8xf32>
    %cst_256 = arith.constant dense<0.000000e+00> : vector<8x8xf32>
    %504 = tpu.matmul %501, %502, %cst_256 {dimension_numbers = #tpu.dot_dimension_numbers<[1], [1], [0], [0], [0, 0, 1, 0], [], []>} : vector<8x8xf32>, vector<8x8xf32>, vector<8x8xf32> -> vector<8x8xf32>
    %cst_257 = arith.constant 0.353553385 : f32
    %505 = vector.broadcast %cst_257 : f32 to vector<8x8xf32>
    %506 = arith.mulf %504, %505 : vector<8x8xf32>
    %507 = arith.addf %506, %415 : vector<8x8xf32>
    %cst_258 = arith.constant dense<0xFF800000> : vector<8xf32>
    %508 = vector.multi_reduction <maximumf>, %507, %cst_258 [1] : vector<8x8xf32> to vector<8xf32>
    %509 = vector.shape_cast %508 : vector<8xf32> to vector<8x1xf32>
    %510 = vector.broadcast %509 : vector<8x1xf32> to vector<8x8xf32>
    %511 = arith.subf %507, %510 : vector<8x8xf32>
    %512 = math.exp %511 : vector<8x8xf32>
    %cst_259 = arith.constant dense<0.000000e+00> : vector<8xf32>
    %513 = vector.multi_reduction <add>, %512, %cst_259 [1] : vector<8x8xf32> to vector<8xf32>
    %514 = vector.shape_cast %513 : vector<8xf32> to vector<8x1xf32>
    %515 = tpu.reciprocal %514 {approx = true} : vector<8x1xf32> -> vector<8x1xf32>
    %516 = vector.broadcast %515 : vector<8x1xf32> to vector<8x8xf32>
    %517 = arith.mulf %512, %516 : vector<8x8xf32>
    %cst_260 = arith.constant dense<0.000000e+00> : vector<8x8xf32>
    %518 = tpu.matmul %517, %503, %cst_260 {dimension_numbers = #tpu.dot_dimension_numbers<[1], [0], [0], [1], [0, 0, 1, 1], [], []>} : vector<8x8xf32>, vector<8x8xf32>, vector<8x8xf32> -> vector<8x8xf32>
    %519 = vector.extract_strided_slice %464 {offsets = [0, 24], sizes = [8, 8], strides = [1, 1]} : vector<8x96xf32> to vector<8x8xf32>
    %520 = vector.extract_strided_slice %464 {offsets = [0, 56], sizes = [8, 8], strides = [1, 1]} : vector<8x96xf32> to vector<8x8xf32>
    %521 = vector.extract_strided_slice %464 {offsets = [0, 88], sizes = [8, 8], strides = [1, 1]} : vector<8x96xf32> to vector<8x8xf32>
    %cst_261 = arith.constant dense<0.000000e+00> : vector<8x8xf32>
    %522 = tpu.matmul %519, %520, %cst_261 {dimension_numbers = #tpu.dot_dimension_numbers<[1], [1], [0], [0], [0, 0, 1, 0], [], []>} : vector<8x8xf32>, vector<8x8xf32>, vector<8x8xf32> -> vector<8x8xf32>
    %cst_262 = arith.constant 0.353553385 : f32
    %523 = vector.broadcast %cst_262 : f32 to vector<8x8xf32>
    %524 = arith.mulf %522, %523 : vector<8x8xf32>
    %525 = arith.addf %524, %415 : vector<8x8xf32>
    %cst_263 = arith.constant dense<0xFF800000> : vector<8xf32>
    %526 = vector.multi_reduction <maximumf>, %525, %cst_263 [1] : vector<8x8xf32> to vector<8xf32>
    %527 = vector.shape_cast %526 : vector<8xf32> to vector<8x1xf32>
    %528 = vector.broadcast %527 : vector<8x1xf32> to vector<8x8xf32>
    %529 = arith.subf %525, %528 : vector<8x8xf32>
    %530 = math.exp %529 : vector<8x8xf32>
    %cst_264 = arith.constant dense<0.000000e+00> : vector<8xf32>
    %531 = vector.multi_reduction <add>, %530, %cst_264 [1] : vector<8x8xf32> to vector<8xf32>
    %532 = vector.shape_cast %531 : vector<8xf32> to vector<8x1xf32>
    %533 = tpu.reciprocal %532 {approx = true} : vector<8x1xf32> -> vector<8x1xf32>
    %534 = vector.broadcast %533 : vector<8x1xf32> to vector<8x8xf32>
    %535 = arith.mulf %530, %534 : vector<8x8xf32>
    %cst_265 = arith.constant dense<0.000000e+00> : vector<8x8xf32>
    %536 = tpu.matmul %535, %521, %cst_265 {dimension_numbers = #tpu.dot_dimension_numbers<[1], [0], [0], [1], [0, 0, 1, 1], [], []>} : vector<8x8xf32>, vector<8x8xf32>, vector<8x8xf32> -> vector<8x8xf32>
    %537 = tpu.concatenate %482, %500, %518, %536 in 1 : vector<8x8xf32>, vector<8x8xf32>, vector<8x8xf32>, vector<8x8xf32> -> vector<8x32xf32>
    %cst_266 = arith.constant dense<0.000000e+00> : vector<8x32xf32>
    %538 = tpu.matmul %537, %425, %cst_266 {dimension_numbers = #tpu.dot_dimension_numbers<[1], [0], [0], [1], [0, 0, 1, 1], [], []>} : vector<8x32xf32>, vector<32x32xf32>, vector<8x32xf32> -> vector<8x32xf32>
    %539 = vector.broadcast %427 : vector<1x32xf32> to vector<8x32xf32>
    %540 = arith.addf %538, %539 : vector<8x32xf32>
    %541 = arith.addf %414, %540 : vector<8x32xf32>
    %cst_267 = arith.constant dense<0.000000e+00> : vector<8xf32>
    %542 = vector.multi_reduction <add>, %541, %cst_267 [1] : vector<8x32xf32> to vector<8xf32>
    %543 = vector.shape_cast %542 : vector<8xf32> to vector<8x1xf32>
    %cst_268 = arith.constant 3.200000e+01 : f32
    %544 = vector.broadcast %cst_268 : f32 to vector<8x1xf32>
    %545 = arith.divf %543, %544 : vector<8x1xf32>
    %546 = vector.broadcast %545 : vector<8x1xf32> to vector<8x32xf32>
    %547 = arith.subf %541, %546 : vector<8x32xf32>
    %548 = arith.mulf %547, %547 : vector<8x32xf32>
    %cst_269 = arith.constant dense<0.000000e+00> : vector<8xf32>
    %549 = vector.multi_reduction <add>, %548, %cst_269 [1] : vector<8x32xf32> to vector<8xf32>
    %550 = vector.shape_cast %549 : vector<8xf32> to vector<8x1xf32>
    %cst_270 = arith.constant 3.200000e+01 : f32
    %551 = vector.broadcast %cst_270 : f32 to vector<8x1xf32>
    %552 = arith.divf %550, %551 : vector<8x1xf32>
    %553 = vector.broadcast %545 : vector<8x1xf32> to vector<8x32xf32>
    %554 = arith.subf %541, %553 : vector<8x32xf32>
    %cst_271 = arith.constant 9.99999974E-6 : f32
    %555 = vector.broadcast %cst_271 : f32 to vector<8x1xf32>
    %556 = arith.addf %552, %555 : vector<8x1xf32>
    %557 = math.rsqrt %556 : vector<8x1xf32>
    %558 = vector.broadcast %557 : vector<8x1xf32> to vector<8x32xf32>
    %559 = arith.mulf %554, %558 : vector<8x32xf32>
    %560 = vector.broadcast %429 : vector<1x32xf32> to vector<8x32xf32>
    %561 = arith.mulf %559, %560 : vector<8x32xf32>
    %562 = vector.broadcast %431 : vector<1x32xf32> to vector<8x32xf32>
    %563 = arith.addf %561, %562 : vector<8x32xf32>
    %cst_272 = arith.constant dense<0.000000e+00> : vector<8x128xf32>
    %564 = tpu.matmul %563, %433, %cst_272 {dimension_numbers = #tpu.dot_dimension_numbers<[1], [0], [0], [1], [0, 0, 1, 1], [], []>} : vector<8x32xf32>, vector<32x128xf32>, vector<8x128xf32> -> vector<8x128xf32>
    %565 = vector.broadcast %435 : vector<1x128xf32> to vector<8x128xf32>
    %566 = arith.addf %564, %565 : vector<8x128xf32>
    %cst_273 = arith.constant 5.000000e-01 : f32
    %567 = vector.broadcast %cst_273 : f32 to vector<8x128xf32>
    %568 = arith.mulf %567, %566 : vector<8x128xf32>
    %cst_274 = arith.constant 0.707106769 : f32
    %569 = vector.broadcast %cst_274 : f32 to vector<8x128xf32>
    %570 = arith.mulf %566, %569 : vector<8x128xf32>
    %571 = math.erf %570 : vector<8x128xf32>
    %cst_275 = arith.constant 1.000000e+00 : f32
    %572 = vector.broadcast %cst_275 : f32 to vector<8x128xf32>
    %573 = arith.addf %572, %571 : vector<8x128xf32>
    %574 = arith.mulf %568, %573 : vector<8x128xf32>
    %cst_276 = arith.constant dense<0.000000e+00> : vector<8x32xf32>
    %575 = tpu.matmul %574, %437, %cst_276 {dimension_numbers = #tpu.dot_dimension_numbers<[1], [0], [0], [1], [0, 0, 1, 1], [], []>} : vector<8x128xf32>, vector<128x32xf32>, vector<8x32xf32> -> vector<8x32xf32>
    %576 = vector.broadcast %439 : vector<1x32xf32> to vector<8x32xf32>
    %577 = arith.addf %575, %576 : vector<8x32xf32>
    %578 = arith.addf %541, %577 : vector<8x32xf32>
    %c0_277 = arith.constant 0 : index
    %c0_278 = arith.constant 0 : index
    %579 = vector.load %arg44[%c0_277, %c0_278] : memref<8x32xf32, #tpu.memory_space<vmem>>, vector<8x32xf32>
    tpu.vector_store %arg44[%c0_277, %c0_278], %578 {strides = array<i32>} : memref<8x32xf32, #tpu.memory_space<vmem>>, vector<8x32xf32>,
    return
  }
}

</mosaic_0001>

<bundles_post_ra>
// kernel: forward.3
= control target key start
LH: loop header
LB: loop body
LE: loop exit
PB: predicated region body
PF: predicated region fallthrough
CT: control target
= control target key end

     0   :  { %s3162_s6 = smov 1   ;;  %s3163_s10 = smov 2   ;;  %s4080_s0 = inlined_call_operand.smem [shape: u32[46], index: -1, kind: input, shape index: {}] }
   0x1   :  { %s3234_s5 = sld [smem:[%s4080_s0]]   ;;  %s3164_s14 = smov 3  }
   0x2   :  { %s3239_s9 = sld [smem:[%s4080_s0 + %s3162_s6]]   ;;  %s3165_s18 = smov 4  }
   0x3   :  { %s3244_s13 = sld [smem:[%s4080_s0 + %s3163_s10]]   ;;  %s3166_s22 = smov 5  }
   0x4   :  { %s3249_s17 = sld [smem:[%s4080_s0 + %s3164_s14]]   ;;  %s3167_s26 = smov 6  }
   0x5   :  { %s3254_s21 = sld [smem:[%s4080_s0 + %s3165_s18]]   ;;  %s3168_s30 = smov 7  }
   0x6   :  { %s3259_s25 = sld [smem:[%s4080_s0 + %s3166_s22]]   ;;  %s3169_s4 = smov 8  }
   0x7   :  { %s3264_s29 = sld [smem:[%s4080_s0 + %s3167_s26]]   ;;  %s3170_s10 = smov 9  }
   0x8   :  { %s3269_s3 = sld [smem:[%s4080_s0 + %s3168_s30]]   ;;  %s3171_s15 = smov 10  }
   0x9   :  { %s3274_s8 = sld [smem:[%s4080_s0 + %s3169_s4]]   ;;  %s3172_s20 = smov 11  }
   0xa   :  { %s3279_s14 = sld [smem:[%s4080_s0 + %s3170_s10]]   ;;  %s3173_s26 = smov 12  }
   0xb   :  { %s3284_s19 = sld [smem:[%s4080_s0 + %s3171_s15]]   ;;  %s3174_s1 = smov 13  }
   0xc   :  { %s3289_s24 = sld [smem:[%s4080_s0 + %s3172_s20]]   ;;  %s3175_s7 = smov 14  }
   0xd   :  { %4093 = sst [smem:[#allocation8_spill]] %s3264_s29  ;;  %s3176_s15 = smov 15  }
   0xe   :  { %4094 = sst [smem:[#allocation9_spill]] %s3269_s3  ;;  %s3177_s22 = smov 16  }
   0xf   :  { %4095 = sst [smem:[#allocation10_spill]] %s3274_s8  ;;  %s3178_s28 = smov 17  }
  0x10   :  { %s3294_s30 = sld [smem:[%s4080_s0 + %s3173_s26]]  }
  0x11   :  { %s3299_s6 = sld [smem:[%s4080_s0 + %s3174_s1]]  }
  0x12   :  { %s3304_s12 = sld [smem:[%s4080_s0 + %s3175_s7]]   ;;  %s3179_s7 = smov 18  }
  0x13   :  { %s3309_s20 = sld [smem:[%s4080_s0 + %s3176_s15]]   ;;  %s3180_s15 = smov 19  }
  0x14   :  { %s3314_s27 = sld [smem:[%s4080_s0 + %s3177_s22]]   ;;  %s3181_s22 = smov 20  }
  0x15   :  { %s3319_s4 = sld [smem:[%s4080_s0 + %s3178_s28]]   ;;  %s3182_s28 = smov 21  }
  0x16   :  { %s3324_s29 = sld [smem:[%s4080_s0 + %s3179_s7]]   ;;  %s3183_s7 = smov 22  }
  0x17   :  { %s3329_s3 = sld [smem:[%s4080_s0 + %s3180_s15]]   ;;  %s3184_s15 = smov 23  }
  0x18   :  { %s3334_s8 = sld [smem:[%s4080_s0 + %s3181_s22]]   ;;  %s3185_s22 = smov 24  }
  0x1b   :  { %4096 = sst [smem:[#allocation11_spill]] %s3319_s4 }
  0x1c   :  { %4097 = sst [smem:[#allocation12_spill]] %s3324_s29 }
  0x1d   :  { %4098 = sst [smem:[#allocation13_spill]] %s3329_s3 }
  0x1e   :  { %4099 = sst [smem:[#allocation14_spill]] %s3334_s8 }
  0x1f   :  { %s3339_s4 = sld [smem:[%s4080_s0 + %s3182_s28]]   ;;  %s3186_s28 = smov 25  }
  0x20   :  { %s3344_s29 = sld [smem:[%s4080_s0 + %s3183_s7]]   ;;  %s3187_s7 = smov 26  }
  0x21   :  { %s3349_s3 = sld [smem:[%s4080_s0 + %s3184_s15]]   ;;  %s3188_s15 = smov 27  }
  0x22   :  { %s3354_s8 = sld [smem:[%s4080_s0 + %s3185_s22]]   ;;  %s3189_s22 = smov 28  }
  0x25   :  { %4100 = sst [smem:[#allocation15_spill]] %s3339_s4 }
  0x26   :  { %4101 = sst [smem:[#allocation16_spill]] %s3344_s29 }
  0x27   :  { %4102 = sst [smem:[#allocation17_spill]] %s3349_s3 }
  0x28   :  { %4103 = sst [smem:[#allocation18_spill]] %s3354_s8 }
  0x29   :  { %s3359_s4 = sld [smem:[%s4080_s0 + %s3186_s28]]   ;;  %s3190_s28 = smov 29  }
  0x2a   :  { %s3364_s29 = sld [smem:[%s4080_s0 + %s3187_s7]]   ;;  %s3191_s7 = smov 30  }
  0x2b   :  { %s3369_s3 = sld [smem:[%s4080_s0 + %s3188_s15]]   ;;  %s3192_s15 = smov 31  }
  0x2c   :  { %s3374_s8 = sld [smem:[%s4080_s0 + %s3189_s22]]   ;;  %s3193_s22 = smov 32  }
  0x2f   :  { %4104 = sst [smem:[#allocation19_spill]] %s3359_s4 }
  0x30   :  { %4105 = sst [smem:[#allocation20_spill]] %s3364_s29 }
  0x31   :  { %4106 = sst [smem:[#allocation21_spill]] %s3369_s3 }
  0x32   :  { %4107 = sst [smem:[#allocation22_spill]] %s3374_s8 }
  0x33   :  { %s3379_s4 = sld [smem:[%s4080_s0 + %s3190_s28]]   ;;  %s3194_s28 = smov 33  }
  0x34   :  { %s3384_s29 = sld [smem:[%s4080_s0 + %s3191_s7]]   ;;  %s3195_s7 = smov 34  }
  0x35   :  { %s3389_s3 = sld [smem:[%s4080_s0 + %s3192_s15]]   ;;  %s3196_s15 = smov 35  }
  0x36   :  { %s3394_s8 = sld [smem:[%s4080_s0 + %s3193_s22]]   ;;  %s3197_s22 = smov 36  }
  0x39   :  { %4108 = sst [smem:[#allocation23_spill]] %s3379_s4 }
  0x3a   :  { %4109 = sst [smem:[#allocation24_spill]] %s3384_s29 }
  0x3b   :  { %4110 = sst [smem:[#allocation25_spill]] %s3389_s3 }
  0x3c   :  { %4111 = sst [smem:[#allocation26_spill]] %s3394_s8 }
  0x3d   :  { %s3399_s4 = sld [smem:[%s4080_s0 + %s3194_s28]]   ;;  %s3198_s28 = smov 37  }
  0x3e   :  { %s3404_s29 = sld [smem:[%s4080_s0 + %s3195_s7]]   ;;  %s3199_s7 = smov 38  }
  0x3f   :  { %s3409_s3 = sld [smem:[%s4080_s0 + %s3196_s15]]   ;;  %s3200_s15 = smov 39  }
  0x40   :  { %s3414_s8 = sld [smem:[%s4080_s0 + %s3197_s22]]   ;;  %s3201_s22 = smov 40  }
  0x43   :  { %4112 = sst [smem:[#allocation27_spill]] %s3399_s4 }
  0x44   :  { %4113 = sst [smem:[#allocation28_spill]] %s3404_s29 }
  0x45   :  { %4114 = sst [smem:[#allocation29_spill]] %s3409_s3 }
  0x46   :  { %4115 = sst [smem:[#allocation30_spill]] %s3414_s8 }
  0x47   :  { %s3419_s4 = sld [smem:[%s4080_s0 + %s3198_s28]]   ;;  %s3202_s28 = smov 41  }
  0x48   :  { %s3424_s29 = sld [smem:[%s4080_s0 + %s3199_s7]]   ;;  %s3203_s7 = smov 42  }
  0x49   :  { %s3429_s3 = sld [smem:[%s4080_s0 + %s3200_s15]]   ;;  %s3204_s15 = smov 43  }
  0x4a   :  { %s3434_s8 = sld [smem:[%s4080_s0 + %s3201_s22]]   ;;  %s3205_s22 = smov 44  }
  0x4d   :  { %4116 = sst [smem:[#allocation31_spill]] %s3419_s4 }
  0x4e   :  { %4117 = sst [smem:[#allocation32_spill]] %s3424_s29 }
  0x4f   :  { %4118 = sst [smem:[#allocation33_spill]] %s3429_s3 }
  0x50   :  { %4119 = sst [smem:[#allocation34_spill]] %s3434_s8 }
  0x51   :  { %s3439_s4 = sld [smem:[%s4080_s0 + %s3202_s28]]   ;;  %s3206_s28 = smov 45  }
  0x52   :  { %s3444_s29 = sld [smem:[%s4080_s0 + %s3203_s7]]  }
  0x53   :  { %s3449_s3 = sld [smem:[%s4080_s0 + %s3204_s15]]  }
  0x54   :  { %s3454_s8 = sld [smem:[%s4080_s0 + %s3205_s22]]  }
  0x57   :  { %4120 = sst [smem:[#allocation35_spill]] %s3439_s4 }
  0x58   :  { %s3459_s4 = sld [smem:[%s4080_s0 + %s3206_s28]]  }
  0x59   :  { %97 = vsyncpa [#allocation3], 0  ;;  %v193_v0 = vld [vmem:[%s3279_s14 + $0x38] sm:$0xff]  ;;  %v192_v1 = vld [vmem:[%s3279_s14 + $0x30] sm:$0xff]  ;;  %vm198_vm0 = vcmask 523264  }
  0x5a   :  { %210 = vmatpush.msra.mxu0 %v193_v0  ;;  %v191_v2 = vld [vmem:[%s3279_s14 + $0x28] sm:$0xff]  ;;  %v190_v3 = vld [vmem:[%s3279_s14 + $0x20] sm:$0xff]  ;;  %v189_v4 = vld [vmem:[%s3279_s14 + $0x18] sm:$0xff] }
  0x5b   :  { %v188_v5 = vld [vmem:[%s3279_s14 + $0x10] sm:$0xff]  ;;  %v187_v6 = vld [vmem:[%s3279_s14 + $0x8] sm:$0xff]  ;;  %v186_v7 = vld [vmem:[%s3279_s14] sm:$0xff] }
  0x5c   :  { %211 = vmatpush.msra.mxu0 %v192_v1  ;;  %v185_v8 = vld [vmem:[%s3234_s5] sm:$0xff] }
  0x5e   :  { %212 = vmatpush.msra.mxu0 %v191_v2 }
  0x60   :  { %213 = vmatpush.msra.mxu0 %v190_v3 }
  0x62   :  { %214 = vmatpush.msra.mxu0 %v189_v4 }
  0x64   :  { %215 = vmatpush.msra.mxu0 %v188_v5 }
  0x66   :  { %216 = vmatpush.msra.mxu0 %v187_v6 }
  0x67   :  { %98 = vsyncpa [#allocation5], 0  ;;  %v3207_v9 = vmov 0   ;;  %v226_v10 = vld [vmem:[%s3254_s21] sm:$0xff]  ;;  %v227_v11 = vld [vmem:[%s3254_s21 + $0x8] sm:$0x3] }
  0x68   :  { %217 = vmatpush.msra.mxu0 %v186_v7  ;;  %2953 = vset.pattern.permute.xlu0 %v3207_v9  ;;  %v2954_v12 = vld [vmem:[%s3284_s19] ss:$0 sm:$0xff]  ;;  %vm244_vm1 = vcmask 64512   ;;  %v225_v18 = vld [vmem:[%s3249_s17 + $0x8] sm:$0x3]  ;;  %vm312_vm2 = vcmask 261120  }
  0x69   :  { %2754 = vmatmul.msk.f32.vlgmr.msra.gmra.mxu0 %vm198_vm0, %v185_v8  ;;  %231 = vperm.xlu0 %2953, %v226_v10   ;;  %v222_v14 = vld [vmem:[%s3239_s9] sm:$0xff]  ;;  %vm316_vm3 = vcmask 254976   ;;  %v3208_v30 = vmov 32.0   ;;  %v281_v47 = vld [vmem:[%s3299_s6 + $0x18] sm:$0xff]  ;;  %v280_v48 = vld [vmem:[%s3299_s6 + $0x10] sm:$0xff]  ;;  %s3209_s0 = smov 120  }
  0x6a   :  { %v224_v17 = vld [vmem:[%s3249_s17] sm:$0xff]  ;;  %2986 = vrcp.f32 %v3208_v30  ;;  %v279_v49 = vld [vmem:[%s3299_s6 + $0x8] sm:$0xff]  ;;  %s3210_s5 = smov 88   ;;  %s3211_s9 = smov 96   ;;  %vm483_vm11 = vcmask 1041408   ;;  %vm448_vm12 = vcmask 80896  }
  0x6b   :  { %v2955_v20 = vld [vmem:[%s3244_s13] ss:$0 sm:$0xff]  ;;  %s3212_s13 = smov 72   ;;  %s3213_s17 = smov 112   ;;  %vm452_vm13 = vcmask 74752   ;;  %vm838_vm14 = vcmask 130048  }
  0x6c   :  { %v278_v50 = vld [vmem:[%s3299_s6] sm:$0xff]  ;;  %s3214_s21 = smov 80   ;;  %s3215_s14 = smov 104   ;;  %vm841_vm15 = vcmask 195584  }
  0x6d   :  { %v2956_v1 = vld [vmem:[%s3289_s24] ss:$0 sm:$0xff]  ;;  %s3216_s19 = smov 56   ;;  %s3217_s7 = smov 64  }
  0x6e   :  { %v2957_v5 = vld [vmem:[%s3294_s30] ss:$0 sm:$0xff]  ;;  %s3218_s10 = smov 40   ;;  %s3219_s11 = smov 48  }
  0x6f   :  { %s3220_s15 = smov 8   ;;  %s3221_s16 = smov 16  }
  0x70   :  { %v2987_v31 = vpop.eup %2986  ;;  %s3222_s18 = smov 24   ;;  %s4121_s22 = sld [smem:[#allocation13_spill]] }
  0x71   :  { %236 = vperm.xlu0 %2953, %v227_v11   ;;  %v321_v32 = vmul.f32 32.0, %v2987_v31  ;;  %vm325_vm4 = vweird.f32 %v2987_v31  ;;  %s4122_s23 = sld [smem:[#allocation11_spill]] }
  0x72   :  { %s4123_s26 = sld [smem:[#allocation12_spill]] }
  0x73   :  { %v322_v33 = vsub.f32 1.0, %v321_v32  ;;  %s4124_s28 = sld [smem:[#allocation15_spill]] }
  0x74   :  { %s4125_s1 = sld [smem:[#allocation14_spill]] }
  0x75   :  { %v323_v34 = vmul.f32 %v2987_v31, %v322_v33  ;;  %s4126_s2 = sld [smem:[#allocation16_spill]] }
  0x77   :  { %v324_v35 = vadd.f32 %v2987_v31, %v323_v34 }
  0x79   :  { %v3487_v36 = vsel %vm325_vm4, %v2987_v31, %v324_v35 }
  0xdb   :  { %v232_v19 = vpop.permute.xlu0 %231 }
  0xdc   :  { %v242_v21 = vmul.f32 %v2955_v20, %v232_v19 }
  0xe3   :  { %v237_v24 = vpop.permute.xlu0 %236 }
  0xe4   :  { %v243_v26 = vmul.f32 %v2955_v20, %v237_v24 }
  0xe6   :  { %v219_v13 = vpop.f32.mrf.mxu0 }
  0xe7   :  { %v220_v15 = vadd.f32 %v2954_v12, %v219_v13 }
  0xe9   :  { %v223_v16 = vadd.f32 %v222_v14, %v220_v15  ;;  %v2958_v15 = vld [vmem:[%s3304_s12] ss:$0 sm:$0xff] }
  0xeb   :  { %266 = vmatpush.msra.mxu1 %v223_v16  ;;  %2888 = vmatpush.msra.mxu2 %v223_v16 }
  0xec   :  { %2755 = vmatmul.msk.f32.vlgmr.msra.gmra.mxu1 %vm244_vm1, %v224_v17  ;;  %2756 = vmatmul.msk.f32.vlgmr.msra.gmra.mxu2 %vm244_vm1, %v225_v18 }
  0xed   :  { %396 = vmatpush.msrb.mxu2 %v281_v47 }
  0xef   :  { %397 = vmatpush.msrb.mxu2 %v280_v48 }
  0xf1   :  { %398 = vmatpush.msrb.mxu2 %v279_v49 }
  0xf3   :  { %399 = vmatpush.msrb.mxu2 %v278_v50 }
 0x169   :  { %v268_v22 = vpop.f32.mrf.mxu1 }
 0x16a   :  { %v3479_v23 = vadd.f32 %v268_v22, %v242_v21 }
 0x16c   :  { %v313_v25 = vsel %vm312_vm2, %v3479_v23, 0.0 }
 0x16d   :  { %314 = vadd.xlane.f32.xlu1 %v313_v25 }
 0x16f   :  { %v271_v27 = vpop.f32.mrf.mxu2 }
 0x170   :  { %v3483_v28 = vadd.f32 %v271_v27, %v243_v26 }
 0x172   :  { %v317_v29 = vsel %vm316_vm3, %v3483_v28, 0.0 }
 0x175   :  { %318 = vadd.xlane.f32.xlu1 %v317_v29 }
 0x1e0   :  { %v315_v37 = vpop.xlane.xlu1 %314 }
 0x1e1   :  { %v327_v38 = vmul.f32 %v3487_v36, %v315_v37 }
 0x1e3   :  { %v329_v39 = vsub.f32 %v3479_v23, %v327_v38 }
 0x1e5   :  { %v331_v40 = vmul.f32 %v329_v39, %v329_v39 }
 0x1e7   :  { %v333_v41 = vsel %vm312_vm2, %v331_v40, 0.0  ;;  %v3562_v40 = vld [vmem:[%s3259_s25] sm:$0xff] }
 0x1e8   :  { %334 = vadd.xlane.f32.xlu2 %v333_v41  ;;  %v319_v42 = vpop.xlane.xlu1 %318 }
 0x1e9   :  { %v328_v43 = vmul.f32 %v3487_v36, %v319_v42 }
 0x1eb   :  { %v330_v44 = vsub.f32 %v3483_v28, %v328_v43 }
 0x1ed   :  { %v332_v45 = vmul.f32 %v330_v44, %v330_v44 }
 0x1ef   :  { %v336_v46 = vsel %vm316_vm3, %v332_v45, 0.0 }
 0x1f0   :  { %337 = vadd.xlane.f32.xlu2 %v336_v46 }
 0x25b   :  { %v335_v51 = vpop.xlane.xlu2 %334 }
 0x25c   :  { %v339_v52 = vmul.f32 %v335_v51, %v3487_v36 }
 0x25e   :  { %v341_v53 = vadd.f32 1e-05, %v339_v52 }
 0x260   :  { %2988 = vrsqrt.f32 %v341_v53  ;;  %vm349_vm6 = vweird.f32 %v341_v53 }
 0x263   :  { %v338_v54 = vpop.xlane.xlu2 %337 }
 0x264   :  { %v340_v55 = vmul.f32 %v338_v54, %v3487_v36  ;;  %v3573_v54 = vld [vmem:[%s3259_s25 + $0x8] sm:$0x3] }
 0x266   :  { %v2989_v56 = vpop.eup %2988  ;;  %v342_v57 = vadd.f32 1e-05, %v340_v55 }
 0x267   :  { %v344_v58 = vmul.f32 %v2989_v56, %v341_v53  ;;  %vm350_vm5 = vweird.f32 %v2989_v56 }
 0x268   :  { %2990 = vrsqrt.f32 %v342_v57  ;;  %vm351_vm7 = vmor %vm349_vm6, %vm350_vm5  ;;  %vm359_vm9 = vweird.f32 %v342_v57 }
 0x269   :  { %v345_v59 = vmul.f32 %v2989_v56, %v344_v58 }
 0x26b   :  { %v346_v60 = vmul.f32 0.5, %v345_v59 }
 0x26d   :  { %v347_v61 = vsub.f32 1.5, %v346_v60 }
 0x26e   :  { %v2991_v62 = vpop.eup %2990 }
 0x26f   :  { %v348_v63 = vmul.f32 %v2989_v56, %v347_v61  ;;  %v354_v0 = vmul.f32 %v2991_v62, %v342_v57  ;;  %vm360_vm8 = vweird.f32 %v2991_v62 }
 0x270   :  { %vm361_vm10 = vmor %vm359_vm9, %vm360_vm8 }
 0x271   :  { %v352_v2 = vsel %vm351_vm7, %v2989_v56, %v348_v63  ;;  %v355_v3 = vmul.f32 %v2991_v62, %v354_v0 }
 0x272   :  { %v363_v4 = vmul.f32 %v352_v2, %v329_v39 }
 0x273   :  { %v356_v6 = vmul.f32 0.5, %v355_v3 }
 0x274   :  { %v368_v7 = vmul.f32 %v2956_v1, %v363_v4 }
 0x275   :  { %v357_v8 = vsub.f32 1.5, %v356_v6 }
 0x276   :  { %v373_v9 = vadd.f32 %v2957_v5, %v368_v7 }
 0x277   :  { %v358_v10 = vmul.f32 %v2991_v62, %v357_v8 }
 0x278   :  { %2757 = vmatmul.msk.f32.vlgmr.msrb.gmra.mxu2 %vm312_vm2, %v373_v9 }
 0x279   :  { %v362_v11 = vsel %vm361_vm10, %v2991_v62, %v358_v10 }
 0x27a   :  { %v364_v12 = vmul.f32 %v362_v11, %v330_v44 }
 0x27c   :  { %v369_v13 = vmul.f32 %v2956_v1, %v364_v12 }
 0x27e   :  { %v374_v14 = vadd.f32 %v2957_v5, %v369_v13 }
 0x280   :  { %2758 = vmatmul.msk.f32.gmra.mxu2 %vm312_vm2, %v374_v14 }
 0x2fb   :  { %v401_v16 = vpop.f32.mrf.mxu2 }
 0x2fc   :  { %v3506_v17 = vadd.f32 %v2958_v15, %v401_v16 }
 0x2fe   :  { %509 = vrot.lane.b32.xlu0 %v3506_v17, %s3209_s0  ;;  %513 = vrot.lane.b32.xlu1 %v3506_v17, %s3210_s5 }
 0x303   :  { %v404_v18 = vpop.f32.mrf.mxu2 }
 0x304   :  { %v3512_v19 = vadd.f32 %v2958_v15, %v404_v18 }
 0x306   :  { %409 = vrot.lane.b32.xlu0 %v3506_v17, %s3211_s9  ;;  %717 = vrot.lane.b32.xlu1 %v3512_v19, %s3212_s13 }
 0x307   :  { %411 = vrot.lane.b32.xlu2 %v3512_v19, %s3211_s9 }
 0x30e   :  { %610 = vrot.lane.b32.xlu1 %v3506_v17, %s3213_s17  ;;  %515 = vrot.lane.b32.xlu0 %v3512_v19, %s3210_s5 }
 0x30f   :  { %616 = vrot.lane.b32.xlu2 %v3512_v19, %s3214_s21 }
 0x316   :  { %713 = vrot.lane.b32.xlu1 %v3512_v19, %s3215_s14  ;;  %614 = vrot.lane.b32.xlu0 %v3506_v17, %s3214_s21 }
 0x317   :  { %715 = vrot.lane.b32.xlu2 %v3506_v17, %s3212_s13 }
 0x31e   :  { %511 = vrot.lane.b32.xlu0 %v3512_v19, %s3209_s0 }
 0x31f   :  { %612 = vrot.lane.b32.xlu2 %v3512_v19, %s3213_s17 }
 0x326   :  { %711 = vrot.lane.b32.xlu0 %v3506_v17, %s3215_s14 }
 0x327   :  { %574 = vrot.lane.b32.xlu2 %v3506_v17, %s3216_s19 }
 0x32e   :  { %576 = vrot.lane.b32.xlu0 %v3512_v19, %s3216_s19 }
 0x361   :  { %v412_v20 = vpop.permute.xlu2 %411 }
 0x362   :  { %2759 = vmatpush.xpose.msk.msrb.mxu1 %vm244_vm1, %v412_v20 }
 0x369   :  { %v617_v21 = vpop.permute.xlu2 %616 }
 0x36a   :  { %2773 = vmatpush.xpose.msk.msra.mxu3 %vm244_vm1, %v617_v21 }
 0x370   :  { %v510_v22 = vpop.permute.xlu0 %509  ;;  %v514_v24 = vpop.permute.xlu1 %513 }
 0x371   :  { %v716_v30 = vpop.permute.xlu2 %715 }
 0x378   :  { %v410_v25 = vpop.permute.xlu0 %409  ;;  %v718_v27 = vpop.permute.xlu1 %717 }
 0x379   :  { %2760 = vmatpush.xpose.msk.msrb.mxu1 %vm244_vm1, %v410_v25  ;;  %v613_v33 = vpop.permute.xlu2 %612 }
 0x37c   :  { %2761 = vmatmul.msk.f32.vlgmr.msrb.gmra.mxu1 %vm244_vm1, %v3506_v17 }
 0x380   :  { %v516_v26 = vpop.permute.xlu0 %515  ;;  %v611_v31 = vpop.permute.xlu1 %610 }
 0x381   :  { %2766 = vmatpush.xpose.msk.msrb.mxu0 %vm244_vm1, %v516_v26  ;;  %v575_v38 = vpop.permute.xlu2 %574 }
 0x384   :  { %2762 = vmatmul.msk.f32.gmra.mxu1 %vm244_vm1, %v3512_v19 }
 0x385   :  { %2767 = vmatpush.xpose.msk.msrb.mxu0 %vm244_vm1, %v514_v24 }
 0x388   :  { %v615_v29 = vpop.permute.xlu0 %614  ;;  %2768 = vmatmul.msk.f32.vlgmr.msrb.gmra.mxu0 %vm244_vm1, %v510_v22  ;;  %v714_v35 = vpop.permute.xlu1 %713 }
 0x389   :  { %2780 = vmatpush.xpose.msk.msra.mxu0 %vm244_vm1, %v718_v27  ;;  %2774 = vmatpush.xpose.msk.msra.mxu3 %vm244_vm1, %v615_v29 }
 0x38c   :  { %2775 = vmatmul.msk.f32.vlgmr.msra.gmra.mxu3 %vm244_vm1, %v611_v31 }
 0x38d   :  { %2781 = vmatpush.xpose.msk.msra.mxu0 %vm244_vm1, %v716_v30 }
 0x390   :  { %v512_v32 = vpop.permute.xlu0 %511 }
 0x391   :  { %2769 = vmatmul.msk.f32.gmra.mxu0 %vm244_vm1, %v512_v32 }
 0x394   :  { %2776 = vmatmul.msk.f32.gmra.mxu3 %vm244_vm1, %v613_v33 }
 0x398   :  { %v712_v34 = vpop.permute.xlu0 %711 }
 0x399   :  { %2782 = vmatmul.msk.f32.vlgmr.msra.gmra.mxu0 %vm244_vm1, %v712_v34 }
 0x3a0   :  { %v577_v37 = vpop.permute.xlu0 %576 }
 0x3a1   :  { %2770 = vmatpush.msk.msra.mxu2 %vm483_vm11, %v577_v37  ;;  %2783 = vmatmul.msk.f32.gmra.mxu0 %vm244_vm1, %v714_v35 }
 0x3a3   :  { %602 = vmatpush.msra.mxu2 %v575_v38 }
 0x3f9   :  { %v438_v39 = vpop.f32.mrf.mxu1 }
 0x3fa   :  { %v444_v41 = vmul.f32 0.35355338, %v438_v39 }
 0x3fc   :  { %v446_v42 = vadd.f32 %v444_v41, %v3562_v40 }
 0x3fe   :  { %v449_v43 = vsel %vm448_vm12, %v446_v42, -inf }
 0x3ff   :  { %450 = vmax.xlane.f32.xlu2 %v449_v43 }
 0x401   :  { %v441_v58 = vpop.f32.mrf.mxu1 }
 0x402   :  { %v445_v59 = vmul.f32 0.35355338, %v441_v58 }
 0x404   :  { %v447_v60 = vadd.f32 %v445_v59, %v3573_v54 }
 0x405   :  { %v542_v44 = vpop.f32.mrf.mxu0 }
 0x406   :  { %v548_v45 = vmul.f32 0.35355338, %v542_v44  ;;  %v453_v0 = vsel %vm452_vm13, %v447_v60, -inf }
 0x408   :  { %v550_v46 = vadd.f32 %v548_v45, %v3562_v40 }
 0x40a   :  { %v552_v47 = vsel %vm448_vm12, %v550_v46, -inf }
 0x40b   :  { %553 = vmax.xlane.f32.xlu0 %v552_v47 }
 0x40e   :  { %v545_v50 = vpop.f32.mrf.mxu0 }
 0x40f   :  { %v643_v48 = vpop.f32.mrf.mxu3  ;;  %v549_v52 = vmul.f32 0.35355338, %v545_v50 }
 0x410   :  { %v649_v49 = vmul.f32 0.35355338, %v643_v48 }
 0x411   :  { %v551_v55 = vadd.f32 %v549_v52, %v3573_v54 }
 0x412   :  { %v651_v51 = vadd.f32 %v649_v49, %v3562_v40 }
 0x413   :  { %v555_v56 = vsel %vm452_vm13, %v551_v55, -inf }
 0x414   :  { %v653_v53 = vsel %vm448_vm12, %v651_v51, -inf }
 0x415   :  { %654 = vmax.xlane.f32.xlu1 %v653_v53 }
 0x416   :  { %v744_v57 = vpop.f32.mrf.mxu0 }
 0x417   :  { %472 = vrot.lane.b32.xlu2 %v3506_v17, %s3217_s7  ;;  %v646_v62 = vpop.f32.mrf.mxu3  ;;  %v750_v5 = vmul.f32 0.35355338, %v744_v57 }
 0x418   :  { %v650_v1 = vmul.f32 0.35355338, %v646_v62 }
 0x419   :  { %v752_v7 = vadd.f32 %v750_v5, %v3562_v40 }
 0x41a   :  { %v3585_v3 = vadd.f32 %v650_v1, %v3573_v54 }
 0x41b   :  { %v754_v8 = vsel %vm448_vm12, %v752_v7, -inf }
 0x41c   :  { %v656_v6 = vsel %vm452_vm13, %v3585_v3, -inf }
 0x41d   :  { %556 = vmax.xlane.f32.xlu1 %v555_v56 }
 0x41e   :  { %v747_v61 = vpop.f32.mrf.mxu0 }
 0x41f   :  { %778 = vrot.lane.b32.xlu0 %v3512_v19, %s3218_s10  ;;  %v751_v63 = vmul.f32 0.35355338, %v747_v61 }
 0x421   :  { %v753_v2 = vadd.f32 %v751_v63, %v3573_v54 }
 0x423   :  { %v757_v4 = vsel %vm452_vm13, %v753_v2, -inf }
 0x436   :  { %474 = vrot.lane.b32.xlu1 %v3512_v19, %s3217_s7 }
 0x440   :  { %454 = vmax.xlane.f32.xlu2 %v453_v0 }
 0x448   :  { %758 = vmax.xlane.f32.xlu2 %v757_v4 }
 0x449   :  { %657 = vmax.xlane.f32.xlu0 %v656_v6 }
 0x451   :  { %755 = vmax.xlane.f32.xlu0 %v754_v8 }
 0x465   :  { %677 = vrot.lane.b32.xlu0 %v3512_v19, %s3219_s11 }
 0x472   :  { %v451_v9 = vpop.xlane.xlu2 %450 }
 0x473   :  { %v456_v10 = vsub.f32 %v446_v42, %v451_v9 }
 0x475   :  { %v458_v11 = vmul.f32 1.442695, %v456_v10 }
 0x477   :  { %2992 = vpow2.f32 %v458_v11 }
 0x47a   :  { %v473_v34 = vpop.permute.xlu2 %472 }
 0x47d   :  { %v3594_v12 = vpop.eup %2992 }
 0x47e   :  { %v554_v13 = vpop.xlane.xlu0 %553  ;;  %v462_v14 = vsel %vm448_vm12, %v3594_v12, 0.0 }
 0x47f   :  { %v558_v15 = vsub.f32 %v550_v46, %v554_v13  ;;  %463 = vadd.xlane.f32.xlu2 %v462_v14 }
 0x481   :  { %v560_v16 = vmul.f32 1.442695, %v558_v15 }
 0x483   :  { %2994 = vpow2.f32 %v560_v16 }
 0x488   :  { %v655_v18 = vpop.xlane.xlu1 %654 }
 0x489   :  { %v2995_v20 = vpop.eup %2994  ;;  %v659_v21 = vsub.f32 %v651_v51, %v655_v18 }
 0x48a   :  { %v564_v22 = vsel %vm448_vm12, %v2995_v20, 0.0 }
 0x48b   :  { %v661_v19 = vmul.f32 1.442695, %v659_v21  ;;  %565 = vadd.xlane.f32.xlu1 %v564_v22 }
 0x48d   :  { %2996 = vpow2.f32 %v661_v19 }
 0x490   :  { %v557_v24 = vpop.xlane.xlu1 %556 }
 0x491   :  { %v559_v25 = vsub.f32 %v551_v55, %v557_v24  ;;  %v779_v26 = vpop.permute.xlu0 %778 }
 0x492   :  { %2784 = vmatpush.msk.msrb.mxu2 %vm483_vm11, %v779_v26 }
 0x493   :  { %v3600_v27 = vpop.eup %2996  ;;  %v562_v29 = vmul.f32 1.442695, %v559_v25 }
 0x494   :  { %v665_v30 = vsel %vm448_vm12, %v3600_v27, 0.0 }
 0x495   :  { %2998 = vpow2.f32 %v562_v29  ;;  %666 = vadd.xlane.f32.xlu2 %v665_v30 }
 0x49b   :  { %v2999_v31 = vpop.eup %2998 }
 0x49c   :  { %v567_v32 = vsel %vm452_vm13, %v2999_v31, 0.0 }
 0x49d   :  { %568 = vadd.xlane.f32.xlu1 %v567_v32  ;;  %v285_v32 = vld [vmem:[%s3309_s20 + $0x10] sm:$0xff] }
 0x4a8   :  { %v475_v33 = vpop.permute.xlu1 %474 }
 0x4a9   :  { %2763 = vmatpush.msk.msra.mxu1 %vm483_vm11, %v475_v33  ;;  %v284_v33 = vld [vmem:[%s3309_s20 + $0x8] sm:$0xff] }
 0x4ab   :  { %501 = vmatpush.msra.mxu1 %v473_v34  ;;  %v283_v34 = vld [vmem:[%s3309_s20] sm:$0xff] }
 0x4ad   :  { %776 = vrot.lane.b32.xlu2 %v3506_v17, %s3218_s10 }
 0x4b3   :  { %v455_v35 = vpop.xlane.xlu2 %454 }
 0x4b4   :  { %v457_v37 = vsub.f32 %v447_v60, %v455_v35 }
 0x4b6   :  { %v460_v38 = vmul.f32 1.442695, %v457_v37 }
 0x4b8   :  { %3000 = vpow2.f32 %v460_v38 }
 0x4bb   :  { %v759_v43 = vpop.xlane.xlu2 %758 }
 0x4bc   :  { %v658_v39 = vpop.xlane.xlu0 %657  ;;  %v761_v46 = vsub.f32 %v753_v2, %v759_v43 }
 0x4bd   :  { %v660_v50 = vsub.f32 %v3585_v3, %v658_v39 }
 0x4be   :  { %v3001_v41 = vpop.eup %3000  ;;  %v764_v48 = vmul.f32 1.442695, %v761_v46 }
 0x4bf   :  { %v465_v42 = vsel %vm452_vm13, %v3001_v41, 0.0  ;;  %v663_v52 = vmul.f32 1.442695, %v660_v50 }
 0x4c0   :  { %466 = vadd.xlane.f32.xlu0 %v465_v42 }
 0x4c4   :  { %v756_v44 = vpop.xlane.xlu0 %755 }
 0x4c5   :  { %v760_v45 = vsub.f32 %v752_v7, %v756_v44 }
 0x4c7   :  { %v762_v47 = vmul.f32 1.442695, %v760_v45 }
 0x4c9   :  { %3002 = vpow2.f32 %v762_v47 }
 0x4ca   :  { %3004 = vpow2.f32 %v764_v48 }
 0x4cb   :  { %3006 = vpow2.f32 %v663_v52 }
 0x4cf   :  { %v3003_v49 = vpop.eup %3002 }
 0x4d0   :  { %v766_v51 = vsel %vm448_vm12, %v3003_v49, 0.0  ;;  %v3005_v53 = vpop.eup %3004 }
 0x4d1   :  { %767 = vadd.xlane.f32.xlu1 %v766_v51  ;;  %v769_v56 = vsel %vm452_vm13, %v3005_v53, 0.0  ;;  %v3007_v57 = vpop.eup %3006 }
 0x4d2   :  { %v668_v58 = vsel %vm452_vm13, %v3007_v57, 0.0 }
 0x4d4   :  { %675 = vrot.lane.b32.xlu0 %v3506_v17, %s3219_s11 }
 0x4d7   :  { %v678_v55 = vpop.permute.xlu0 %677 }
 0x4d8   :  { %2777 = vmatpush.msk.msrb.mxu1 %vm483_vm11, %v678_v55 }
 0x4d9   :  { %770 = vadd.xlane.f32.xlu1 %v769_v56 }
 0x4e1   :  { %669 = vadd.xlane.f32.xlu1 %v668_v58 }
 0x4f2   :  { %v464_v59 = vpop.xlane.xlu2 %463 }
 0x4f3   :  { %3008 = vrcp.f32 %v464_v59 }
 0x4f9   :  { %v3009_v60 = vpop.eup %3008 }
 0x4fa   :  { %v470_v61 = vmul.f32 %v3009_v60, %v3594_v12 }
 0x4fc   :  { %2764 = vmatmul.msk.f32.vlgmr.msra.gmra.mxu1 %vm448_vm12, %v470_v61 }
 0x4fe   :  { %v566_v17 = vpop.xlane.xlu1 %565 }
 0x4ff   :  { %3010 = vrcp.f32 %v566_v17 }
 0x505   :  { %v3011_v62 = vpop.eup %3010 }
 0x506   :  { %v572_v63 = vmul.f32 %v3011_v62, %v2995_v20 }
 0x508   :  { %v667_v0 = vpop.xlane.xlu2 %666  ;;  %2771 = vmatmul.msk.f32.vlgmr.msra.gmra.mxu2 %vm448_vm12, %v572_v63 }
 0x510   :  { %v777_v1 = vpop.permute.xlu2 %776  ;;  %v569_v2 = vpop.xlane.xlu1 %568 }
 0x511   :  { %3012 = vrcp.f32 %v569_v2  ;;  %804 = vmatpush.msrb.mxu2 %v777_v1  ;;  %v293_v2 = vld [vmem:[%s4121_s22 + $0x18] sm:$0xff] }
 0x517   :  { %v3013_v3 = vpop.eup %3012 }
 0x518   :  { %v573_v4 = vmul.f32 %v3013_v3, %v2999_v31  ;;  %v286_v31 = vld [vmem:[%s3309_s20 + $0x18] sm:$0xff]  ;;  %v292_v3 = vld [vmem:[%s4121_s22 + $0x10] sm:$0xff] }
 0x519   :  { %865 = vmatpush.msrb.mxu3 %v286_v31 }
 0x51a   :  { %2772 = vmatmul.msk.f32.gmra.mxu2 %vm448_vm12, %v573_v4  ;;  %v291_v4 = vld [vmem:[%s4121_s22 + $0x8] sm:$0xff] }
 0x51b   :  { %866 = vmatpush.msrb.mxu3 %v285_v32 }
 0x51d   :  { %867 = vmatpush.msrb.mxu3 %v284_v33 }
 0x51f   :  { %868 = vmatpush.msrb.mxu3 %v283_v34 }
 0x533   :  { %v467_v5 = vpop.xlane.xlu0 %466 }
 0x534   :  { %3014 = vrcp.f32 %v467_v5  ;;  %v290_v5 = vld [vmem:[%s4121_s22] sm:$0xff] }
 0x535   :  { %3016 = vrcp.f32 %v667_v0 }
 0x53a   :  { %v3015_v6 = vpop.eup %3014 }
 0x53b   :  { %v471_v7 = vmul.f32 %v3015_v6, %v3001_v41  ;;  %v3017_v8 = vpop.eup %3016 }
 0x53c   :  { %v673_v10 = vmul.f32 %v3017_v8, %v3600_v27 }
 0x53d   :  { %2765 = vmatmul.msk.f32.gmra.mxu1 %vm448_vm12, %v471_v7 }
 0x544   :  { %v768_v9 = vpop.xlane.xlu1 %767 }
 0x545   :  { %3018 = vrcp.f32 %v768_v9 }
 0x546   :  { %v676_v11 = vpop.permute.xlu0 %675 }
 0x547   :  { %703 = vmatpush.msrb.mxu1 %v676_v11 }
 0x548   :  { %2778 = vmatmul.msk.f32.vlgmr.msrb.gmra.mxu1 %vm448_vm12, %v673_v10 }
 0x549   :  { %953 = vmatpush.msra.mxu1 %v293_v2 }
 0x54b   :  { %v3019_v12 = vpop.eup %3018  ;;  %954 = vmatpush.msra.mxu1 %v292_v3  ;;  %v297_v3 = vld [vmem:[%s4124_s28 + $0x10] sm:$0xff] }
 0x54c   :  { %v774_v13 = vmul.f32 %v3019_v12, %v3003_v49  ;;  %v771_v14 = vpop.xlane.xlu1 %770  ;;  %v2959_v49 = vld [vmem:[%s3314_s27] ss:$0 sm:$0xff] }
 0x54d   :  { %3020 = vrcp.f32 %v771_v14  ;;  %955 = vmatpush.msra.mxu1 %v291_v4 }
 0x54e   :  { %2785 = vmatmul.msk.f32.vlgmr.msrb.gmra.mxu2 %vm448_vm12, %v774_v13 }
 0x54f   :  { %956 = vmatpush.msra.mxu1 %v290_v5 }
 0x553   :  { %v3021_v15 = vpop.eup %3020 }
 0x554   :  { %v670_v16 = vpop.xlane.xlu1 %669  ;;  %v775_v18 = vmul.f32 %v3021_v15, %v3005_v53 }
 0x555   :  { %3022 = vrcp.f32 %v670_v16 }
 0x556   :  { %2786 = vmatmul.msk.f32.gmra.mxu2 %vm448_vm12, %v775_v18  ;;  %v2960_v18 = vld [vmem:[%s4122_s23] ss:$0 sm:$0xff] }
 0x55b   :  { %v3023_v20 = vpop.eup %3022 }
 0x55c   :  { %v674_v21 = vmul.f32 %v3023_v20, %v3007_v57 }
 0x55e   :  { %2779 = vmatmul.msk.f32.gmra.mxu1 %vm448_vm12, %v674_v21 }
 0x579   :  { %v503_v19 = vpop.f32.mrf.mxu1 }
 0x58b   :  { %v604_v22 = vpop.f32.mrf.mxu2 }
 0x58c   :  { %814 = vrot.lane.b32.xlu1 %v604_v22, %s3220_s15 }
 0x59d   :  { %v607_v26 = vpop.f32.mrf.mxu2 }
 0x5ba   :  { %v506_v24 = vpop.f32.mrf.mxu1 }
 0x5c5   :  { %v705_v25 = vpop.f32.mrf.mxu1 }
 0x5c6   :  { %822 = vrot.lane.b32.xlu0 %v705_v25, %s3221_s16 }
 0x5ce   :  { %816 = vrot.lane.b32.xlu0 %v607_v26, %s3220_s15 }
 0x5d1   :  { %v806_v27 = vpop.f32.mrf.mxu2 }
 0x5d2   :  { %830 = vrot.lane.b32.xlu2 %v806_v27, %s3222_s18 }
 0x5d9   :  { %v809_v29 = vpop.f32.mrf.mxu2 }
 0x5da   :  { %832 = vrot.lane.b32.xlu0 %v809_v29, %s3222_s18 }
 0x5db   :  { %v708_v30 = vpop.f32.mrf.mxu1 }
 0x5dc   :  { %824 = vrot.lane.b32.xlu2 %v708_v30, %s3221_s16 }
 0x5fe   :  { %v815_v35 = vpop.permute.xlu1 %814 }
 0x5ff   :  { %v836_v37 = vsel %vm244_vm1, %v503_v19, %v815_v35  ;;  %v2961_v19 = vld [vmem:[%s4123_s26] ss:$0 sm:$0xff] }
 0x62c   :  { %v831_v39 = vpop.permute.xlu2 %830 }
 0x636   :  { %v825_v45 = vpop.permute.xlu2 %824 }
 0x638   :  { %v823_v38 = vpop.permute.xlu0 %822 }
 0x639   :  { %v839_v41 = vsel %vm838_vm14, %v836_v37, %v823_v38  ;;  %v310_v38 = vld [vmem:[%s4124_s28 + $0x78] sm:$0xff] }
 0x63a   :  { %v842_v42 = vsel %vm841_vm15, %v839_v41, %v831_v39  ;;  %1055 = vmatpush.msrb.mxu0 %v310_v38  ;;  %v309_v39 = vld [vmem:[%s4124_s28 + $0x70] sm:$0xff]  ;;  %v308_v41 = vld [vmem:[%s4124_s28 + $0x68] sm:$0xff] }
 0x63b   :  { %2787 = vmatmul.msk.f32.vlgmr.msrb.gmra.mxu3 %vm312_vm2, %v842_v42  ;;  %v2962_v42 = vld [vmem:[%s4125_s1] ss:$0 sm:$0xff] }
 0x63c   :  { %1056 = vmatpush.msrb.mxu0 %v309_v39 }
 0x63e   :  { %1057 = vmatpush.msrb.mxu0 %v308_v41 }
 0x640   :  { %v817_v43 = vpop.permute.xlu0 %816 }
 0x641   :  { %v837_v44 = vsel %vm244_vm1, %v506_v24, %v817_v43  ;;  %v307_v43 = vld [vmem:[%s4124_s28 + $0x60] sm:$0xff] }
 0x642   :  { %v840_v47 = vsel %vm838_vm14, %v837_v44, %v825_v45  ;;  %1058 = vmatpush.msrb.mxu0 %v307_v43  ;;  %v306_v44 = vld [vmem:[%s4124_s28 + $0x58] sm:$0xff] }
 0x644   :  { %1059 = vmatpush.msrb.mxu0 %v306_v44 }
 0x64c   :  { %v833_v46 = vpop.permute.xlu0 %832 }
 0x64d   :  { %v843_v48 = vsel %vm841_vm15, %v840_v47, %v833_v46  ;;  %v305_v47 = vld [vmem:[%s4124_s28 + $0x50] sm:$0xff] }
 0x64e   :  { %2788 = vmatmul.msk.f32.gmra.mxu3 %vm312_vm2, %v843_v48  ;;  %1060 = vmatpush.msrb.mxu0 %v305_v47 }
 0x6be   :  { %v870_v50 = vpop.f32.mrf.mxu3 }
 0x6bf   :  { %v871_v51 = vadd.f32 %v2959_v49, %v870_v50 }
 0x6c1   :  { %v3646_v52 = vadd.f32 %v871_v51, %v3479_v23  ;;  %v303_v51 = vld [vmem:[%s4124_s28 + $0x40] sm:$0xff] }
 0x6c3   :  { %v878_v53 = vsel %vm312_vm2, %v3646_v52, 0.0 }
 0x6c4   :  { %879 = vadd.xlane.f32.xlu1 %v878_v53 }
 0x6d1   :  { %v873_v55 = vpop.f32.mrf.mxu3 }
 0x6d2   :  { %v874_v56 = vadd.f32 %v2959_v49, %v873_v55  ;;  %v304_v49 = vld [vmem:[%s4124_s28 + $0x48] sm:$0xff]  ;;  %v302_v55 = vld [vmem:[%s4124_s28 + $0x38] sm:$0xff] }
 0x6d3   :  { %1061 = vmatpush.msrb.mxu0 %v304_v49 }
 0x6d4   :  { %v3651_v57 = vadd.f32 %v874_v56, %v3483_v28 }
 0x6d5   :  { %1062 = vmatpush.msrb.mxu0 %v303_v51 }
 0x6d6   :  { %v881_v58 = vsel %vm316_vm3, %v3651_v57, 0.0 }
 0x6d7   :  { %882 = vadd.xlane.f32.xlu2 %v881_v58  ;;  %1063 = vmatpush.msrb.mxu0 %v302_v55 }
 0x737   :  { %v880_v59 = vpop.xlane.xlu1 %879 }
 0x738   :  { %v884_v23 = vmul.f32 %v880_v59, %v3487_v36  ;;  %v301_v59 = vld [vmem:[%s4124_s28 + $0x30] sm:$0xff] }
 0x739   :  { %1064 = vmatpush.msrb.mxu0 %v301_v59 }
 0x73a   :  { %v886_v60 = vsub.f32 %v3646_v52, %v884_v23 }
 0x73c   :  { %v888_v61 = vmul.f32 %v886_v60, %v886_v60 }
 0x73e   :  { %v890_v17 = vsel %vm312_vm2, %v888_v61, 0.0  ;;  %v300_v61 = vld [vmem:[%s4124_s28 + $0x28] sm:$0xff] }
 0x73f   :  { %891 = vadd.xlane.f32.xlu0 %v890_v17  ;;  %1065 = vmatpush.msrb.mxu0 %v300_v61 }
 0x74a   :  { %v883_v62 = vpop.xlane.xlu2 %882 }
 0x74b   :  { %v885_v28 = vmul.f32 %v883_v62, %v3487_v36 }
 0x74d   :  { %v887_v63 = vsub.f32 %v3651_v57, %v885_v28  ;;  %v299_v28 = vld [vmem:[%s4124_s28 + $0x20] sm:$0xff] }
 0x74e   :  { %1066 = vmatpush.msrb.mxu0 %v299_v28 }
 0x74f   :  { %v889_v0 = vmul.f32 %v887_v63, %v887_v63 }
 0x751   :  { %v893_v1 = vsel %vm316_vm3, %v889_v0, 0.0 }
 0x752   :  { %894 = vadd.xlane.f32.xlu1 %v893_v1  ;;  %v298_v1 = vld [vmem:[%s4124_s28 + $0x18] sm:$0xff] }
 0x753   :  { %1067 = vmatpush.msrb.mxu0 %v298_v1 }
 0x755   :  { %1068 = vmatpush.msrb.mxu0 %v297_v3 }
 0x7b2   :  { %v892_v6 = vpop.xlane.xlu0 %891 }
 0x7b3   :  { %v896_v7 = vmul.f32 %v892_v6, %v3487_v36 }
 0x7b5   :  { %v898_v8 = vadd.f32 1e-05, %v896_v7  ;;  %v296_v7 = vld [vmem:[%s4124_s28 + $0x8] sm:$0xff] }
 0x7b6   :  { %1069 = vmatpush.msrb.mxu0 %v296_v7 }
 0x7b7   :  { %3024 = vrsqrt.f32 %v898_v8  ;;  %vm906_vm4 = vweird.f32 %v898_v8 }
 0x7bd   :  { %v3025_v9 = vpop.eup %3024 }
 0x7be   :  { %v901_v10 = vmul.f32 %v3025_v9, %v898_v8  ;;  %vm907_vm0 = vweird.f32 %v3025_v9 }
 0x7bf   :  { %vm908_vm5 = vmor %vm906_vm4, %vm907_vm0 }
 0x7c0   :  { %v902_v11 = vmul.f32 %v3025_v9, %v901_v10 }
 0x7c2   :  { %v903_v12 = vmul.f32 0.5, %v902_v11 }
 0x7c4   :  { %v904_v13 = vsub.f32 1.5, %v903_v12 }
 0x7c5   :  { %v895_v14 = vpop.xlane.xlu1 %894 }
 0x7c6   :  { %v905_v15 = vmul.f32 %v3025_v9, %v904_v13  ;;  %v897_v16 = vmul.f32 %v895_v14, %v3487_v36 }
 0x7c8   :  { %v909_v20 = vsel %vm908_vm5, %v3025_v9, %v905_v15  ;;  %v899_v21 = vadd.f32 1e-05, %v897_v16  ;;  %v295_v9 = vld [vmem:[%s4124_s28] sm:$0xff] }
 0x7c9   :  { %v920_v22 = vmul.f32 %v909_v20, %v886_v60  ;;  %1070 = vmatpush.msrb.mxu0 %v295_v9 }
 0x7ca   :  { %3026 = vrsqrt.f32 %v899_v21  ;;  %vm916_vm7 = vweird.f32 %v899_v21 }
 0x7cb   :  { %v925_v24 = vmul.f32 %v2960_v18, %v920_v22 }
 0x7cd   :  { %v930_v25 = vadd.f32 %v2961_v19, %v925_v24 }
 0x7cf   :  { %2789 = vmatmul.msk.f32.vlgmr.msra.gmra.mxu1 %vm312_vm2, %v930_v25 }
 0x7d0   :  { %v3027_v26 = vpop.eup %3026 }
 0x7d1   :  { %v911_v27 = vmul.f32 %v3027_v26, %v899_v21  ;;  %vm917_vm6 = vweird.f32 %v3027_v26 }
 0x7d2   :  { %vm918_vm8 = vmor %vm916_vm7, %vm917_vm6 }
 0x7d3   :  { %v912_v29 = vmul.f32 %v3027_v26, %v911_v27 }
 0x7d5   :  { %v913_v30 = vmul.f32 0.5, %v912_v29 }
 0x7d7   :  { %v914_v31 = vsub.f32 1.5, %v913_v30 }
 0x7d9   :  { %v915_v32 = vmul.f32 %v3027_v26, %v914_v31 }
 0x7db   :  { %v919_v33 = vsel %vm918_vm8, %v3027_v26, %v915_v32 }
 0x7dc   :  { %v921_v34 = vmul.f32 %v919_v33, %v887_v63 }
 0x7de   :  { %v926_v35 = vmul.f32 %v2960_v18, %v921_v34 }
 0x7e0   :  { %v931_v37 = vadd.f32 %v2961_v19, %v926_v35 }
 0x7e2   :  { %2790 = vmatmul.msk.f32.gmra.mxu1 %vm312_vm2, %v931_v37 }
 0x84c   :  { %v958_v45 = vpop.f32.mrf.mxu1 }
 0x84d   :  { %v3677_v46 = vadd.f32 %v2962_v42, %v958_v45 }
 0x84f   :  { %v3681_v48 = vmul.f32 0.70710677, %v3677_v46  ;;  %v964_v61 = vmul.f32 0.5, %v3677_v46 }
 0x851   :  { %v968_v50 = vmul.f32 %v3681_v48, %v3681_v48 }
 0x853   :  { %v969_v53 = vmin.f32 %v968_v50, 16.0 }
 0x855   :  { %v970_v56 = vmul.f32 2.1237322e-06, %v969_v53  ;;  %v981_v58 = vmul.f32 3.8918573e-05, %v969_v53 }
 0x857   :  { %v971_v23 = vadd.f32 0.00028619796, %v970_v56  ;;  %v982_v60 = vadd.f32 0.001143296, %v981_v58 }
 0x859   :  { %v972_v17 = vmul.f32 %v971_v23, %v969_v53  ;;  %v983_v62 = vmul.f32 %v982_v60, %v969_v53 }
 0x85b   :  { %v973_v63 = vadd.f32 0.0036580483, %v972_v17  ;;  %v984_v0 = vadd.f32 0.014752088, %v983_v62 }
 0x85d   :  { %v985_v2 = vmul.f32 %v984_v0, %v969_v53  ;;  %v974_v4 = vmul.f32 %v973_v63, %v969_v53 }
 0x85f   :  { %v986_v5 = vadd.f32 0.112945676, %v985_v2  ;;  %v961_v6 = vpop.f32.mrf.mxu1  ;;  %v975_v12 = vadd.f32 0.05243302, %v974_v4 }
 0x860   :  { %v3694_v8 = vadd.f32 %v2962_v42, %v961_v6 }
 0x861   :  { %v987_v10 = vmul.f32 %v986_v5, %v969_v53  ;;  %v976_v18 = vmul.f32 %v975_v12, %v969_v53 }
 0x862   :  { %v3698_v11 = vmul.f32 0.70710677, %v3694_v8 }
 0x863   :  { %v988_v13 = vadd.f32 0.4994258, %v987_v10  ;;  %v977_v25 = vadd.f32 0.18741608, %v976_v18  ;;  %v2963_v18 = vld [vmem:[%s4126_s2] ss:$0 sm:$0xff] }
 0x864   :  { %v1008_v14 = vmul.f32 %v3698_v11, %v3698_v11 }
 0x865   :  { %v989_v15 = vmul.f32 %v988_v13, %v969_v53  ;;  %v978_v31 = vmul.f32 %v977_v25, %v969_v53 }
 0x866   :  { %v1009_v16 = vmin.f32 %v1008_v14, 16.0  ;;  %v965_v14 = vmul.f32 0.5, %v3694_v8 }
 0x867   :  { %v990_v20 = vadd.f32 1.0, %v989_v15  ;;  %v979_v38 = vadd.f32 1.1283791, %v978_v31 }
 0x868   :  { %v1010_v21 = vmul.f32 2.1237322e-06, %v1009_v16  ;;  %v1021_v22 = vmul.f32 3.8918573e-05, %v1009_v16 }
 0x869   :  { %3028 = vrcp.f32 %v990_v20  ;;  %v1002_v39 = vand.u32 2147483648, %v990_v20  ;;  %v1000_v43 = vand.u32 2147483647, %v990_v20  ;;  %vm996_vm10 = vweird.f32 %v990_v20 }
 0x86a   :  { %v1011_v19 = vadd.f32 0.00028619796, %v1010_v21  ;;  %v1022_v24 = vadd.f32 0.001143296, %v1021_v22  ;;  %v980_v51 = vmul.f32 %v979_v38, %v3681_v48  ;;  %v2796_v38 = vld [vmem:[%s3299_s6 + $0x28] sm:$0xff] }
 0x86b   :  { %v1003_v49 = vor.u32 1.1754944e-38, %v1002_v39  ;;  %vm1001_vm4 = vcmp.eq.f32.partialorder %v1000_v43, 8.507059e+37  ;;  %v2795_v39 = vld [vmem:[%s3299_s6 + $0x20] sm:$0xff] }
 0x86c   :  { %v1012_v26 = vmul.f32 %v1011_v19, %v1009_v16  ;;  %v1023_v27 = vmul.f32 %v1022_v24, %v1009_v16 }
 0x86e   :  { %v1024_v29 = vadd.f32 0.014752088, %v1023_v27  ;;  %v1013_v32 = vadd.f32 0.0036580483, %v1012_v26 }
 0x86f   :  { %v3029_v30 = vpop.eup %3028 }
 0x870   :  { %v992_v33 = vmul.f32 %v3029_v30, %v990_v20  ;;  %v1025_v34 = vmul.f32 %v1024_v29, %v1009_v16  ;;  %v1014_v41 = vmul.f32 %v1013_v32, %v1009_v16  ;;  %vm997_vm9 = vweird.f32 %v3029_v30 }
 0x871   :  { %vm998_vm0 = vmor %vm996_vm10, %vm997_vm9 }
 0x872   :  { %v993_v35 = vsub.f32 1.0, %v992_v33  ;;  %v1026_v37 = vadd.f32 0.112945676, %v1025_v34  ;;  %v1015_v50 = vadd.f32 0.05243302, %v1014_v41 }
 0x874   :  { %v994_v42 = vmul.f32 %v3029_v30, %v993_v35  ;;  %v1027_v44 = vmul.f32 %v1026_v37, %v1009_v16  ;;  %v1016_v23 = vmul.f32 %v1015_v50, %v1009_v16  ;;  %v2798_v35 = vld [vmem:[%s3299_s6 + $0x38] sm:$0xff]  ;;  %v2797_v37 = vld [vmem:[%s3299_s6 + $0x30] sm:$0xff]  ;;  %s4130_s6 = sld [smem:[#allocation9_spill]] }
 0x875   :  { %1203 = vmatpush.msra.mxu2 %v2798_v35 }
 0x876   :  { %v995_v45 = vadd.f32 %v3029_v30, %v994_v42  ;;  %v1028_v47 = vadd.f32 0.4994258, %v1027_v44  ;;  %v1017_v62 = vadd.f32 0.18741608, %v1016_v23 }
 0x877   :  { %1204 = vmatpush.msra.mxu2 %v2797_v37 }
 0x878   :  { %v999_v53 = vsel %vm998_vm0, %v3029_v30, %v995_v45  ;;  %v1029_v55 = vmul.f32 %v1028_v47, %v1009_v16  ;;  %v1018_v0 = vmul.f32 %v1017_v62, %v1009_v16 }
 0x879   :  { %v1004_v56 = vsel %vm1001_vm4, %v1003_v49, %v999_v53  ;;  %1205 = vmatpush.msra.mxu2 %v2796_v38 }
 0x87a   :  { %v1005_v58 = vmul.f32 %v1004_v56, %v980_v51  ;;  %v1030_v59 = vadd.f32 1.0, %v1029_v55  ;;  %v1019_v3 = vadd.f32 1.1283791, %v1018_v0  ;;  %v2964_v56 = vld [vmem:[%s3289_s24 + $0x1] ss:$0 sm:$0xff]  ;;  %s4128_s24 = sld [smem:[#allocation30_spill]] }
 0x87b   :  { %1206 = vmatpush.msra.mxu2 %v2795_v39 }
 0x87c   :  { %v2791_v60 = vclamps-f32 %v1005_v58, 1.0  ;;  %3030 = vrcp.f32 %v1030_v59  ;;  %v1042_v48 = vand.u32 2147483648, %v1030_v59  ;;  %v1040_v5 = vand.u32 2147483647, %v1030_v59 }
 0x87d   :  { %vm1036_vm6 = vweird.f32 %v1030_v59  ;;  %v1020_v46 = vmul.f32 %v1019_v3, %v3698_v11 }
 0x87e   :  { %v1048_v17 = vadd.f32 1.0, %v2791_v60  ;;  %v1043_v7 = vor.u32 1.1754944e-38, %v1042_v48  ;;  %vm1041_vm8 = vcmp.eq.f32.partialorder %v1040_v5, 8.507059e+37  ;;  %v2965_v60 = vld [vmem:[%s3294_s30 + $0x1] ss:$0 sm:$0xff]  ;;  %s4129_s30 = sld [smem:[#allocation10_spill]] }
 0x880   :  { %v1050_v28 = vmul.f32 %v1048_v17, %v964_v61 }
 0x882   :  { %v3031_v63 = vpop.eup %3030  ;;  %1071 = vmatmul.f32.vlgmr.msrb.gmra.mxu0 %v1050_v28 }
 0x883   :  { %v1032_v1 = vmul.f32 %v3031_v63, %v1030_v59  ;;  %vm1037_vm5 = vweird.f32 %v3031_v63 }
 0x884   :  { %vm1038_vm7 = vmor %vm1036_vm6, %vm1037_vm5 }
 0x885   :  { %v1033_v2 = vsub.f32 1.0, %v1032_v1 }
 0x887   :  { %v1034_v4 = vmul.f32 %v3031_v63, %v1033_v2 }
 0x889   :  { %v1035_v6 = vadd.f32 %v3031_v63, %v1034_v4 }
 0x88b   :  { %v1039_v9 = vsel %vm1038_vm7, %v3031_v63, %v1035_v6  ;;  %v2966_v6 = vld [vmem:[%s3304_s12 + $0x1] ss:$0 sm:$0xff]  ;;  %s4131_s12 = sld [smem:[#allocation31_spill]] }
 0x88c   :  { %v1044_v10 = vsel %vm1041_vm8, %v1043_v7, %v1039_v9 }
 0x88d   :  { %v1045_v12 = vmul.f32 %v1044_v10, %v1020_v46 }
 0x88f   :  { %v2792_v13 = vclamps-f32 %v1045_v12, 1.0 }
 0x891   :  { %v1049_v15 = vadd.f32 1.0, %v2792_v13 }
 0x893   :  { %v1051_v16 = vmul.f32 %v1049_v15, %v965_v14 }
 0x895   :  { %1074 = vmatmul.f32.gmra.mxu0 %v1051_v16 }
 0x8ff   :  { %v1072_v20 = vpop.f32.mrf.mxu0 }
 0x900   :  { %v1073_v21 = vadd.f32 %v2963_v18, %v1072_v20 }
 0x902   :  { %v3708_v22 = vadd.f32 %v1073_v21, %v3646_v52 }
 0x904   :  { %v1128_v19 = vsel %vm312_vm2, %v3708_v22, 0.0 }
 0x905   :  { %1129 = vadd.xlane.f32.xlu2 %v1128_v19 }
 0x912   :  { %v1075_v11 = vpop.f32.mrf.mxu0 }
 0x913   :  { %v1076_v24 = vadd.f32 %v2963_v18, %v1075_v11 }
 0x915   :  { %v3713_v25 = vadd.f32 %v1076_v24, %v3651_v57 }
 0x917   :  { %v1131_v8 = vsel %vm316_vm3, %v3713_v25, 0.0 }
 0x918   :  { %1132 = vadd.xlane.f32.xlu0 %v1131_v8 }
 0x978   :  { %v1130_v26 = vpop.xlane.xlu2 %1129 }
 0x979   :  { %v1134_v52 = vmul.f32 %v1130_v26, %v3487_v36 }
 0x97b   :  { %v1136_v27 = vsub.f32 %v3708_v22, %v1134_v52 }
 0x97d   :  { %v1138_v29 = vmul.f32 %v1136_v27, %v1136_v27 }
 0x97f   :  { %v1140_v30 = vsel %vm312_vm2, %v1138_v29, 0.0 }
 0x980   :  { %1141 = vadd.xlane.f32.xlu1 %v1140_v30 }
 0x98b   :  { %v1133_v31 = vpop.xlane.xlu0 %1132 }
 0x98c   :  { %v1135_v57 = vmul.f32 %v1133_v31, %v3487_v36 }
 0x98e   :  { %v1137_v32 = vsub.f32 %v3713_v25, %v1135_v57 }
 0x990   :  { %v1139_v33 = vmul.f32 %v1137_v32, %v1137_v32 }
 0x992   :  { %v1143_v34 = vsel %vm316_vm3, %v1139_v33, 0.0 }
 0x993   :  { %1144 = vadd.xlane.f32.xlu2 %v1143_v34 }
 0x9f3   :  { %v1142_v41 = vpop.xlane.xlu1 %1141 }
 0x9f4   :  { %v1146_v42 = vmul.f32 %v1142_v41, %v3487_v36 }
 0x9f6   :  { %v1148_v43 = vadd.f32 1e-05, %v1146_v42 }
 0x9f8   :  { %3032 = vrsqrt.f32 %v1148_v43  ;;  %vm1156_vm10 = vweird.f32 %v1148_v43 }
 0x9fe   :  { %v3033_v44 = vpop.eup %3032 }
 0x9ff   :  { %v1151_v45 = vmul.f32 %v3033_v44, %v1148_v43  ;;  %vm1157_vm9 = vweird.f32 %v3033_v44 }
 0xa00   :  { %vm1158_vm0 = vmor %vm1156_vm10, %vm1157_vm9 }
 0xa01   :  { %v1152_v47 = vmul.f32 %v3033_v44, %v1151_v45 }
 0xa03   :  { %v1153_v49 = vmul.f32 0.5, %v1152_v47 }
 0xa05   :  { %v1154_v50 = vsub.f32 1.5, %v1153_v49 }
 0xa06   :  { %v1145_v51 = vpop.xlane.xlu2 %1144 }
 0xa07   :  { %v1155_v53 = vmul.f32 %v3033_v44, %v1154_v50  ;;  %v1147_v55 = vmul.f32 %v1145_v51, %v3487_v36 }
 0xa09   :  { %v1159_v58 = vsel %vm1158_vm0, %v3033_v44, %v1155_v53  ;;  %v1149_v59 = vadd.f32 1e-05, %v1147_v55 }
 0xa0a   :  { %v1170_v23 = vmul.f32 %v1159_v58, %v1136_v27 }
 0xa0b   :  { %3034 = vrsqrt.f32 %v1149_v59  ;;  %vm1166_vm5 = vweird.f32 %v1149_v59 }
 0xa0c   :  { %v1175_v61 = vmul.f32 %v2964_v56, %v1170_v23 }
 0xa0e   :  { %v1180_v17 = vadd.f32 %v2965_v60, %v1175_v61 }
 0xa10   :  { %2829 = vmatmul.msk.f32.vlgmr.msra.gmra.mxu2 %vm312_vm2, %v1180_v17 }
 0xa11   :  { %v3035_v62 = vpop.eup %3034 }
 0xa12   :  { %v1161_v28 = vmul.f32 %v3035_v62, %v1149_v59  ;;  %vm1167_vm4 = vweird.f32 %v3035_v62  ;;  %v3108_v59 = vld [vmem:[%s3259_s25] sm:$0xff] }
 0xa13   :  { %vm1168_vm6 = vmor %vm1166_vm5, %vm1167_vm4 }
 0xa14   :  { %v1162_v63 = vmul.f32 %v3035_v62, %v1161_v28  ;;  %v3109_v28 = vld [vmem:[%s3259_s25 + $0x8] sm:$0x3]  ;;  %s4127_s25 = sld [smem:[#allocation29_spill]] }
 0xa16   :  { %v1163_v0 = vmul.f32 0.5, %v1162_v63 }
 0xa18   :  { %v1164_v1 = vsub.f32 1.5, %v1163_v0 }
 0xa1a   :  { %v1165_v2 = vmul.f32 %v3035_v62, %v1164_v1 }
 0xa1c   :  { %v1169_v48 = vsel %vm1168_vm6, %v3035_v62, %v1165_v2 }
 0xa1d   :  { %v1171_v3 = vmul.f32 %v1169_v48, %v1137_v32 }
 0xa1f   :  { %v1176_v4 = vmul.f32 %v2964_v56, %v1171_v3 }
 0xa21   :  { %v1181_v5 = vadd.f32 %v2965_v60, %v1176_v4 }
 0xa23   :  { %2830 = vmatmul.msk.f32.gmra.mxu2 %vm312_vm2, %v1181_v5 }
 0xa93   :  { %v1208_v7 = vpop.f32.mrf.mxu2 }
 0xa94   :  { %v3734_v46 = vadd.f32 %v2966_v6, %v1208_v7 }
 0xa96   :  { %1216 = vrot.lane.b32.xlu1 %v3734_v46, %s3211_s9 }
 0xa9e   :  { %1515 = vrot.lane.b32.xlu1 %v3734_v46, %s3215_s14 }
 0xaa6   :  { %v1211_v9 = vpop.f32.mrf.mxu2 }
 0xaa7   :  { %v3740_v10 = vadd.f32 %v2966_v6, %v1211_v9 }
 0xaa9   :  { %1218 = vrot.lane.b32.xlu0 %v3740_v10, %s3211_s9 }
 0xab1   :  { %1319 = vrot.lane.b32.xlu0 %v3740_v10, %s3210_s5 }
 0xab9   :  { %1313 = vrot.lane.b32.xlu0 %v3734_v46, %s3209_s0 }
 0xac1   :  { %1279 = vrot.lane.b32.xlu0 %v3740_v10, %s3217_s7 }
 0xac9   :  { %1315 = vrot.lane.b32.xlu0 %v3740_v10, %s3209_s0 }
 0xad1   :  { %1521 = vrot.lane.b32.xlu0 %v3740_v10, %s3212_s13 }
 0xad9   :  { %1277 = vrot.lane.b32.xlu0 %v3734_v46, %s3217_s7 }
 0xae1   :  { %1519 = vrot.lane.b32.xlu0 %v3734_v46, %s3212_s13 }
 0xae9   :  { %1420 = vrot.lane.b32.xlu0 %v3740_v10, %s3214_s21 }
 0xaf1   :  { %1418 = vrot.lane.b32.xlu0 %v3734_v46, %s3214_s21 }
 0xaf9   :  { %1414 = vrot.lane.b32.xlu0 %v3734_v46, %s3213_s17 }
 0xb08   :  { %v1217_v13 = vpop.permute.xlu1 %1216 }
 0xb10   :  { %v1516_v43 = vpop.permute.xlu1 %1515 }
 0xb1b   :  { %v1219_v12 = vpop.permute.xlu0 %1218 }
 0xb1c   :  { %2831 = vmatpush.xpose.msk.msra.mxu3 %vm244_vm1, %v1219_v12 }
 0xb20   :  { %2832 = vmatpush.xpose.msk.msra.mxu3 %vm244_vm1, %v1217_v13 }
 0xb23   :  { %v1320_v14 = vpop.permute.xlu0 %1319  ;;  %2833 = vmatmul.msk.f32.vlgmr.msra.gmra.mxu3 %vm244_vm1, %v3734_v46 }
 0xb24   :  { %2838 = vmatpush.xpose.msk.msrb.mxu2 %vm244_vm1, %v1320_v14 }
 0xb2b   :  { %v1314_v15 = vpop.permute.xlu0 %1313  ;;  %2834 = vmatmul.msk.f32.gmra.mxu3 %vm244_vm1, %v3740_v10 }
 0xb33   :  { %v1280_v16 = vpop.permute.xlu0 %1279 }
 0xb34   :  { %2835 = vmatpush.msk.msrb.mxu1 %vm483_vm11, %v1280_v16 }
 0xb3b   :  { %v1316_v18 = vpop.permute.xlu0 %1315 }
 0xb43   :  { %v1522_v20 = vpop.permute.xlu0 %1521 }
 0xb4b   :  { %v1278_v21 = vpop.permute.xlu0 %1277 }
 0xb4c   :  { %1305 = vmatpush.msrb.mxu1 %v1278_v21 }
 0xb53   :  { %v1520_v19 = vpop.permute.xlu0 %1519 }
 0xb5b   :  { %v1421_v11 = vpop.permute.xlu0 %1420 }
 0xb5c   :  { %2845 = vmatpush.xpose.msk.msra.mxu1 %vm244_vm1, %v1421_v11 }
 0xb63   :  { %v1419_v24 = vpop.permute.xlu0 %1418 }
 0xb64   :  { %2846 = vmatpush.xpose.msk.msra.mxu1 %vm244_vm1, %v1419_v24 }
 0xb6b   :  { %v1415_v58 = vpop.permute.xlu0 %1414 }
 0xba6   :  { %v1245_v8 = vpop.f32.mrf.mxu3 }
 0xba7   :  { %v1251_v26 = vmul.f32 0.35355338, %v1245_v8 }
 0xba9   :  { %v1253_v52 = vadd.f32 %v1251_v26, %v3562_v40 }
 0xbab   :  { %v1255_v27 = vsel %vm448_vm12, %v1253_v52, -inf }
 0xbac   :  { %1256 = vmax.xlane.f32.xlu2 %v1255_v27 }
 0xbae   :  { %v1248_v29 = vpop.f32.mrf.mxu3 }
 0xbaf   :  { %v1252_v30 = vmul.f32 0.35355338, %v1248_v29 }
 0xbb1   :  { %v1254_v31 = vadd.f32 %v1252_v30, %v3573_v54 }
 0xbb3   :  { %v1258_v57 = vsel %vm452_vm13, %v1254_v31, -inf }
 0xbb4   :  { %1259 = vmax.xlane.f32.xlu2 %v1258_v57 }
 0xbcc   :  { %1317 = vrot.lane.b32.xlu2 %v3734_v46, %s3210_s5 }
 0xc1f   :  { %v1257_v32 = vpop.xlane.xlu2 %1256 }
 0xc20   :  { %v1261_v33 = vsub.f32 %v1253_v52, %v1257_v32 }
 0xc22   :  { %v1263_v34 = vmul.f32 1.442695, %v1261_v33 }
 0xc24   :  { %3036 = vpow2.f32 %v1263_v34 }
 0xc27   :  { %v1260_v35 = vpop.xlane.xlu2 %1259 }
 0xc28   :  { %v1262_v37 = vsub.f32 %v1254_v31, %v1260_v35 }
 0xc2a   :  { %v3037_v40 = vpop.eup %3036  ;;  %v1265_v38 = vmul.f32 1.442695, %v1262_v37 }
 0xc2b   :  { %v1267_v39 = vsel %vm448_vm12, %v3037_v40, 0.0 }
 0xc2c   :  { %3038 = vpow2.f32 %v1265_v38  ;;  %1268 = vadd.xlane.f32.xlu1 %v1267_v39 }
 0xc2f   :  { %v1318_v41 = vpop.permute.xlu2 %1317 }
 0xc30   :  { %2839 = vmatpush.xpose.msk.msrb.mxu2 %vm244_vm1, %v1318_v41 }
 0xc32   :  { %v3039_v54 = vpop.eup %3038 }
 0xc33   :  { %2840 = vmatmul.msk.f32.vlgmr.msrb.gmra.mxu2 %vm244_vm1, %v1314_v15  ;;  %v1270_v42 = vsel %vm452_vm13, %v3039_v54, 0.0 }
 0xc34   :  { %2852 = vmatpush.xpose.msk.msra.mxu2 %vm244_vm1, %v1522_v20  ;;  %1271 = vadd.xlane.f32.xlu2 %v1270_v42 }
 0xc38   :  { %2853 = vmatpush.xpose.msk.msra.mxu2 %vm244_vm1, %v1520_v19 }
 0xc3b   :  { %2841 = vmatmul.msk.f32.gmra.mxu2 %vm244_vm1, %v1316_v18 }
 0xc43   :  { %2854 = vmatmul.msk.f32.vlgmr.msra.gmra.mxu2 %vm244_vm1, %v1516_v43 }
 0xc45   :  { %1416 = vrot.lane.b32.xlu1 %v3740_v10, %s3213_s17 }
 0xc4c   :  { %1517 = vrot.lane.b32.xlu2 %v3740_v10, %s3215_s14 }
 0xc9f   :  { %v1269_v44 = vpop.xlane.xlu1 %1268 }
 0xca0   :  { %3040 = vrcp.f32 %v1269_v44 }
 0xca6   :  { %v3041_v45 = vpop.eup %3040 }
 0xca7   :  { %v1275_v47 = vmul.f32 %v3041_v45, %v3037_v40  ;;  %v1272_v49 = vpop.xlane.xlu2 %1271 }
 0xca8   :  { %3042 = vrcp.f32 %v1272_v49 }
 0xca9   :  { %2836 = vmatmul.msk.f32.vlgmr.msrb.gmra.mxu1 %vm448_vm12, %v1275_v47 }
 0xcae   :  { %v3043_v50 = vpop.eup %3042 }
 0xcaf   :  { %v1518_v51 = vpop.permute.xlu2 %1517  ;;  %v1276_v53 = vmul.f32 %v3043_v50, %v3039_v54 }
 0xcb0   :  { %2855 = vmatmul.msk.f32.gmra.mxu2 %vm244_vm1, %v1518_v51 }
 0xcb1   :  { %2837 = vmatmul.msk.f32.gmra.mxu1 %vm448_vm12, %v1276_v53 }
 0xcb6   :  { %v1346_v55 = vpop.f32.mrf.mxu2 }
 0xcb7   :  { %v1352_v56 = vmul.f32 0.35355338, %v1346_v55  ;;  %v1417_v62 = vpop.permute.xlu1 %1416 }
 0xcb9   :  { %2847 = vmatmul.msk.f32.vlgmr.msra.gmra.mxu1 %vm244_vm1, %v1415_v58  ;;  %v1354_v23 = vadd.f32 %v3108_v59, %v1352_v56 }
 0xcbb   :  { %v1356_v60 = vsel %vm448_vm12, %v1354_v23, -inf }
 0xcbc   :  { %1357 = vmax.xlane.f32.xlu0 %v1356_v60 }
 0xcbe   :  { %v1349_v61 = vpop.f32.mrf.mxu2 }
 0xcbf   :  { %v1353_v17 = vmul.f32 0.35355338, %v1349_v61 }
 0xcc1   :  { %2848 = vmatmul.msk.f32.gmra.mxu1 %vm244_vm1, %v1417_v62  ;;  %v1355_v63 = vadd.f32 %v3109_v28, %v1353_v17 }
 0xcc3   :  { %v1359_v0 = vsel %vm452_vm13, %v1355_v63, -inf }
 0xcc4   :  { %1360 = vmax.xlane.f32.xlu1 %v1359_v0 }
 0xcc6   :  { %v1548_v1 = vpop.f32.mrf.mxu2 }
 0xcc7   :  { %v1554_v2 = vmul.f32 0.35355338, %v1548_v1 }
 0xcc9   :  { %v1556_v48 = vadd.f32 %v3108_v59, %v1554_v2 }
 0xccb   :  { %v1558_v3 = vsel %vm448_vm12, %v1556_v48, -inf }
 0xccc   :  { %1559 = vmax.xlane.f32.xlu2 %v1558_v3 }
 0xd26   :  { %v3802_v4 = vpop.f32.mrf.mxu1 }
 0xd2e   :  { %v3804_v5 = vpop.f32.mrf.mxu1 }
 0xd2f   :  { %v1358_v6 = vpop.xlane.xlu0 %1357 }
 0xd30   :  { %v1362_v7 = vsub.f32 %v1354_v23, %v1358_v6 }
 0xd32   :  { %v1364_v9 = vmul.f32 1.442695, %v1362_v7 }
 0xd33   :  { %v1551_v12 = vpop.f32.mrf.mxu2 }
 0xd34   :  { %3044 = vpow2.f32 %v1364_v9  ;;  %v1555_v13 = vmul.f32 0.35355338, %v1551_v12 }
 0xd36   :  { %v1447_v14 = vpop.f32.mrf.mxu1  ;;  %v1557_v15 = vadd.f32 %v3109_v28, %v1555_v13 }
 0xd37   :  { %v1453_v16 = vmul.f32 0.35355338, %v1447_v14  ;;  %v1361_v18 = vpop.xlane.xlu1 %1360 }
 0xd38   :  { %v1561_v20 = vsel %vm452_vm13, %v1557_v15, -inf  ;;  %v1363_v11 = vsub.f32 %v1355_v63, %v1361_v18 }
 0xd39   :  { %1562 = vmax.xlane.f32.xlu1 %v1561_v20  ;;  %v1455_v21 = vadd.f32 %v3108_v59, %v1453_v16 }
 0xd3a   :  { %v3045_v19 = vpop.eup %3044  ;;  %v1366_v26 = vmul.f32 1.442695, %v1363_v11 }
 0xd3b   :  { %v1368_v24 = vsel %vm448_vm12, %v3045_v19, 0.0  ;;  %v1457_v8 = vsel %vm448_vm12, %v1455_v21, -inf }
 0xd3c   :  { %1369 = vadd.xlane.f32.xlu2 %v1368_v24  ;;  %1458 = vmax.xlane.f32.xlu0 %v1457_v8  ;;  %3046 = vpow2.f32 %v1366_v26  ;;  %v2803_v24 = vld [vmem:[%s3309_s20 + $0x38] sm:$0xff]  ;;  %v2802_v8 = vld [vmem:[%s3309_s20 + $0x30] sm:$0xff]  ;;  %v2801_v26 = vld [vmem:[%s3309_s20 + $0x28] sm:$0xff] }
 0xd3d   :  { %1667 = vmatpush.msrb.mxu1 %v2803_v24 }
 0xd3e   :  { %v1450_v52 = vpop.f32.mrf.mxu1 }
 0xd3f   :  { %v1454_v27 = vmul.f32 0.35355338, %v1450_v52  ;;  %v1560_v29 = vpop.xlane.xlu2 %1559  ;;  %1668 = vmatpush.msrb.mxu1 %v2802_v8  ;;  %v2800_v52 = vld [vmem:[%s3309_s20 + $0x20] sm:$0xff]  ;;  %s4133_s20 = sld [smem:[#allocation32_spill]] }
 0xd40   :  { %v1564_v31 = vsub.f32 %v1556_v48, %v1560_v29 }
 0xd41   :  { %v1456_v30 = vadd.f32 %v3109_v28, %v1454_v27  ;;  %1669 = vmatpush.msrb.mxu1 %v2801_v26 }
 0xd42   :  { %v1566_v32 = vmul.f32 1.442695, %v1564_v31  ;;  %v3047_v33 = vpop.eup %3046 }
 0xd43   :  { %v1460_v57 = vsel %vm452_vm13, %v1456_v30, -inf  ;;  %v1371_v34 = vsel %vm452_vm13, %v3047_v33, 0.0  ;;  %1670 = vmatpush.msrb.mxu1 %v2800_v52 }
 0xd44   :  { %1461 = vmax.xlane.f32.xlu0 %v1460_v57  ;;  %3048 = vpow2.f32 %v1566_v32 }
 0xd4a   :  { %v3049_v35 = vpop.eup %3048 }
 0xd4b   :  { %v1570_v37 = vsel %vm448_vm12, %v3049_v35, 0.0 }
 0xd4c   :  { %1372 = vadd.xlane.f32.xlu0 %v1371_v34 }
 0xd52   :  { %1380 = vrot.lane.b32.xlu1 %v3740_v10, %s3216_s19 }
 0xd54   :  { %1378 = vrot.lane.b32.xlu2 %v3734_v46, %s3216_s19  ;;  %1571 = vadd.xlane.f32.xlu0 %v1570_v37 }
 0xd5a   :  { %1582 = vrot.lane.b32.xlu1 %v3740_v10, %s3218_s10 }
 0xd5c   :  { %1580 = vrot.lane.b32.xlu2 %v3734_v46, %s3218_s10 }
 0xd62   :  { %1481 = vrot.lane.b32.xlu1 %v3740_v10, %s3219_s11 }
 0xd64   :  { %1479 = vrot.lane.b32.xlu2 %v3734_v46, %s3219_s11 }
 0xdac   :  { %v1563_v40 = vpop.xlane.xlu1 %1562 }
 0xdad   :  { %v1565_v38 = vsub.f32 %v1557_v15, %v1563_v40 }
 0xdaf   :  { %v1568_v39 = vmul.f32 1.442695, %v1565_v38  ;;  %v1459_v41 = vpop.xlane.xlu0 %1458  ;;  %v1370_v45 = vpop.xlane.xlu2 %1369 }
 0xdb0   :  { %v1463_v54 = vsub.f32 %v1455_v21, %v1459_v41 }
 0xdb1   :  { %3050 = vpow2.f32 %v1568_v39  ;;  %v2967_v39 = vld [vmem:[%s3314_s27 + $0x1] ss:$0 sm:$0xff]  ;;  %s4134_s27 = sld [smem:[#allocation17_spill]] }
 0xdb2   :  { %v1465_v42 = vmul.f32 1.442695, %v1463_v54 }
 0xdb4   :  { %3052 = vpow2.f32 %v1465_v42 }
 0xdb5   :  { %3054 = vrcp.f32 %v1370_v45 }
 0xdb7   :  { %v3051_v43 = vpop.eup %3050  ;;  %v1462_v44 = vpop.xlane.xlu0 %1461 }
 0xdb8   :  { %v1464_v47 = vsub.f32 %v1456_v30, %v1462_v44  ;;  %v1573_v49 = vsel %vm452_vm13, %v3051_v43, 0.0  ;;  %v1379_v53 = vpop.permute.xlu2 %1378 }
 0xdb9   :  { %1574 = vadd.xlane.f32.xlu0 %v1573_v49 }
 0xdba   :  { %v1467_v50 = vmul.f32 1.442695, %v1464_v47  ;;  %v3053_v10 = vpop.eup %3052 }
 0xdbb   :  { %v1469_v51 = vsel %vm448_vm12, %v3053_v10, 0.0  ;;  %v3055_v55 = vpop.eup %3054 }
 0xdbc   :  { %3056 = vpow2.f32 %v1467_v50  ;;  %v1376_v59 = vmul.f32 %v3055_v55, %v3045_v19 }
 0xdbf   :  { %v1373_v46 = vpop.xlane.xlu0 %1372 }
 0xdc0   :  { %3058 = vrcp.f32 %v1373_v46  ;;  %v1581_v17 = vpop.permute.xlu2 %1580 }
 0xdc1   :  { %1470 = vadd.xlane.f32.xlu0 %v1469_v51 }
 0xdc2   :  { %v3057_v58 = vpop.eup %3056 }
 0xdc3   :  { %v1472_v23 = vsel %vm452_vm13, %v3057_v58, 0.0 }
 0xdc4   :  { %v1381_v56 = vpop.permute.xlu1 %1380 }
 0xdc5   :  { %2842 = vmatpush.msk.msrb.mxu3 %vm483_vm11, %v1381_v56  ;;  %v2810_v56 = vld [vmem:[%s4121_s22 + $0x38] sm:$0xff] }
 0xdc6   :  { %v3059_v61 = vpop.eup %3058 }
 0xdc7   :  { %1406 = vmatpush.msrb.mxu3 %v1379_v53  ;;  %v1572_v60 = vpop.xlane.xlu0 %1571  ;;  %v1377_v28 = vmul.f32 %v3059_v61, %v3047_v33 }
 0xdc8   :  { %2843 = vmatmul.msk.f32.vlgmr.msrb.gmra.mxu3 %vm448_vm12, %v1376_v59  ;;  %3060 = vrcp.f32 %v1572_v60  ;;  %v1480_v1 = vpop.permute.xlu2 %1479  ;;  %v2808_v59 = vld [vmem:[%s4121_s22 + $0x28] sm:$0xff] }
 0xdc9   :  { %1473 = vadd.xlane.f32.xlu0 %v1472_v23  ;;  %v2807_v23 = vld [vmem:[%s4121_s22 + $0x20] sm:$0xff] }
 0xdcc   :  { %v1583_v62 = vpop.permute.xlu1 %1582 }
 0xdcd   :  { %2856 = vmatpush.msk.msra.mxu3 %vm483_vm11, %v1583_v62 }
 0xdce   :  { %v3061_v63 = vpop.eup %3060 }
 0xdcf   :  { %1608 = vmatpush.msra.mxu3 %v1581_v17  ;;  %v1578_v2 = vmul.f32 %v3061_v63, %v3049_v35 }
 0xdd0   :  { %2844 = vmatmul.msk.f32.gmra.mxu3 %vm448_vm12, %v1377_v28 }
 0xdd4   :  { %v1482_v0 = vpop.permute.xlu1 %1481 }
 0xdd5   :  { %2849 = vmatpush.msk.msra.mxu0 %vm483_vm11, %v1482_v0 }
 0xdd7   :  { %1507 = vmatpush.msra.mxu0 %v1480_v1 }
 0xdd8   :  { %2857 = vmatmul.msk.f32.vlgmr.msra.gmra.mxu3 %vm448_vm12, %v1578_v2 }
 0xdd9   :  { %1755 = vmatpush.msrb.mxu0 %v2810_v56  ;;  %v2815_v56 = vld [vmem:[%s4124_s28 + $0x98] sm:$0xff] }
 0xe2c   :  { %v1575_v48 = vpop.xlane.xlu0 %1574 }
 0xe2d   :  { %3062 = vrcp.f32 %v1575_v48 }
 0xe33   :  { %v3063_v3 = vpop.eup %3062 }
 0xe34   :  { %v1471_v6 = vpop.xlane.xlu0 %1470  ;;  %v1579_v7 = vmul.f32 %v3063_v3, %v3051_v43 }
 0xe35   :  { %3064 = vrcp.f32 %v1471_v6 }
 0xe36   :  { %2858 = vmatmul.msk.f32.gmra.mxu3 %vm448_vm12, %v1579_v7 }
 0xe3b   :  { %v3065_v9 = vpop.eup %3064 }
 0xe3c   :  { %v1477_v12 = vmul.f32 %v3065_v9, %v3053_v10  ;;  %v1474_v13 = vpop.xlane.xlu0 %1473 }
 0xe3d   :  { %3066 = vrcp.f32 %v1474_v13 }
 0xe3e   :  { %2850 = vmatmul.msk.f32.vlgmr.msra.gmra.mxu0 %vm448_vm12, %v1477_v12  ;;  %v2968_v12 = vld [vmem:[%s4122_s23 + $0x1] ss:$0 sm:$0xff]  ;;  %s4136_s23 = sld [smem:[#allocation33_spill]] }
 0xe43   :  { %v3067_v14 = vpop.eup %3066 }
 0xe44   :  { %v1478_v15 = vmul.f32 %v3067_v14, %v3057_v58  ;;  %v2809_v58 = vld [vmem:[%s4121_s22 + $0x30] sm:$0xff]  ;;  %s4135_s22 = sld [smem:[#allocation18_spill]] }
 0xe45   :  { %1756 = vmatpush.msrb.mxu0 %v2809_v58 }
 0xe46   :  { %2851 = vmatmul.msk.f32.gmra.mxu0 %vm448_vm12, %v1478_v15 }
 0xe47   :  { %1757 = vmatpush.msrb.mxu0 %v2808_v59 }
 0xe49   :  { %1758 = vmatpush.msrb.mxu0 %v2807_v23 }
 0xe4b   :  { %v1408_v16 = vpop.f32.mrf.mxu3 }
 0xe4c   :  { %1618 = vrot.lane.b32.xlu1 %v1408_v16, %s3220_s15  ;;  %v2969_v16 = vld [vmem:[%s4123_s26 + $0x1] ss:$0 sm:$0xff]  ;;  %s4137_s26 = sld [smem:[#allocation34_spill]] }
 0xe53   :  { %v1411_v18 = vpop.f32.mrf.mxu3 }
 0xe54   :  { %1620 = vrot.lane.b32.xlu1 %v1411_v18, %s3220_s15 }
 0xe5b   :  { %v1610_v20 = vpop.f32.mrf.mxu3 }
 0xe5c   :  { %1634 = vrot.lane.b32.xlu2 %v1610_v20, %s3222_s18 }
 0xeb6   :  { %v1635_v29 = vpop.permute.xlu2 %1634 }
 0xeb9   :  { %v1613_v21 = vpop.f32.mrf.mxu3 }
 0xeba   :  { %1636 = vrot.lane.b32.xlu1 %v1613_v21, %s3222_s18 }
 0xebb   :  { %v1509_v19 = vpop.f32.mrf.mxu0 }
 0xebc   :  { %1626 = vrot.lane.b32.xlu0 %v1509_v19, %s3221_s16 }
 0xebe   :  { %v1619_v27 = vpop.permute.xlu1 %1618 }
 0xebf   :  { %v1640_v31 = vsel %vm244_vm1, %v3802_v4, %v1619_v27  ;;  %v2827_v27 = vld [vmem:[%s4124_s28 + $0xf8] sm:$0xff] }
 0xec0   :  { %1857 = vmatpush.msrb.mxu2 %v2827_v27 }
 0xec3   :  { %v1512_v11 = vpop.f32.mrf.mxu0 }
 0xec4   :  { %1628 = vrot.lane.b32.xlu2 %v1512_v11, %s3221_s16 }
 0xec6   :  { %v1621_v30 = vpop.permute.xlu1 %1620 }
 0xec7   :  { %v1641_v37 = vsel %vm244_vm1, %v3804_v5, %v1621_v30  ;;  %v2825_v30 = vld [vmem:[%s4124_s28 + $0xe8] sm:$0xff] }
 0xf1e   :  { %v1629_v34 = vpop.permute.xlu2 %1628 }
 0xf1f   :  { %v1643_v40 = vsel %vm838_vm14, %v1641_v37, %v1629_v34 }
 0xf2c   :  { %v1637_v35 = vpop.permute.xlu1 %1636 }
 0xf2d   :  { %v1645_v38 = vsel %vm841_vm15, %v1643_v40, %v1637_v35  ;;  %v2822_v35 = vld [vmem:[%s4124_s28 + $0xd0] sm:$0xff]  ;;  %v2821_v40 = vld [vmem:[%s4124_s28 + $0xc8] sm:$0xff] }
 0xf2e   :  { %v1627_v57 = vpop.permute.xlu0 %1626 }
 0xf2f   :  { %v1642_v32 = vsel %vm838_vm14, %v1640_v31, %v1627_v57  ;;  %v2970_v31 = vld [vmem:[%s4125_s1 + $0x1] ss:$0 sm:$0xff]  ;;  %s4139_s1 = sld [smem:[#allocation20_spill]] }
 0xf30   :  { %v1644_v33 = vsel %vm841_vm15, %v1642_v32, %v1635_v29  ;;  %v2826_v29 = vld [vmem:[%s4124_s28 + $0xf0] sm:$0xff]  ;;  %v2824_v57 = vld [vmem:[%s4124_s28 + $0xe0] sm:$0xff]  ;;  %v2823_v32 = vld [vmem:[%s4124_s28 + $0xd8] sm:$0xff] }
 0xf31   :  { %2859 = vmatmul.msk.f32.vlgmr.msrb.gmra.mxu1 %vm312_vm2, %v1644_v33  ;;  %1858 = vmatpush.msrb.mxu2 %v2826_v29 }
 0xf33   :  { %1859 = vmatpush.msrb.mxu2 %v2825_v30 }
 0xf35   :  { %1860 = vmatpush.msrb.mxu2 %v2824_v57 }
 0xf37   :  { %1861 = vmatpush.msrb.mxu2 %v2823_v32 }
 0xf39   :  { %2860 = vmatmul.msk.f32.gmra.mxu1 %vm312_vm2, %v1645_v38  ;;  %1862 = vmatpush.msrb.mxu2 %v2822_v35 }
 0xf3b   :  { %1863 = vmatpush.msrb.mxu2 %v2821_v40 }
 0xfae   :  { %v1672_v4 = vpop.f32.mrf.mxu1 }
 0xfaf   :  { %v1673_v41 = vadd.f32 %v2967_v39, %v1672_v4 }
 0xfb1   :  { %v3858_v54 = vadd.f32 %v1673_v41, %v3708_v22  ;;  %v2819_v41 = vld [vmem:[%s4124_s28 + $0xb8] sm:$0xff] }
 0xfb3   :  { %v1680_v42 = vsel %vm312_vm2, %v3858_v54, 0.0 }
 0xfb4   :  { %1681 = vadd.xlane.f32.xlu2 %v1680_v42 }
 0xfb6   :  { %v1675_v43 = vpop.f32.mrf.mxu1 }
 0xfb7   :  { %v1676_v44 = vadd.f32 %v2967_v39, %v1675_v43  ;;  %v2820_v39 = vld [vmem:[%s4124_s28 + $0xc0] sm:$0xff] }
 0xfb8   :  { %1864 = vmatpush.msrb.mxu2 %v2820_v39 }
 0xfb9   :  { %v3863_v5 = vadd.f32 %v1676_v44, %v3713_v25 }
 0xfba   :  { %1865 = vmatpush.msrb.mxu2 %v2819_v41 }
 0xfbb   :  { %v1683_v45 = vsel %vm316_vm3, %v3863_v5, 0.0 }
 0xfbc   :  { %1684 = vadd.xlane.f32.xlu0 %v1683_v45 }
0x1027   :  { %v1682_v47 = vpop.xlane.xlu2 %1681 }
0x1028   :  { %v1686_v22 = vmul.f32 %v1682_v47, %v3487_v36  ;;  %v2818_v47 = vld [vmem:[%s4124_s28 + $0xb0] sm:$0xff] }
0x1029   :  { %1866 = vmatpush.msrb.mxu2 %v2818_v47 }
0x102a   :  { %v1688_v49 = vsub.f32 %v3858_v54, %v1686_v22 }
0x102c   :  { %v1690_v50 = vmul.f32 %v1688_v49, %v1688_v49 }
0x102e   :  { %v1692_v10 = vsel %vm312_vm2, %v1690_v50, 0.0  ;;  %v2817_v50 = vld [vmem:[%s4124_s28 + $0xa8] sm:$0xff] }
0x102f   :  { %1693 = vadd.xlane.f32.xlu1 %v1692_v10  ;;  %v1685_v46 = vpop.xlane.xlu0 %1684  ;;  %1867 = vmatpush.msrb.mxu2 %v2817_v50 }
0x1030   :  { %v1687_v25 = vmul.f32 %v1685_v46, %v3487_v36 }
0x1032   :  { %v1689_v51 = vsub.f32 %v3863_v5, %v1687_v25 }
0x1034   :  { %v1691_v53 = vmul.f32 %v1689_v51, %v1689_v51 }
0x1036   :  { %v1695_v55 = vsel %vm316_vm3, %v1691_v53, 0.0 }
0x1037   :  { %1696 = vadd.xlane.f32.xlu2 %v1695_v55 }
0x10a2   :  { %v1694_v60 = vpop.xlane.xlu1 %1693 }
0x10a3   :  { %v1698_v61 = vmul.f32 %v1694_v60, %v3487_v36  ;;  %v2814_v60 = vld [vmem:[%s4124_s28 + $0x90] sm:$0xff] }
0x10a5   :  { %v1700_v17 = vadd.f32 1e-05, %v1698_v61 }
0x10a7   :  { %3068 = vrsqrt.f32 %v1700_v17  ;;  %vm1708_vm7 = vweird.f32 %v1700_v17 }
0x10aa   :  { %v1697_v62 = vpop.xlane.xlu2 %1696 }
0x10ab   :  { %v1699_v28 = vmul.f32 %v1697_v62, %v3487_v36 }
0x10ad   :  { %v3069_v63 = vpop.eup %3068  ;;  %v1701_v0 = vadd.f32 1e-05, %v1699_v28  ;;  %v2813_v28 = vld [vmem:[%s4124_s28 + $0x88] sm:$0xff] }
0x10ae   :  { %v1703_v1 = vmul.f32 %v3069_v63, %v1700_v17  ;;  %vm1709_vm13 = vweird.f32 %v3069_v63 }
0x10af   :  { %3070 = vrsqrt.f32 %v1701_v0  ;;  %vm1710_vm8 = vmor %vm1708_vm7, %vm1709_vm13  ;;  %vm1718_vm10 = vweird.f32 %v1701_v0 }
0x10b0   :  { %v1704_v2 = vmul.f32 %v3069_v63, %v1703_v1  ;;  %v2812_v1 = vld [vmem:[%s4124_s28 + $0x80] sm:$0xff] }
0x10b2   :  { %v1705_v48 = vmul.f32 0.5, %v1704_v2 }
0x10b4   :  { %v1706_v3 = vsub.f32 1.5, %v1705_v48 }
0x10b5   :  { %v3071_v6 = vpop.eup %3070 }
0x10b6   :  { %v1707_v7 = vmul.f32 %v3069_v63, %v1706_v3  ;;  %v1713_v9 = vmul.f32 %v3071_v6, %v1701_v0  ;;  %vm1719_vm9 = vweird.f32 %v3071_v6 }
0x10b7   :  { %vm1720_vm0 = vmor %vm1718_vm10, %vm1719_vm9 }
0x10b8   :  { %v1711_v13 = vsel %vm1710_vm8, %v3069_v63, %v1707_v7  ;;  %v1714_v14 = vmul.f32 %v3071_v6, %v1713_v9 }
0x10b9   :  { %v1722_v15 = vmul.f32 %v1711_v13, %v1688_v49 }
0x10ba   :  { %v1715_v18 = vmul.f32 0.5, %v1714_v14 }
0x10bb   :  { %v1727_v20 = vmul.f32 %v2968_v12, %v1722_v15 }
0x10bc   :  { %v1716_v21 = vsub.f32 1.5, %v1715_v18 }
0x10bd   :  { %v1732_v19 = vadd.f32 %v2969_v16, %v1727_v20 }
0x10be   :  { %v1717_v11 = vmul.f32 %v3071_v6, %v1716_v21 }
0x10bf   :  { %2861 = vmatmul.msk.f32.vlgmr.msrb.gmra.mxu0 %vm312_vm2, %v1732_v19 }
0x10c0   :  { %v1721_v24 = vsel %vm1720_vm0, %v3071_v6, %v1717_v11 }
0x10c1   :  { %v1723_v8 = vmul.f32 %v1721_v24, %v1689_v51  ;;  %v2816_v51 = vld [vmem:[%s4124_s28 + $0xa0] sm:$0xff]  ;;  %s4138_s28 = sld [smem:[#allocation35_spill]] }
0x10c2   :  { %1868 = vmatpush.msrb.mxu2 %v2816_v51 }
0x10c3   :  { %v1728_v26 = vmul.f32 %v2968_v12, %v1723_v8 }
0x10c4   :  { %1869 = vmatpush.msrb.mxu2 %v2815_v56 }
0x10c5   :  { %v1733_v52 = vadd.f32 %v2969_v16, %v1728_v26 }
0x10c6   :  { %1870 = vmatpush.msrb.mxu2 %v2814_v60 }
0x10c7   :  { %2862 = vmatmul.msk.f32.gmra.mxu0 %vm312_vm2, %v1733_v52 }
0x10c8   :  { %1871 = vmatpush.msrb.mxu2 %v2813_v28 }
0x10ca   :  { %1872 = vmatpush.msrb.mxu2 %v2812_v1 }
0x113c   :  { %v1760_v33 = vpop.f32.mrf.mxu0 }
0x113d   :  { %v3889_v34 = vadd.f32 %v2970_v31, %v1760_v33 }
0x113f   :  { %v3893_v37 = vmul.f32 0.70710677, %v3889_v34  ;;  %v1766_v56 = vmul.f32 0.5, %v3889_v34  ;;  %v2971_v34 = vld [vmem:[%s4126_s2 + $0x1] ss:$0 sm:$0xff]  ;;  %s4140_s2 = sld [smem:[#allocation8_spill]] }
0x1141   :  { %v1770_v38 = vmul.f32 %v3893_v37, %v3893_v37 }
0x1143   :  { %v1771_v4 = vmin.f32 %v1770_v38, 16.0 }
0x1144   :  { %v1763_v42 = vpop.f32.mrf.mxu0 }
0x1145   :  { %v1772_v43 = vmul.f32 2.1237322e-06, %v1771_v4  ;;  %v1783_v44 = vmul.f32 3.8918573e-05, %v1771_v4  ;;  %v3900_v45 = vadd.f32 %v2970_v31, %v1763_v42 }
0x1147   :  { %v1773_v22 = vadd.f32 0.00028619796, %v1772_v43  ;;  %v1784_v49 = vadd.f32 0.001143296, %v1783_v44  ;;  %v3905_v10 = vmul.f32 0.70710677, %v3900_v45 }
0x1149   :  { %v1774_v46 = vmul.f32 %v1773_v22, %v1771_v4  ;;  %v1785_v25 = vmul.f32 %v1784_v49, %v1771_v4  ;;  %v1810_v53 = vmul.f32 %v3905_v10, %v3905_v10 }
0x114b   :  { %v1786_v55 = vadd.f32 0.014752088, %v1785_v25  ;;  %v1775_v58 = vadd.f32 0.0036580483, %v1774_v46  ;;  %v1811_v59 = vmin.f32 %v1810_v53, 16.0 }
0x114d   :  { %v1787_v23 = vmul.f32 %v1786_v55, %v1771_v4  ;;  %v1812_v61 = vmul.f32 2.1237322e-06, %v1811_v59  ;;  %v1823_v17 = vmul.f32 3.8918573e-05, %v1811_v59  ;;  %v1776_v63 = vmul.f32 %v1775_v58, %v1771_v4 }
0x114f   :  { %v1788_v62 = vadd.f32 0.112945676, %v1787_v23  ;;  %v1813_v0 = vadd.f32 0.00028619796, %v1812_v61  ;;  %v1824_v2 = vadd.f32 0.001143296, %v1823_v17 }
0x1150   :  { %v1777_v9 = vadd.f32 0.05243302, %v1776_v63  ;;  %v1767_v63 = vmul.f32 0.5, %v3900_v45 }
0x1151   :  { %v1789_v48 = vmul.f32 %v1788_v62, %v1771_v4  ;;  %v1814_v3 = vmul.f32 %v1813_v0, %v1811_v59  ;;  %v1825_v6 = vmul.f32 %v1824_v2, %v1811_v59 }
0x1152   :  { %v1778_v18 = vmul.f32 %v1777_v9, %v1771_v4 }
0x1153   :  { %v1790_v7 = vadd.f32 0.4994258, %v1789_v48  ;;  %v1826_v12 = vadd.f32 0.014752088, %v1825_v6  ;;  %v1815_v14 = vadd.f32 0.0036580483, %v1814_v3 }
0x1154   :  { %v1779_v11 = vadd.f32 0.18741608, %v1778_v18 }
0x1155   :  { %v1791_v13 = vmul.f32 %v1790_v7, %v1771_v4  ;;  %v1827_v15 = vmul.f32 %v1826_v12, %v1811_v59  ;;  %v1816_v21 = vmul.f32 %v1815_v14, %v1811_v59 }
0x1156   :  { %v1780_v27 = vmul.f32 %v1779_v11, %v1771_v4 }
0x1157   :  { %v1792_v16 = vadd.f32 1.0, %v1791_v13  ;;  %v1828_v20 = vadd.f32 0.112945676, %v1827_v15  ;;  %v1817_v8 = vadd.f32 0.05243302, %v1816_v21 }
0x1158   :  { %v1781_v33 = vadd.f32 1.1283791, %v1780_v27 }
0x1159   :  { %3072 = vrcp.f32 %v1792_v16  ;;  %v1829_v19 = vmul.f32 %v1828_v20, %v1811_v59  ;;  %v1818_v31 = vmul.f32 %v1817_v8, %v1811_v59  ;;  %v1804_v32 = vand.u32 2147483648, %v1792_v16 }
0x115a   :  { %v1802_v40 = vand.u32 2147483647, %v1792_v16  ;;  %vm1798_vm5 = vweird.f32 %v1792_v16  ;;  %v1782_v43 = vmul.f32 %v1781_v33, %v3893_v37 }
0x115b   :  { %v1830_v24 = vadd.f32 0.4994258, %v1829_v19  ;;  %v1819_v38 = vadd.f32 0.18741608, %v1818_v31  ;;  %v1805_v41 = vor.u32 1.1754944e-38, %v1804_v32 }
0x115c   :  { %vm1803_vm13 = vcmp.eq.f32.partialorder %v1802_v40, 8.507059e+37 }
0x115d   :  { %v1831_v26 = vmul.f32 %v1830_v24, %v1811_v59  ;;  %v1820_v47 = vmul.f32 %v1819_v38, %v1811_v59 }
0x115f   :  { %v3073_v52 = vpop.eup %3072  ;;  %v1832_v30 = vadd.f32 1.0, %v1831_v26  ;;  %v1821_v51 = vadd.f32 1.1283791, %v1820_v47 }
0x1160   :  { %v1794_v29 = vmul.f32 %v3073_v52, %v1792_v16  ;;  %vm1799_vm4 = vweird.f32 %v3073_v52 }
0x1161   :  { %3074 = vrcp.f32 %v1832_v30  ;;  %vm1800_vm6 = vmor %vm1798_vm5, %vm1799_vm4  ;;  %v1844_v25 = vand.u32 2147483648, %v1832_v30  ;;  %v1842_v55 = vand.u32 2147483647, %v1832_v30  ;;  %vm1838_vm8 = vweird.f32 %v1832_v30 }
0x1162   :  { %v1795_v57 = vsub.f32 1.0, %v1794_v29  ;;  %v1822_v59 = vmul.f32 %v1821_v51, %v3905_v10  ;;  %v2122_v51 = vld [vmem:[%s4129_s30] sm:$0xff] }
0x1163   :  { %v1845_v60 = vor.u32 1.1754944e-38, %v1844_v25  ;;  %vm1843_vm10 = vcmp.eq.f32.partialorder %v1842_v55, 8.507059e+37 }
0x1164   :  { %v1796_v35 = vmul.f32 %v3073_v52, %v1795_v57 }
0x1166   :  { %v1797_v39 = vadd.f32 %v3073_v52, %v1796_v35  ;;  %v2972_v35 = vld [vmem:[%s4127_s25] ss:$0 sm:$0xff] }
0x1167   :  { %v3075_v42 = vpop.eup %3074 }
0x1168   :  { %v1801_v44 = vsel %vm1800_vm6, %v3073_v52, %v1797_v39  ;;  %v1834_v22 = vmul.f32 %v3075_v42, %v1832_v30  ;;  %vm1839_vm7 = vweird.f32 %v3075_v42 }
0x1169   :  { %v1806_v4 = vsel %vm1803_vm13, %v1805_v41, %v1801_v44  ;;  %vm1840_vm9 = vmor %vm1838_vm8, %vm1839_vm7  ;;  %v2973_v41 = vld [vmem:[%s4128_s24] ss:$0 sm:$0xff] }
0x116a   :  { %v1807_v49 = vmul.f32 %v1806_v4, %v1782_v43  ;;  %v1835_v50 = vsub.f32 1.0, %v1834_v22 }
0x116c   :  { %v2863_v46 = vclamps-f32 %v1807_v49, 1.0  ;;  %v1836_v53 = vmul.f32 %v3075_v42, %v1835_v50 }
0x116e   :  { %v1850_v58 = vadd.f32 1.0, %v2863_v46  ;;  %v1837_v23 = vadd.f32 %v3075_v42, %v1836_v53  ;;  %v1940_v53 = vld [vmem:[%s4130_s6] sm:$0x3] }
0x1170   :  { %v1852_v37 = vmul.f32 %v1850_v58, %v1766_v56  ;;  %v1841_v61 = vsel %vm1840_vm9, %v3075_v42, %v1837_v23  ;;  %v1970_v58 = vld [vmem:[%s4131_s12 + $0x18] sm:$0xff]  ;;  %v1969_v23 = vld [vmem:[%s4131_s12 + $0x10] sm:$0xff] }
0x1171   :  { %v1846_v17 = vsel %vm1843_vm10, %v1845_v60, %v1841_v61  ;;  %v1967_v60 = vld [vmem:[%s4131_s12] sm:$0xff] }
0x1172   :  { %1873 = vmatmul.f32.vlgmr.msrb.gmra.mxu2 %v1852_v37  ;;  %v1847_v62 = vmul.f32 %v1846_v17, %v1822_v59  ;;  %v1968_v37 = vld [vmem:[%s4131_s12 + $0x8] sm:$0xff] }
0x1174   :  { %v2864_v28 = vclamps-f32 %v1847_v62, 1.0 }
0x1176   :  { %v1851_v0 = vadd.f32 1.0, %v2864_v28 }
0x1178   :  { %v1853_v1 = vmul.f32 %v1851_v0, %v1767_v63 }
0x117a   :  { %1876 = vmatmul.f32.gmra.mxu2 %v1853_v1 }
0x11f5   :  { %v1874_v2 = vpop.f32.mrf.mxu2 }
0x11f6   :  { %v1875_v48 = vadd.f32 %v2971_v34, %v1874_v2 }
0x11f8   :  { %v1880_v3 = vadd.f32 %v1875_v48, %v3858_v54  ;;  %v2976_v48 = vld [vmem:[%s4133_s20] ss:$0 sm:$0xff] }
0x11fa   :  { %v1884_v6 = vsel %vm312_vm2, %v1880_v3, 0.0 }
0x11fb   :  { %1885 = vadd.xlane.f32.xlu1 %v1884_v6  ;;  %v3223_v6 = vmov 2.0  }
0x11fd   :  { %v1877_v10 = vpop.f32.mrf.mxu2 }
0x11fe   :  { %v1878_v7 = vadd.f32 %v2971_v34, %v1877_v10 }
0x1200   :  { %v1881_v9 = vadd.f32 %v1878_v7, %v3863_v5 }
0x1202   :  { %v1887_v12 = vsel %vm316_vm3, %v1881_v9, 0.0 }
0x1203   :  { %1888 = vadd.xlane.f32.xlu0 %v1887_v12 }
0x126e   :  { %v1886_v13 = vpop.xlane.xlu1 %1885 }
0x126f   :  { %v1890_v45 = vmul.f32 %v1886_v13, %v3487_v36 }
0x1271   :  { %v1892_v14 = vsub.f32 %v1880_v3, %v1890_v45 }
0x1273   :  { %v1894_v15 = vmul.f32 %v1892_v14, %v1892_v14 }
0x1275   :  { %v1896_v16 = vsel %vm312_vm2, %v1894_v15, 0.0 }
0x1276   :  { %1897 = vadd.xlane.f32.xlu0 %v1896_v16  ;;  %v1889_v18 = vpop.xlane.xlu0 %1888 }
0x1277   :  { %v1891_v54 = vmul.f32 %v1889_v18, %v3487_v36 }
0x1279   :  { %v1893_v20 = vsub.f32 %v1881_v9, %v1891_v54 }
0x127b   :  { %v1895_v21 = vmul.f32 %v1893_v20, %v1893_v20 }
0x127d   :  { %v1899_v19 = vsel %vm316_vm3, %v1895_v21, 0.0 }
0x127e   :  { %1900 = vadd.xlane.f32.xlu2 %v1899_v19 }
0x12e9   :  { %v1898_v5 = vpop.xlane.xlu0 %1897 }
0x12ea   :  { %v1902_v11 = vmul.f32 %v1898_v5, %v3487_v36 }
0x12ec   :  { %v1904_v24 = vadd.f32 1e-05, %v1902_v11 }
0x12ee   :  { %3076 = vrsqrt.f32 %v1904_v24  ;;  %vm1912_vm4 = vweird.f32 %v1904_v24 }
0x12f1   :  { %v1901_v8 = vpop.xlane.xlu2 %1900 }
0x12f2   :  { %v1903_v26 = vmul.f32 %v1901_v8, %v3487_v36 }
0x12f4   :  { %v3077_v52 = vpop.eup %3076  ;;  %v1905_v29 = vadd.f32 1e-05, %v1903_v26 }
0x12f5   :  { %v1907_v27 = vmul.f32 %v3077_v52, %v1904_v24  ;;  %vm1913_vm0 = vweird.f32 %v3077_v52 }
0x12f6   :  { %3078 = vrsqrt.f32 %v1905_v29  ;;  %vm1914_vm5 = vmor %vm1912_vm4, %vm1913_vm0  ;;  %vm1922_vm13 = vweird.f32 %v1905_v29 }
0x12f7   :  { %v1908_v30 = vmul.f32 %v3077_v52, %v1907_v27  ;;  %3080 = vrcp.f32 %v3223_v6 }
0x12f9   :  { %v1909_v31 = vmul.f32 0.5, %v1908_v30 }
0x12fb   :  { %v1910_v57 = vsub.f32 1.5, %v1909_v31 }
0x12fc   :  { %v3079_v32 = vpop.eup %3078 }
0x12fd   :  { %v1911_v33 = vmul.f32 %v3077_v52, %v1910_v57  ;;  %v1917_v40 = vmul.f32 %v3079_v32, %v1905_v29  ;;  %vm1923_vm6 = vweird.f32 %v3079_v32 }
0x12fe   :  { %vm1924_vm7 = vmor %vm1922_vm13, %vm1923_vm6 }
0x12ff   :  { %v1915_v38 = vsel %vm1914_vm5, %v3077_v52, %v1911_v33  ;;  %v1918_v39 = vmul.f32 %v3079_v32, %v1917_v40 }
0x1300   :  { %v1926_v42 = vmul.f32 %v1915_v38, %v1892_v14  ;;  %v3081_v14 = vpop.eup %3080 }
0x1301   :  { %v1919_v43 = vmul.f32 0.5, %v1918_v39  ;;  %v2006_v16 = vmul.f32 2.0, %v3081_v14 }
0x1302   :  { %v1931_v44 = vmul.f32 %v2972_v35, %v1926_v42 }
0x1303   :  { %v1920_v4 = vsub.f32 1.5, %v1919_v43  ;;  %v2007_v54 = vsub.f32 1.0, %v2006_v16 }
0x1304   :  { %v1936_v47 = vadd.f32 %v2973_v41, %v1931_v44 }
0x1305   :  { %v1921_v22 = vmul.f32 %v3079_v32, %v1920_v4  ;;  %v2008_v21 = vmul.f32 %v3081_v14, %v2007_v54 }
0x1306   :  { %1938 = vst.msk [vmem:[%s3449_s3] sm:$0xff] %vm312_vm2, %v1936_v47 }
0x1307   :  { %v1925_v49 = vsel %vm1924_vm7, %v3079_v32, %v1921_v22  ;;  %v2009_v11 = vadd.f32 %v3081_v14, %v2008_v21  ;;  %vm2120_vm7 = vcmask 123904  }
0x1308   :  { %v1927_v50 = vmul.f32 %v1925_v49, %v1893_v20 }
0x130a   :  { %v1932_v46 = vmul.f32 %v2972_v35, %v1927_v50  ;;  %v2974_v35 = vld [vmem:[%s4134_s27] ss:$0 sm:$0xff] }
0x130c   :  { %v1937_v25 = vadd.f32 %v2973_v41, %v1932_v46  ;;  %v2975_v41 = vld [vmem:[%s4135_s22] ss:$0 sm:$0xff] }
0x130e   :  { %1939 = vst.msk [vmem:[%s3449_s3 + $0x8] sm:$0x3] %vm316_vm3, %v1937_v25  ;;  %2865 = vmatpush.msk.msrb.mxu3 %vm483_vm11, %v1937_v25  ;;  %2870 = vmatpush.msk.msra.mxu0 %vm483_vm11, %v1937_v25  ;;  %s4132_s3 = sld [smem:[#allocation19_spill]]  ;;  %vm2010_vm11 = vweird.f32 %v3081_v14 }
0x130f   :  { %v2011_v26 = vsel %vm2010_vm11, %v3081_v14, %v2009_v11 }
0x1310   :  { %1962 = vmatpush.msrb.mxu3 %v1936_v47  ;;  %2141 = vmatpush.msra.mxu0 %v1936_v47 }
0x1311   :  { %2871 = vmatmul.msk.f32.vlgmr.msra.gmra.mxu0 %vm448_vm12, %v2122_v51  ;;  %2866 = vmatmul.msk.f32.vlgmr.msrb.gmra.mxu3 %vm448_vm12, %v1940_v53 }
0x1312   :  { %1990 = vmatpush.msra.mxu3 %v1970_v58 }
0x1314   :  { %1991 = vmatpush.msra.mxu3 %v1969_v23  ;;  %v2152_v0 = vld [vmem:[%s4132_s3 + $0x18] sm:$0xff]  ;;  %v2151_v1 = vld [vmem:[%s4132_s3 + $0x10] sm:$0xff]  ;;  %v2150_v34 = vld [vmem:[%s4132_s3 + $0x8] sm:$0xff] }
0x1315   :  { %v2149_v2 = vld [vmem:[%s4132_s3] sm:$0xff] }
0x1316   :  { %1992 = vmatpush.msra.mxu3 %v1968_v37  ;;  %v2977_v37 = vld [vmem:[%s4136_s23] ss:$0 sm:$0xff] }
0x1318   :  { %1993 = vmatpush.msra.mxu3 %v1967_v60 }
0x131a   :  { %2231 = vmatpush.msrb.mxu3 %v2152_v0 }
0x131c   :  { %2232 = vmatpush.msrb.mxu3 %v2151_v1 }
0x131e   :  { %2233 = vmatpush.msrb.mxu3 %v2150_v34 }
0x1320   :  { %2234 = vmatpush.msrb.mxu3 %v2149_v2 }
0x138e   :  { %v3941_v55 = vpop.f32.mrf.mxu0 }
0x138f   :  { %v2183_v56 = vsel %vm312_vm2, %v3941_v55, 0.0 }
0x1390   :  { %2184 = vadd.xlane.f32.xlu1 %v2183_v56 }
0x1394   :  { %v1964_v59 = vpop.f32.mrf.mxu3 }
0x1395   :  { %2867 = vmatmul.msk.f32.vlgmr.msra.gmra.mxu3 %vm312_vm2, %v1964_v59 }
0x1403   :  { %v2185_v61 = vpop.xlane.xlu1 %2184 }
0x1404   :  { %v2186_v17 = vmul.f32 %v2185_v61, %v3487_v36  ;;  %v2978_v61 = vld [vmem:[%s4137_s26] ss:$0 sm:$0xff] }
0x1406   :  { %v2187_v62 = vsub.f32 %v3941_v55, %v2186_v17 }
0x1408   :  { %v2188_v28 = vmul.f32 %v2187_v62, %v2187_v62 }
0x140a   :  { %v2189_v63 = vsel %vm312_vm2, %v2188_v28, 0.0 }
0x140b   :  { %2190 = vadd.xlane.f32.xlu2 %v2189_v63 }
0x1418   :  { %v1995_v3 = vpop.f32.mrf.mxu3 }
0x1419   :  { %v1996_v10 = vadd.f32 %v2976_v48, %v1995_v3  ;;  %v2092_v48 = vld [vmem:[%s4138_s28 + $0x18] sm:$0xff] }
0x141a   :  { %2112 = vmatpush.msra.mxu1 %v2092_v48 }
0x141b   :  { %v1998_v12 = vsel %vm316_vm3, %v1996_v10, 0.0 }
0x141c   :  { %v1999_v13 = vrot.slane %v1998_v12, 4 }
0x141e   :  { %v2000_v15 = vadd.f32 %v1999_v13, %v1998_v12 }
0x1420   :  { %v2001_v18 = vrot.slane %v2000_v15, 2 }
0x1422   :  { %v2002_v20 = vadd.f32 %v2001_v18, %v2000_v15 }
0x1424   :  { %v2003_v19 = vrot.slane %v2002_v20, 1 }
0x1426   :  { %v2004_v8 = vadd.f32 %v2003_v19, %v2002_v20 }
0x1428   :  { %v2012_v27 = vmul.f32 %v2011_v26, %v2004_v8 }
0x142a   :  { %v2013_v30 = vsub.f32 %v1996_v10, %v2012_v27 }
0x142c   :  { %v2014_v57 = vmul.f32 %v2013_v30, %v2013_v30 }
0x142e   :  { %v2015_v33 = vsel %vm316_vm3, %v2014_v57, 0.0 }
0x142f   :  { %v2016_v40 = vrot.slane %v2015_v33, 4 }
0x1431   :  { %v2017_v42 = vadd.f32 %v2016_v40, %v2015_v33 }
0x1433   :  { %v2018_v44 = vrot.slane %v2017_v42, 2 }
0x1435   :  { %v2019_v47 = vadd.f32 %v2018_v44, %v2017_v42  ;;  %v2979_v44 = vld [vmem:[%s4139_s1] ss:$0 sm:$0xff] }
0x1437   :  { %v2020_v22 = vrot.slane %v2019_v47, 1 }
0x1439   :  { %v2021_v49 = vadd.f32 %v2020_v22, %v2019_v47 }
0x143b   :  { %v2022_v50 = vmul.f32 %v2021_v49, %v2011_v26  ;;  %v2980_v49 = vld [vmem:[%s3444_s29] ss:$0 sm:$0xff]  ;;  %s4141_s29 = sld [smem:[#allocation21_spill]] }
0x143d   :  { %v2023_v46 = vadd.f32 1e-05, %v2022_v50 }
0x143f   :  { %vm2030_vm3 = vweird.f32 %v2023_v46 }
0x147e   :  { %v2191_v7 = vpop.xlane.xlu2 %2190 }
0x147f   :  { %v2192_v9 = vmul.f32 %v2191_v7, %v3487_v36 }
0x1481   :  { %v2193_v45 = vadd.f32 1e-05, %v2192_v9 }
0x1483   :  { %3082 = vrsqrt.f32 %v2193_v45  ;;  %vm2200_vm8 = vweird.f32 %v2193_v45 }
0x1484   :  { %3084 = vrsqrt.f32 %v2023_v46 }
0x1489   :  { %v3083_v5 = vpop.eup %3082 }
0x148a   :  { %v2195_v24 = vmul.f32 %v3083_v5, %v2193_v45  ;;  %vm2201_vm12 = vweird.f32 %v3083_v5  ;;  %v3085_v25 = vpop.eup %3084 }
0x148b   :  { %vm2202_vm9 = vmor %vm2200_vm8, %vm2201_vm12  ;;  %v2025_v51 = vmul.f32 %v3085_v25, %v2023_v46  ;;  %vm2031_vm10 = vweird.f32 %v3085_v25 }
0x148c   :  { %v2196_v52 = vmul.f32 %v3083_v5, %v2195_v24  ;;  %vm2032_vm0 = vmor %vm2030_vm3, %vm2031_vm10 }
0x148d   :  { %v2026_v53 = vmul.f32 %v3085_v25, %v2025_v51 }
0x148e   :  { %v2197_v29 = vmul.f32 0.5, %v2196_v52 }
0x148f   :  { %v2027_v56 = vmul.f32 0.5, %v2026_v53 }
0x1490   :  { %v2198_v31 = vsub.f32 1.5, %v2197_v29 }
0x1491   :  { %v2028_v58 = vsub.f32 1.5, %v2027_v56 }
0x1492   :  { %v2199_v32 = vmul.f32 %v3083_v5, %v2198_v31 }
0x1493   :  { %v2029_v23 = vmul.f32 %v3085_v25, %v2028_v58  ;;  %v2146_v58 = vld [vmem:[%s4140_s2] sm:$0xff] }
0x1494   :  { %v2203_v38 = vsel %vm2202_vm9, %v3083_v5, %v2199_v32 }
0x1495   :  { %v2204_v39 = vmul.f32 %v2203_v38, %v2187_v62  ;;  %v2033_v60 = vsel %vm2032_vm0, %v3085_v25, %v2029_v23 }
0x1496   :  { %v2034_v59 = vmul.f32 %v2033_v60, %v2013_v30 }
0x1497   :  { %v2208_v43 = vmul.f32 %v2974_v35, %v2204_v39  ;;  %v2091_v35 = vld [vmem:[%s4138_s28 + $0x10] sm:$0xff]  ;;  %v2090_v39 = vld [vmem:[%s4138_s28 + $0x8] sm:$0xff] }
0x1498   :  { %v2039_v17 = vmul.f32 %v2977_v37, %v2034_v59  ;;  %2113 = vmatpush.msra.mxu1 %v2091_v35 }
0x1499   :  { %v2212_v4 = vadd.f32 %v2975_v41, %v2208_v43  ;;  %v2089_v41 = vld [vmem:[%s4138_s28] sm:$0xff] }
0x149a   :  { %v2044_v62 = vadd.f32 %v2978_v61, %v2039_v17  ;;  %2114 = vmatpush.msra.mxu1 %v2090_v39 }
0x149b   :  { %2872 = vmatmul.msk.f32.vlgmr.msrb.gmra.mxu3 %vm312_vm2, %v2212_v4 }
0x149c   :  { %v2046_v28 = vmul.f32 0.70710677, %v2044_v62  ;;  %v2045_v40 = vmul.f32 0.5, %v2044_v62  ;;  %2115 = vmatpush.msra.mxu1 %v2089_v41 }
0x149e   :  { %v2047_v63 = vmul.f32 %v2046_v28, %v2046_v28 }
0x14a0   :  { %v2048_v0 = vmin.f32 %v2047_v63, 16.0 }
0x14a2   :  { %v2060_v1 = vmul.f32 3.8918573e-05, %v2048_v0  ;;  %v2049_v9 = vmul.f32 2.1237322e-06, %v2048_v0 }
0x14a4   :  { %v2061_v34 = vadd.f32 0.001143296, %v2060_v1  ;;  %v2050_v13 = vadd.f32 0.00028619796, %v2049_v9 }
0x14a6   :  { %v2062_v2 = vmul.f32 %v2061_v34, %v2048_v0  ;;  %v2051_v14 = vmul.f32 %v2050_v13, %v2048_v0 }
0x14a8   :  { %v2063_v3 = vadd.f32 0.014752088, %v2062_v2  ;;  %v2052_v16 = vadd.f32 0.0036580483, %v2051_v14 }
0x14aa   :  { %v2064_v6 = vmul.f32 %v2063_v3, %v2048_v0  ;;  %v2053_v18 = vmul.f32 %v2052_v16, %v2048_v0 }
0x14ac   :  { %v2065_v10 = vadd.f32 0.112945676, %v2064_v6  ;;  %v2054_v20 = vadd.f32 0.05243302, %v2053_v18 }
0x14ae   :  { %v2066_v7 = vmul.f32 %v2065_v10, %v2048_v0  ;;  %v2055_v19 = vmul.f32 %v2054_v20, %v2048_v0 }
0x14b0   :  { %v2067_v12 = vadd.f32 0.4994258, %v2066_v7  ;;  %v2056_v11 = vadd.f32 0.18741608, %v2055_v19 }
0x14b2   :  { %v2068_v45 = vmul.f32 %v2067_v12, %v2048_v0  ;;  %v2057_v8 = vmul.f32 %v2056_v11, %v2048_v0 }
0x14b4   :  { %v2069_v15 = vadd.f32 1.0, %v2068_v45  ;;  %v2058_v29 = vadd.f32 1.1283791, %v2057_v8 }
0x14b6   :  { %3086 = vrcp.f32 %v2069_v15  ;;  %vm2075_vm4 = vweird.f32 %v2069_v15  ;;  %v2081_v26 = vand.u32 2147483648, %v2069_v15  ;;  %v2079_v27 = vand.u32 2147483647, %v2069_v15 }
0x14b7   :  { %v2059_v57 = vmul.f32 %v2058_v29, %v2046_v28 }
0x14b8   :  { %v2082_v30 = vor.u32 1.1754944e-38, %v2081_v26  ;;  %vm2080_vm13 = vcmp.eq.f32.partialorder %v2079_v27, 8.507059e+37 }
0x14bc   :  { %v3087_v54 = vpop.eup %3086 }
0x14bd   :  { %v2071_v21 = vmul.f32 %v3087_v54, %v2069_v15  ;;  %vm2076_vm5 = vweird.f32 %v3087_v54 }
0x14be   :  { %vm2077_vm6 = vmor %vm2075_vm4, %vm2076_vm5 }
0x14bf   :  { %v2072_v5 = vsub.f32 1.0, %v2071_v21 }
0x14c1   :  { %v2073_v24 = vmul.f32 %v3087_v54, %v2072_v5 }
0x14c3   :  { %v2074_v52 = vadd.f32 %v3087_v54, %v2073_v24 }
0x14c5   :  { %v2078_v31 = vsel %vm2077_vm6, %v3087_v54, %v2074_v52 }
0x14c6   :  { %v2083_v32 = vsel %vm2080_vm13, %v2082_v30, %v2078_v31 }
0x14c7   :  { %v2084_v33 = vmul.f32 %v2083_v32, %v2059_v57 }
0x14c9   :  { %v2868_v38 = vclamps-f32 %v2084_v33, 1.0 }
0x14cb   :  { %v2087_v42 = vadd.f32 1.0, %v2868_v38 }
0x14cd   :  { %v2088_v43 = vmul.f32 %v2087_v42, %v2045_v40 }
0x14cf   :  { %2869 = vmatmul.msk.f32.vlgmr.msra.gmra.mxu1 %vm312_vm2, %v2088_v43 }
0x151e   :  { %v2236_v4 = vpop.f32.mrf.mxu3 }
0x151f   :  { %v3972_v47 = vadd.f32 %v2979_v44, %v2236_v4 }
0x1521   :  { %2279 = vrot.lane.b32.xlu2 %v3972_v47, %s3217_s7  ;;  %2240 = vrot.lane.b32.xlu0 %v3972_v47, %s3211_s9  ;;  %s4144_s9 = sld [smem:[#allocation23_spill]]  ;;  %s2693_s7 = sshll.u32 %s3459_s4, 4  ;;  %s2694_s7 = int_to_ptr.hbm [resolvable:$true] %s2693_s7 }
0x1529   :  { %2305 = vrot.lane.b32.xlu0 %v3972_v47, %s3209_s0  ;;  %s4142_s0 = sld [smem:[#allocation22_spill]] }
0x1531   :  { %2374 = vrot.lane.b32.xlu0 %v3972_v47, %s3214_s21  ;;  %s4147_s21 = sld [smem:[#allocation26_spill]] }
0x1539   :  { %2372 = vrot.lane.b32.xlu0 %v3972_v47, %s3213_s17  ;;  %s4146_s17 = sld [smem:[#allocation27_spill]] }
0x154c   :  { %v2117_v50 = vpop.f32.mrf.mxu1 }
0x154d   :  { %v2118_v46 = vadd.f32 %v2980_v49, %v2117_v50 }
0x154f   :  { %2121 = vst.msk [vmem:[#allocation4] sm:$0x3] %vm2120_vm7, %v2118_v46 }
0x157b   :  { %v2280_v22 = vpop.permute.xlu2 %2279 }
0x157c   :  { %2300 = vmatpush.msrb.mxu0 %v2280_v22 }
0x1593   :  { %v2241_v25 = vpop.permute.xlu0 %2240 }
0x1594   :  { %2873 = vmatpush.xpose.msk.msrb.mxu1 %vm244_vm1, %v2241_v25 }
0x1597   :  { %2874 = vmatmul.msk.f32.vlgmr.msrb.gmra.mxu1 %vm244_vm1, %v3972_v47 }
0x159b   :  { %v2306_v51 = vpop.permute.xlu0 %2305 }
0x15a3   :  { %v2375_v53 = vpop.permute.xlu0 %2374 }
0x15a4   :  { %2879 = vmatpush.xpose.msk.msra.mxu0 %vm244_vm1, %v2375_v53  ;;  %v2156_v53 = vld [vmem:[%s4141_s29 + $0x10] sm:$0xff] }
0x15ab   :  { %v2373_v3 = vpop.permute.xlu0 %2372 }
0x1614   :  { %v2263_v56 = vpop.f32.mrf.mxu1 }
0x1615   :  { %v2266_v23 = vmul.f32 0.35355338, %v2263_v56  ;;  %v2155_v56 = vld [vmem:[%s4141_s29 + $0x8] sm:$0xff] }
0x1617   :  { %v2267_v37 = vadd.f32 %v2266_v23, %v2146_v58 }
0x1619   :  { %v2268_v60 = vsel %vm244_vm1, %v2267_v37, -inf }
0x161a   :  { %2269 = vmax.xlane.f32.xlu1 %v2268_v60 }
0x1633   :  { %2307 = vrot.lane.b32.xlu1 %v3972_v47, %s3210_s5  ;;  %s4143_s5 = sld [smem:[#allocation25_spill]] }
0x163b   :  { %2441 = vrot.lane.b32.xlu1 %v3972_v47, %s3212_s13  ;;  %s4145_s13 = sld [smem:[#allocation24_spill]] }
0x168d   :  { %v2270_v59 = vpop.xlane.xlu1 %2269 }
0x168e   :  { %v2271_v61 = vsub.f32 %v2267_v37, %v2270_v59 }
0x1690   :  { %v2272_v17 = vmul.f32 1.442695, %v2271_v61 }
0x1692   :  { %3088 = vpow2.f32 %v2272_v17 }
0x1698   :  { %v3089_v62 = vpop.eup %3088 }
0x1699   :  { %v2274_v28 = vsel %vm244_vm1, %v3089_v62, 0.0 }
0x169a   :  { %2275 = vadd.xlane.f32.xlu2 %v2274_v28 }
0x16a5   :  { %v2308_v63 = vpop.permute.xlu1 %2307 }
0x16a6   :  { %2876 = vmatpush.xpose.msk.msra.mxu3 %vm244_vm1, %v2308_v63 }
0x16a9   :  { %2877 = vmatmul.msk.f32.vlgmr.msra.gmra.mxu3 %vm244_vm1, %v2306_v51  ;;  %v2157_v51 = vld [vmem:[%s4141_s29 + $0x18] sm:$0xff] }
0x16ad   :  { %v2442_v0 = vpop.permute.xlu1 %2441 }
0x16ae   :  { %2882 = vmatpush.xpose.msk.msrb.mxu3 %vm244_vm1, %v2442_v0 }
0x16b2   :  { %2439 = vrot.lane.b32.xlu2 %v3972_v47, %s3215_s14  ;;  %s3224_s14 = smov [#allocation4]  }
0x170d   :  { %v2276_v1 = vpop.xlane.xlu2 %2275 }
0x170e   :  { %3090 = vrcp.f32 %v2276_v1 }
0x1714   :  { %v3091_v34 = vpop.eup %3090 }
0x1715   :  { %v2278_v2 = vmul.f32 %v3091_v34, %v3089_v62  ;;  %v2440_v48 = vpop.permute.xlu2 %2439  ;;  %v2981_v62 = vld [vmem:[%s4142_s0] ss:$0 sm:$0xff] }
0x1716   :  { %2883 = vmatmul.msk.f32.vlgmr.msrb.gmra.mxu3 %vm244_vm1, %v2440_v48 }
0x1717   :  { %2875 = vmatmul.msk.f32.vlgmr.msrb.gmra.mxu0 %vm244_vm1, %v2278_v2 }
0x1718   :  { %2539 = vmatpush.msrb.mxu0 %v2157_v51  ;;  %v2169_v51 = vld [vmem:[%s4146_s17 + $0x18] sm:$0xff] }
0x171a   :  { %2540 = vmatpush.msrb.mxu0 %v2156_v53 }
0x171c   :  { %2541 = vmatpush.msrb.mxu0 %v2155_v56 }
0x171f   :  { %2880 = vmatmul.msk.f32.vlgmr.msra.gmra.mxu0 %vm244_vm1, %v2373_v3 }
0x172c   :  { %v2330_v6 = vpop.f32.mrf.mxu3 }
0x172d   :  { %v2333_v10 = vmul.f32 0.35355338, %v2330_v6 }
0x172f   :  { %v2334_v7 = vadd.f32 %v2333_v10, %v2146_v58  ;;  %v2164_v10 = vld [vmem:[%s4143_s5 + $0x18] sm:$0xff] }
0x1731   :  { %v2335_v9 = vsel %vm244_vm1, %v2334_v7, -inf }
0x1732   :  { %2336 = vmax.xlane.f32.xlu1 %v2335_v9  ;;  %v2162_v9 = vld [vmem:[%s4143_s5 + $0x8] sm:$0xff] }
0x1794   :  { %v4005_v12 = vpop.f32.mrf.mxu0 }
0x1799   :  { %v2464_v13 = vpop.f32.mrf.mxu3 }
0x179a   :  { %v2467_v45 = vmul.f32 0.35355338, %v2464_v13 }
0x179c   :  { %v2397_v14 = vpop.f32.mrf.mxu0  ;;  %v2468_v15 = vadd.f32 %v2467_v45, %v2146_v58 }
0x179d   :  { %v2400_v16 = vmul.f32 0.35355338, %v2397_v14 }
0x179e   :  { %v2469_v18 = vsel %vm244_vm1, %v2468_v15, -inf }
0x179f   :  { %2470 = vmax.xlane.f32.xlu2 %v2469_v18  ;;  %v2401_v54 = vadd.f32 %v2400_v16, %v2146_v58  ;;  %v2154_v58 = vld [vmem:[%s4141_s29] sm:$0xff] }
0x17a0   :  { %2542 = vmatpush.msrb.mxu0 %v2154_v58  ;;  %v2168_v58 = vld [vmem:[%s4146_s17 + $0x10] sm:$0xff] }
0x17a1   :  { %v2402_v20 = vsel %vm244_vm1, %v2401_v54, -inf }
0x17a2   :  { %2403 = vmax.xlane.f32.xlu0 %v2402_v20 }
0x17a5   :  { %v2337_v21 = vpop.xlane.xlu1 %2336 }
0x17a6   :  { %v2338_v19 = vsub.f32 %v2334_v7, %v2337_v21  ;;  %v2163_v7 = vld [vmem:[%s4143_s5 + $0x10] sm:$0xff]  ;;  %v2982_v21 = vld [vmem:[%s4144_s9] ss:$0 sm:$0xff] }
0x17a8   :  { %v2339_v5 = vmul.f32 1.442695, %v2338_v19 }
0x17aa   :  { %3092 = vpow2.f32 %v2339_v5  ;;  %v2983_v5 = vld [vmem:[%s4145_s13] ss:$0 sm:$0xff] }
0x17b0   :  { %v3093_v11 = vpop.eup %3092 }
0x17b1   :  { %v2341_v24 = vsel %vm244_vm1, %v3093_v11, 0.0 }
0x17b2   :  { %2342 = vadd.xlane.f32.xlu1 %v2341_v24 }
0x17cb   :  { %2346 = vrot.lane.b32.xlu1 %v3972_v47, %s3216_s19  ;;  %s2691_s19 = sshll.u32 %s3224_s14, 4  ;;  %s2692_s19 = int_to_ptr.vmem [resolvable:$true] %s2691_s19 }
0x1812   :  { %v2471_v8 = vpop.xlane.xlu2 %2470 }
0x1813   :  { %v2472_v26 = vsub.f32 %v2468_v15, %v2471_v8  ;;  %v2181_v8 = vld [vmem:[%s4146_s17 + $0x78] sm:$0xff] }
0x1814   :  { %2651 = vmatpush.msra.mxu3 %v2181_v8 }
0x1815   :  { %v2473_v52 = vmul.f32 1.442695, %v2472_v26  ;;  %v2404_v27 = vpop.xlane.xlu0 %2403  ;;  %v2180_v26 = vld [vmem:[%s4146_s17 + $0x70] sm:$0xff] }
0x1816   :  { %v2405_v29 = vsub.f32 %v2401_v54, %v2404_v27  ;;  %2652 = vmatpush.msra.mxu3 %v2180_v26  ;;  %v2984_v27 = vld [vmem:[%s4147_s21] ss:$0 sm:$0xff] }
0x1817   :  { %3094 = vpow2.f32 %v2473_v52  ;;  %v2179_v52 = vld [vmem:[%s4146_s17 + $0x68] sm:$0xff] }
0x1818   :  { %v2406_v30 = vmul.f32 1.442695, %v2405_v29  ;;  %2653 = vmatpush.msra.mxu3 %v2179_v52  ;;  %v2178_v29 = vld [vmem:[%s4146_s17 + $0x60] sm:$0xff] }
0x181a   :  { %3096 = vpow2.f32 %v2406_v30  ;;  %2654 = vmatpush.msra.mxu3 %v2178_v29  ;;  %v2177_v30 = vld [vmem:[%s4146_s17 + $0x58] sm:$0xff] }
0x181c   :  { %2655 = vmatpush.msra.mxu3 %v2177_v30 }
0x181d   :  { %v3095_v31 = vpop.eup %3094 }
0x181e   :  { %v2475_v57 = vsel %vm244_vm1, %v3095_v31, 0.0 }
0x181f   :  { %2476 = vadd.xlane.f32.xlu0 %v2475_v57 }
0x1820   :  { %v3097_v32 = vpop.eup %3096 }
0x1821   :  { %v2408_v33 = vsel %vm244_vm1, %v3097_v32, 0.0 }
0x1822   :  { %2409 = vadd.xlane.f32.xlu2 %v2408_v33 }
0x1825   :  { %v2343_v35 = vpop.xlane.xlu1 %2342 }
0x1826   :  { %3098 = vrcp.f32 %v2343_v35  ;;  %v2175_v35 = vld [vmem:[%s4146_s17 + $0x48] sm:$0xff] }
0x182c   :  { %v3099_v40 = vpop.eup %3098 }
0x182d   :  { %v2345_v38 = vmul.f32 %v3099_v40, %v3093_v11 }
0x1833   :  { %2480 = vrot.lane.b32.xlu0 %v3972_v47, %s3218_s10  ;;  %s3122_s10 = sshra.s32 %s2694_s7, 4  ;;  %s3123_s10 = int_to_ptr.hbm [resolvable:$true] %s3122_s10 }
0x1834   :  { %p3127_p1 = scmp.lt.s32.totalorder %s3123_s10, %s3459_s4 }
0x183a   :  { %2413 = vrot.lane.b32.xlu2 %v3972_v47, %s3219_s11  ;;  %s3124_s11 = scalar_lea.hbm %s3123_s10, 2 }
0x183b   :  { %p3125_p0 = scmp.ne.s32.totalorder %s3123_s10, %s3124_s11 }
0x183d   :  { %v2347_v39 = vpop.permute.xlu1 %2346 }
0x183e   :  { %2367 = vmatpush.msra.mxu1 %v2347_v39 }
0x183f   :  { %2878 = vmatmul.msk.f32.vlgmr.msra.gmra.mxu1 %vm244_vm1, %v2345_v38  ;;  %v2174_v38 = vld [vmem:[%s4146_s17 + $0x40] sm:$0xff] }
0x1892   :  { %v2477_v42 = vpop.xlane.xlu0 %2476 }
0x1895   :  { %v2410_v41 = vpop.xlane.xlu2 %2409 }
0x1896   :  { %3100 = vrcp.f32 %v2410_v41  ;;  %v2173_v41 = vld [vmem:[%s4146_s17 + $0x38] sm:$0xff] }
0x1897   :  { %3102 = vrcp.f32 %v2477_v42 }
0x189c   :  { %v3101_v43 = vpop.eup %3100 }
0x189d   :  { %v2412_v44 = vmul.f32 %v3101_v43, %v3097_v32  ;;  %v2414_v4 = vpop.permute.xlu2 %2413  ;;  %v3103_v22 = vpop.eup %3102  ;;  %v2176_v32 = vld [vmem:[%s4146_s17 + $0x50] sm:$0xff] }
0x189e   :  { %2434 = vmatpush.msra.mxu2 %v2414_v4  ;;  %v2479_v47 = vmul.f32 %v3103_v22, %v3095_v31  ;;  %2656 = vmatpush.msra.mxu3 %v2176_v32 }
0x189f   :  { %2881 = vmatmul.msk.f32.vlgmr.msra.gmra.mxu2 %vm244_vm1, %v2412_v44  ;;  %v2172_v44 = vld [vmem:[%s4146_s17 + $0x30] sm:$0xff] }
0x18a0   :  { %2596 = vmatpush.msrb.mxu2 %v2164_v10  ;;  %2657 = vmatpush.msra.mxu3 %v2175_v35 }
0x18a2   :  { %2597 = vmatpush.msrb.mxu2 %v2163_v7  ;;  %2658 = vmatpush.msra.mxu3 %v2174_v38 }
0x18a4   :  { %2598 = vmatpush.msrb.mxu2 %v2162_v9  ;;  %2659 = vmatpush.msra.mxu3 %v2173_v41 }
0x18a5   :  { %v2481_v49 = vpop.permute.xlu0 %2480 }
0x18a6   :  { %2501 = vmatpush.msrb.mxu1 %v2481_v49  ;;  %2660 = vmatpush.msra.mxu3 %v2172_v44 }
0x18a7   :  { %2884 = vmatmul.msk.f32.vlgmr.msrb.gmra.mxu1 %vm244_vm1, %v2479_v47  ;;  %v2171_v47 = vld [vmem:[%s4146_s17 + $0x28] sm:$0xff] }
0x18a8   :  { %2661 = vmatpush.msra.mxu3 %v2171_v47 }
0x18bc   :  { %v2369_v50 = vpop.f32.mrf.mxu1 }
0x18bd   :  { %2507 = vrot.lane.b32.xlu0 %v2369_v50, %s3220_s15  ;;  %s3126_s15 = scalar_lea.hbm %s3459_s4, 2 }
0x18be   :  { %p3128_p2 = scmp.lt.s32.totalorder %s3126_s15, %s3124_s11 }
0x18c0   :  { %p3129_p3 = por %p3128_p2, %p3127_p1 }
0x18c2   :  { %p3130_p4 = pnand %p3129_p3, %p3125_p0 }
0x1922   :  { %v2436_v46 = vpop.f32.mrf.mxu2 }
0x1923   :  { %2511 = vrot.lane.b32.xlu1 %v2436_v46, %s3221_s16  ;;  %v2170_v46 = vld [vmem:[%s4146_s17 + $0x20] sm:$0xff] }
0x1924   :  { %v2503_v25 = vpop.f32.mrf.mxu1  ;;  %2662 = vmatpush.msra.mxu3 %v2170_v46 }
0x1925   :  { %2515 = vrot.lane.b32.xlu2 %v2503_v25, %s3222_s18 }
0x1926   :  { %2663 = vmatpush.msra.mxu3 %v2169_v51 }
0x1928   :  { %2664 = vmatpush.msra.mxu3 %v2168_v58 }
0x192f   :  { %v2508_v23 = vpop.permute.xlu0 %2507 }
0x1930   :  { %v2518_v37 = vsel %vm244_vm1, %v4005_v12, %v2508_v23 }
0x197f   :  { %v2516_v59 = vpop.permute.xlu2 %2515 }
0x1995   :  { %v2512_v60 = vpop.permute.xlu1 %2511 }
0x1996   :  { %v2519_v61 = vsel %vm838_vm14, %v2518_v37, %v2512_v60  ;;  %v2167_v37 = vld [vmem:[%s4146_s17 + $0x8] sm:$0xff] }
0x1997   :  { %v2520_v17 = vsel %vm841_vm15, %v2519_v61, %v2516_v59  ;;  %2665 = vmatpush.msra.mxu3 %v2167_v37  ;;  %v2166_v59 = vld [vmem:[%s4146_s17] sm:$0xff] }
0x1998   :  { %2885 = vmatmul.msk.f32.vlgmr.msrb.gmra.mxu0 %vm312_vm2, %v2520_v17 }
0x1999   :  { %2666 = vmatpush.msra.mxu3 %v2166_v59 }
0x1a15   :  { %v2544_v28 = vpop.f32.mrf.mxu0 }
0x1a16   :  { %v2545_v63 = vadd.f32 %v2981_v62, %v2544_v28 }
0x1a18   :  { %v4035_v0 = vadd.f32 %v2545_v63, %v3941_v55  ;;  %v2161_v55 = vld [vmem:[%s4143_s5] sm:$0xff] }
0x1a19   :  { %2599 = vmatpush.msrb.mxu2 %v2161_v55 }
0x1a1a   :  { %v2548_v1 = vsel %vm312_vm2, %v4035_v0, 0.0 }
0x1a1b   :  { %2549 = vadd.xlane.f32.xlu0 %v2548_v1 }
0x1a8e   :  { %v2550_v34 = vpop.xlane.xlu0 %2549 }
0x1a8f   :  { %v2551_v2 = vmul.f32 %v2550_v34, %v3487_v36 }
0x1a91   :  { %v2552_v48 = vsub.f32 %v4035_v0, %v2551_v2 }
0x1a93   :  { %v2553_v3 = vmul.f32 %v2552_v48, %v2552_v48 }
0x1a95   :  { %v2554_v6 = vsel %vm312_vm2, %v2553_v3, 0.0 }
0x1a96   :  { %2555 = vadd.xlane.f32.xlu1 %v2554_v6 }
0x1b09   :  { %v2556_v12 = vpop.xlane.xlu1 %2555 }
0x1b0a   :  { %v2557_v13 = vmul.f32 %v2556_v12, %v3487_v36 }
0x1b0c   :  { %v2558_v45 = vadd.f32 1e-05, %v2557_v13 }
0x1b0e   :  { %3104 = vrsqrt.f32 %v2558_v45  ;;  %vm2565_vm14 = vweird.f32 %v2558_v45 }
0x1b14   :  { %v3105_v14 = vpop.eup %3104 }
0x1b15   :  { %v2560_v15 = vmul.f32 %v3105_v14, %v2558_v45  ;;  %vm2566_vm1 = vweird.f32 %v3105_v14 }
0x1b16   :  { %vm2567_vm15 = vmor %vm2565_vm14, %vm2566_vm1 }
0x1b17   :  { %v2561_v16 = vmul.f32 %v3105_v14, %v2560_v15 }
0x1b19   :  { %v2562_v18 = vmul.f32 0.5, %v2561_v16 }
0x1b1b   :  { %v2563_v54 = vsub.f32 1.5, %v2562_v18 }
0x1b1d   :  { %v2564_v20 = vmul.f32 %v3105_v14, %v2563_v54 }
0x1b1f   :  { %v2568_v19 = vsel %vm2567_vm15, %v3105_v14, %v2564_v20 }
0x1b20   :  { %v2569_v36 = vmul.f32 %v2568_v19, %v2552_v48 }
0x1b22   :  { %v2573_v11 = vmul.f32 %v2982_v21, %v2569_v36 }
0x1b24   :  { %v2577_v24 = vadd.f32 %v2983_v5, %v2573_v11 }
0x1b26   :  { %2886 = vmatmul.msk.f32.vlgmr.msrb.gmra.mxu2 %vm312_vm2, %v2577_v24 }
0x1ba9   :  { %v2601_v31 = vpop.f32.mrf.mxu2 }
0x1baa   :  { %v4056_v57 = vadd.f32 %v2984_v27, %v2601_v31 }
0x1bac   :  { %v2605_v33 = vmul.f32 0.70710677, %v4056_v57  ;;  %v2604_v54 = vmul.f32 0.5, %v4056_v57 }
0x1bae   :  { %v2606_v40 = vmul.f32 %v2605_v33, %v2605_v33 }
0x1bb0   :  { %v2607_v39 = vmin.f32 %v2606_v40, 16.0 }
0x1bb2   :  { %v2608_v42 = vmul.f32 2.1237322e-06, %v2607_v39  ;;  %v2619_v43 = vmul.f32 3.8918573e-05, %v2607_v39 }
0x1bb4   :  { %v2609_v4 = vadd.f32 0.00028619796, %v2608_v42  ;;  %v2620_v22 = vadd.f32 0.001143296, %v2619_v43 }
0x1bb6   :  { %v2610_v49 = vmul.f32 %v2609_v4, %v2607_v39  ;;  %v2621_v50 = vmul.f32 %v2620_v22, %v2607_v39 }
0x1bb8   :  { %v2622_v25 = vadd.f32 0.014752088, %v2621_v50  ;;  %v2611_v53 = vadd.f32 0.0036580483, %v2610_v49 }
0x1bba   :  { %v2623_v56 = vmul.f32 %v2622_v25, %v2607_v39  ;;  %v2612_v60 = vmul.f32 %v2611_v53, %v2607_v39 }
0x1bbc   :  { %v2624_v23 = vadd.f32 0.112945676, %v2623_v56  ;;  %v2613_v62 = vadd.f32 0.05243302, %v2612_v60 }
0x1bbe   :  { %v2625_v61 = vmul.f32 %v2624_v23, %v2607_v39  ;;  %v2614_v1 = vmul.f32 %v2613_v62, %v2607_v39 }
0x1bc0   :  { %v2626_v17 = vadd.f32 0.4994258, %v2625_v61  ;;  %v2615_v34 = vadd.f32 0.18741608, %v2614_v1 }
0x1bc2   :  { %v2627_v28 = vmul.f32 %v2626_v17, %v2607_v39  ;;  %v2616_v48 = vmul.f32 %v2615_v34, %v2607_v39 }
0x1bc4   :  { %v2628_v63 = vadd.f32 1.0, %v2627_v28  ;;  %v2617_v7 = vadd.f32 1.1283791, %v2616_v48 }
0x1bc6   :  { %3106 = vrcp.f32 %v2628_v63  ;;  %v2640_v10 = vand.u32 2147483648, %v2628_v63  ;;  %v2638_v55 = vand.u32 2147483647, %v2628_v63  ;;  %vm2634_vm12 = vweird.f32 %v2628_v63 }
0x1bc7   :  { %v2618_v45 = vmul.f32 %v2617_v7, %v2605_v33 }
0x1bc8   :  { %v2641_v13 = vor.u32 1.1754944e-38, %v2640_v10  ;;  %vm2639_vm9 = vcmp.eq.f32.partialorder %v2638_v55, 8.507059e+37 }
0x1bcc   :  { %v3107_v2 = vpop.eup %3106 }
0x1bcd   :  { %v2630_v3 = vmul.f32 %v3107_v2, %v2628_v63  ;;  %vm2635_vm11 = vweird.f32 %v3107_v2 }
0x1bce   :  { %vm2636_vm8 = vmor %vm2634_vm12, %vm2635_vm11 }
0x1bcf   :  { %v2631_v6 = vsub.f32 1.0, %v2630_v3 }
0x1bd1   :  { %v2632_v9 = vmul.f32 %v3107_v2, %v2631_v6 }
0x1bd3   :  { %v2633_v12 = vadd.f32 %v3107_v2, %v2632_v9 }
0x1bd5   :  { %v2637_v14 = vsel %vm2636_vm8, %v3107_v2, %v2633_v12 }
0x1bd6   :  { %v2642_v15 = vsel %vm2639_vm9, %v2641_v13, %v2637_v14 }
0x1bd7   :  { %v2643_v16 = vmul.f32 %v2642_v15, %v2618_v45 }
0x1bd9   :  { %v2887_v18 = vclamps-f32 %v2643_v16, 1.0 }
0x1bdb   :  { %v2646_v20 = vadd.f32 1.0, %v2887_v18 }
0x1bdd   :  { %v2647_v21 = vmul.f32 %v2646_v20, %v2604_v54 }
0x1bdf   :  { %2667 = vmatmul.f32.vlgmr.msra.gmra.mxu3 %v2647_v21 }
0x1be0   :  { %3133 = shalt.err (!%p3130_p4)
}
0x1be1   :  { %2696 = dma.vmem_to_hbm [thread:$0]  %s2692_s19, 32, %s2694_s7, [#allocation5]  }
0x1be2   :  { %s4148_s16 = sld [smem:[#allocation28_spill]]  ;;  %s3225_s18 = smov [#allocation2]  }
0x1be3   :  { %s2680_s25 = sshll.u32 %s3225_s18, 4  ;;  %s2682_s24 = sshll.u32 %s3454_s8, 4  ;;  %s2681_s25 = int_to_ptr.vmem [resolvable:$true] %s2680_s25  ;;  %s2683_s24 = int_to_ptr.hbm [resolvable:$true] %s2682_s24 }
0x1be4   :  { %s3146_s4 = sshra.s32 %s2683_s24, 4  ;;  %s3150_s6 = scalar_lea.hbm %s3454_s8, 8  ;;  %s3147_s4 = int_to_ptr.hbm [resolvable:$true] %s3146_s4 }
0x1be5   :  { %s3148_s30 = scalar_lea.hbm %s3147_s4, 8  ;;  %p3151_p6 = scmp.lt.s32.totalorder %s3147_s4, %s3454_s8 }
0x1be6   :  { %p3149_p5 = scmp.ne.s32.totalorder %s3147_s4, %s3148_s30  ;;  %p3152_p7 = scmp.lt.s32.totalorder %s3150_s6, %s3148_s30 }
0x1be8   :  { %v2985_v19 = vld [vmem:[%s4148_s16] ss:$0 sm:$0xff]  ;;  %p3153_p8 = por %p3152_p7, %p3151_p6 }
0x1bea   :  { %p3154_p9 = pnand %p3153_p8, %p3149_p5 }
0x1c62   :  { %v2668_v36 = vpop.f32.mrf.mxu3 }
0x1c63   :  { %v2669_v5 = vadd.f32 %v2985_v19, %v2668_v36 }
0x1c65   :  { %v2671_v11 = vadd.f32 %v2669_v5, %v4035_v0 }
0x1c67   :  { %2672 = vst.msk [vmem:[#allocation2] sm:$0xff] %vm312_vm2, %v2671_v11 }
0x1c68   :  { %3157 = shalt.err (!%p3154_p9)
}
0x1c69   :  { %2685 = dma.vmem_to_hbm [thread:$0]  %s2681_s25, 128, %s2683_s24, [#allocation3]  }
0x1c6a   :  { %3158 = dma.done.wait [#allocation3], 128  }
0x1c6b   :  { %3159 = vsyncadd [#allocation3], 4294967168 }
0x1c6c   :  { %3160 = dma.done.wait [#allocation5], 32  }
0x1c6d   :  { %3161 = vsyncadd [#allocation5], 4294967264 }
0x1c6e   :  { %2707 = vsyncpa [#allocation3], 1 }
0x1c6f   :  { %2708 = vsyncpa [#allocation5], 1 }

</bundles_post_ra>
